<compile_context>
chip_gen: v7x
topology: tpu7x:2x2x1
jax: 0.10.0
libtpu: 0.0.40
codegen_flags: <defaults>
</compile_context>

<pallas_src>
import jax
import jax.numpy as jnp
from jax.experimental import pallas as pl
from jax.experimental.pallas import tpu as pltpu

H_DIM = 32    # h_dim of the module (f1 + f2)
H1 = 1600     # fc1 out
H2 = 200      # fc2 out


def _round_up(x, k):
    return ((x + k - 1) // k) * k


def _elementwise_dtype():
    """bf16 fc1 elementwise on chips with a bf16 VPU (v6e/v7x); f32 on v5e and older."""
    try:
        kind = jax.devices()[0].device_kind.lower()
    except Exception:
        return jnp.float32
    if any(tag in kind for tag in ("v2", "v3", "v4", "v5")):
        return jnp.float32
    return jnp.bfloat16


def relation1_kernel(a_ref, b_ref, w2_ref, b2_ref, w3_ref, b3_ref, out_ref):
    # a_ref : (tn, H1P)      = x1_tile @ W1a              (precomputed in wrapper)
    # b_ref : (tm, H1P)      = x2_tile @ W1b + b1         (precomputed in wrapper)
    # w2_ref: (H1P, H2P) bf16,  b2_ref/w3_ref: (1, H2P) f32,  b3_ref: (1,) f32 in SMEM
    a = a_ref[...]
    b = b_ref[...]
    tn, h1p = a.shape
    tm = b.shape[0]
    h2p = w2_ref.shape[1]

    # fc1 for the (tn, tm) pair tile via broadcast-add of the precomputed halves.
    # dtype follows a/b: bf16 on v6e/v7x (packed-bf16 VPU), f32 on v5e.
    h = jnp.maximum(a[:, None, :] + b[None, :, :], 0.0)             # (tn, tm, H1P)
    # tm is a multiple of 8 -> the reshape is a cheap sublane merge.
    h = h.reshape(tn * tm, h1p).astype(jnp.bfloat16)

    # fc2 (+ bias, ReLU): FLOP-dominant MXU matmul, bf16 operands / f32 accumulation.
    z = jnp.dot(h, w2_ref[...], preferred_element_type=jnp.float32) + b2_ref[...]
    z = jnp.maximum(z, 0.0)                                          # (tn*tm, H2P) f32

    # fc3 (output dim 1): fold the two 128-lane halves on the VPU (fused with the
    # w3 multiply), then a single 128-lane XLU reduction per row.
    if h2p % 256 == 0:
        half = h2p // 2
        zf = z[:, :half] * w3_ref[:, :half] + z[:, half:] * w3_ref[:, half:]
    else:
        zf = z * w3_ref[...]
    o = jnp.sum(zf.reshape(tn, tm, zf.shape[-1]), axis=-1) + b3_ref[0]   # (tn, tm)
    out_ref[...] = o.astype(out_ref.dtype)


def relation1(x1, x2, params, *, tn=16, tm=128, elementwise_dtype=None):
    """Pairwise relation scores, shape (n, m)."""
    w1, b1, w2, b2, w3, b3 = params      # weights stored (in_features, out_features)
    n, f1 = x1.shape
    m, f2 = x2.shape
    h_dim, h1 = w1.shape
    h2 = w2.shape[1]
    assert f1 + f2 == h_dim

    ew_dtype = _elementwise_dtype() if elementwise_dtype is None else elementwise_dtype
    ew_bytes = jnp.dtype(ew_dtype).itemsize

    # Zero-pad hidden dims to lane multiples of 128 (1600 -> 1664, 200 -> 256).
    # relu(0)=0 and zero weight rows/cols contribute nothing -> no semantic change.
    h1p = _round_up(h1, 128)
    h2p = _round_up(h2, 128)
    w1p = jnp.pad(w1, ((0, 0), (0, h1p - h1)))
    b1p = jnp.pad(b1, ((0, h1p - h1),))
    w2p = jnp.pad(w2, ((0, h1p - h1), (0, h2p - h2))).astype(jnp.bfloat16)
    b2p = jnp.pad(b2, ((0, h2p - h2),)).reshape(1, h2p).astype(jnp.float32)
    w3p = jnp.pad(w3[:, 0], ((0, h2p - h2),)).reshape(1, h2p).astype(jnp.float32)
    b3v = b3.reshape(1).astype(jnp.float32)

    # Clamp tiles to the (8-aligned) problem size and pad n/m up to tile multiples.
    tn = min(_round_up(tn, 8), _round_up(n, 8))
    tm = min(_round_up(tm, 8), _round_up(m, 8))
    n_pad = _round_up(n, tn)
    m_pad = _round_up(m, tm)
    x1p = jnp.pad(x1, ((0, n_pad - n), (0, 0)))
    x2p = jnp.pad(x2, ((0, m_pad - m), (0, 0)))

    # Hoist both per-row halves of fc1 out of the grid loop (computed once, reused
    # by every (i, j) pair tile).  b1 is folded into the x2 half.  Stored in the
    # elementwise dtype (bf16 on v6e/v7x) to halve DMA bytes and the VPU sweep.
    a_all = (x1p @ w1p[:f1]).astype(ew_dtype)                        # (n_pad, H1P)
    b_all = (x2p @ w1p[f1:] + b1p[None, :]).astype(ew_dtype)         # (m_pad, H1P)

    n_blocks = n_pad // tn
    m_blocks = m_pad // tm

    # Grid order: lead with the m axis so the large b-tile's block index is constant
    # along the fast (inner) n axis -> Pallas keeps it resident and only the small
    # a-tile is DMA'd per step.  If m has a single block, lead with n instead so
    # megacore sharding (v7x, 2 TCs) gets >= 2 blocks on the leading parallel axis.
    if m_blocks > 1:
        grid = (m_blocks, n_blocks)
        a_map = lambda j, i: (i, 0)
        b_map = lambda j, i: (j, 0)
        o_map = lambda j, i: (i, j)
    else:
        grid = (n_blocks, m_blocks)
        a_map = lambda i, j: (i, 0)
        b_map = lambda i, j: (j, 0)
        o_map = lambda i, j: (i, j)

    # VMEM budget derived from the chosen tile: double-buffered streaming tiles,
    # (possibly double-buffered) resident weights, and in-kernel intermediates
    # (broadcast-add result + bf16 h + f32 z), plus slack.  Clamp to [32, 64] MiB
    # so a v5e/v6e-tuned tile never requests more than v7x's physical VMEM.
    io_bytes = 2 * (tn * h1p * ew_bytes + tm * h1p * ew_bytes + tn * tm * 4)
    w_bytes = 2 * h1p * h2p * 2 + 4 * h2p * 4
    inter_bytes = tn * tm * h1p * (ew_bytes + 2) + tn * tm * h2p * 4
    vmem_limit = int(max(32 << 20, min(64 << 20, io_bytes + w_bytes + inter_bytes + (12 << 20))))

    out = pl.pallas_call(
        relation1_kernel,
        out_shape=jax.ShapeDtypeStruct((n_pad, m_pad), jnp.float32),
        grid_spec=pltpu.PrefetchScalarGridSpec(
            num_scalar_prefetch=0,
            grid=grid,
            in_specs=[
                pl.BlockSpec((tn, h1p), a_map),                      # x1 half of fc1
                pl.BlockSpec((tm, h1p), b_map),                      # x2 half of fc1 (+b1)
                pl.BlockSpec((h1p, h2p), lambda u, v: (0, 0)),       # W2 (bf16, resident)
                pl.BlockSpec((1, h2p), lambda u, v: (0, 0)),         # b2
                pl.BlockSpec((1, h2p), lambda u, v: (0, 0)),         # w3 row
                pl.BlockSpec(memory_space=pltpu.MemorySpace.SMEM),   # b3 scalar
            ],
            out_specs=pl.BlockSpec((tn, tm), o_map),
        ),
        compiler_params=pltpu.CompilerParams(
            dimension_semantics=("parallel", "parallel"),
            vmem_limit_bytes=vmem_limit,
        ),
    )(a_all, b_all, w2p, b2p, w3p, b3v)
    return out[:n, :m]


def init_params(key, h_dim=H_DIM):
    # nn.Linear-style init: U(+/- 1/sqrt(fan_in)); weights stored (in, out).
    k = jax.random.split(key, 6)
    s1 = 1.0 / jnp.sqrt(jnp.float32(h_dim))
    s2 = 1.0 / jnp.sqrt(jnp.float32(H1))
    s3 = 1.0 / jnp.sqrt(jnp.float32(H2))
    w1 = jax.random.uniform(k[0], (h_dim, H1), jnp.float32, -s1, s1)
    b1 = jax.random.uniform(k[1], (H1,), jnp.float32, -s1, s1)
    w2 = jax.random.uniform(k[2], (H1, H2), jnp.float32, -s2, s2)
    b2 = jax.random.uniform(k[3], (H2,), jnp.float32, -s2, s2)
    w3 = jax.random.uniform(k[4], (H2, 1), jnp.float32, -s3, s3)
    b3 = jax.random.uniform(k[5], (1,), jnp.float32, -s3, s3)
    return (w1, b1, w2, b2, w3, b3)


def relation1_ref(x1, x2, params):
    # Pure-JAX reference matching the PyTorch forward exactly (f32 everywhere).
    w1, b1, w2, b2, w3, b3 = params
    n, m = x1.shape[0], x2.shape[0]
    x1e = jnp.broadcast_to(x1[:, None, :], (n, m, x1.shape[1]))
    x2e = jnp.broadcast_to(x2[None, :, :], (n, m, x2.shape[1]))
    x = jnp.concatenate([x1e, x2e], axis=2)
    h = jax.nn.relu(x @ w1 + b1)
    h = jax.nn.relu(h @ w2 + b2)
    return (h @ w3 + b3)[..., 0]


if __name__ == "__main__":
    key = jax.random.PRNGKey(0)
    kx1, kx2, kp, kx3, kx4 = jax.random.split(key, 5)

    f1 = f2 = H_DIM // 2
    params = init_params(kp)

    # Small case (single-block grid, masked-lane output path).
    n, m = 16, 8
    x1 = jax.random.normal(kx1, (n, f1), jnp.float32)
    x2 = jax.random.normal(kx2, (m, f2), jnp.float32)
    out = jax.block_until_ready(relation1(x1, x2, params))
    ref = relation1_ref(x1, x2, params)
    assert out.shape == (n, m)
    # fc1 elementwise may run in bf16 and fc2 uses bf16 MXU operands (f32 acc)
    # -> slightly loose tolerance vs the all-f32 reference.
    assert jnp.allclose(out, ref, atol=2e-2, rtol=2e-2), float(jnp.max(jnp.abs(out - ref)))

    # Multi-block case (exercises the reordered grid with the resident b-tile
    # and the n/m padding slices).
    n2, m2 = 48, 300
    x1b = jax.random.normal(kx3, (n2, f1), jnp.float32)
    x2b = jax.random.normal(kx4, (m2, f2), jnp.float32)
    out2 = jax.block_until_ready(relation1(x1b, x2b, params))
    ref2 = relation1_ref(x1b, x2b, params)
    assert out2.shape == (n2, m2)
    assert jnp.allclose(out2, ref2, atol=2e-2, rtol=2e-2), float(jnp.max(jnp.abs(out2 - ref2)))

    print("KERNEL_OK")
</pallas_src>

<mosaic_0001>
module attributes {stable_mosaic.version = 11 : i64} {
  func.func @relation1_kernel(%arg0: i32, %arg1: i32, %arg2: memref<16x1664xbf16, #tpu.memory_space<vmem>>, %arg3: memref<8x1664xbf16, #tpu.memory_space<vmem>>, %arg4: memref<1664x256xbf16, #tpu.memory_space<vmem>>, %arg5: memref<1x256xf32, #tpu.memory_space<vmem>>, %arg6: memref<1x256xf32, #tpu.memory_space<vmem>>, %arg7: memref<1xf32, #tpu.memory_space<smem>>, %arg8: memref<16x8xf32, #tpu.memory_space<vmem>>) attributes {dimension_semantics = [#tpu.dimension_semantics<parallel>, #tpu.dimension_semantics<parallel>], iteration_bounds = array<i64: 1, 1>, scalar_prefetch = 0 : i64, scratch_operands = 0 : i64, tpu.core_type = #tpu.core_type<tc>, window_params = [{transform_indices = @transform_0, window_bounds = array<i64: 16, 1664>}, {transform_indices = @transform_1, window_bounds = array<i64: 8, 1664>}, {pipeline_mode = #tpu.pipeline_mode<synchronous>, transform_indices = @transform_2, window_bounds = array<i64: 1664, 256>}, {pipeline_mode = #tpu.pipeline_mode<synchronous>, transform_indices = @transform_3, window_bounds = array<i64: 1, 256>}, {pipeline_mode = #tpu.pipeline_mode<synchronous>, transform_indices = @transform_4, window_bounds = array<i64: 1, 256>}, {transform_indices = @transform_5, window_bounds = array<i64: 1>}, {transform_indices = @transform_6, window_bounds = array<i64: 16, 8>}]} {
    %c0 = arith.constant 0 : index
    %c0_0 = arith.constant 0 : index
    %0 = vector.load %arg2[%c0, %c0_0] : memref<16x1664xbf16, #tpu.memory_space<vmem>>, vector<16x1664xbf16>
    %c0_1 = arith.constant 0 : index
    %c0_2 = arith.constant 0 : index
    %1 = vector.load %arg3[%c0_1, %c0_2] : memref<8x1664xbf16, #tpu.memory_space<vmem>>, vector<8x1664xbf16>
    %2 = vector.shape_cast %0 : vector<16x1664xbf16> to vector<16x1x1664xbf16>
    %3 = vector.shape_cast %1 : vector<8x1664xbf16> to vector<1x8x1664xbf16>
    %4 = vector.broadcast %2 : vector<16x1x1664xbf16> to vector<16x8x1664xbf16>
    %5 = vector.broadcast %3 : vector<1x8x1664xbf16> to vector<16x8x1664xbf16>
    %6 = arith.addf %4, %5 : vector<16x8x1664xbf16>
    %cst = arith.constant 0.000000e+00 : bf16
    %7 = vector.broadcast %cst : bf16 to vector<16x8x1664xbf16>
    %8 = arith.maximumf %6, %7 : vector<16x8x1664xbf16>
    %9 = vector.shape_cast %8 : vector<16x8x1664xbf16> to vector<128x1664xbf16>
    %c0_3 = arith.constant 0 : index
    %c0_4 = arith.constant 0 : index
    %10 = vector.load %arg4[%c0_3, %c0_4] : memref<1664x256xbf16, #tpu.memory_space<vmem>>, vector<1664x256xbf16>
    %cst_5 = arith.constant dense<0.000000e+00> : vector<128x256xf32>
    %11 = tpu.matmul %9, %10, %cst_5 {dimension_numbers = #tpu.dot_dimension_numbers<[1], [0], [0], [1], [0, 0, 1, 1], [], []>} : vector<128x1664xbf16>, vector<1664x256xbf16>, vector<128x256xf32> -> vector<128x256xf32>
    %c0_6 = arith.constant 0 : index
    %c0_7 = arith.constant 0 : index
    %12 = vector.load %arg5[%c0_6, %c0_7] : memref<1x256xf32, #tpu.memory_space<vmem>>, vector<1x256xf32>
    %13 = vector.broadcast %12 : vector<1x256xf32> to vector<128x256xf32>
    %14 = arith.addf %11, %13 : vector<128x256xf32>
    %cst_8 = arith.constant 0.000000e+00 : f32
    %15 = vector.broadcast %cst_8 : f32 to vector<128x256xf32>
    %16 = arith.maximumf %14, %15 : vector<128x256xf32>
    %17 = vector.extract_strided_slice %16 {offsets = [0, 0], sizes = [128, 128], strides = [1, 1]} : vector<128x256xf32> to vector<128x128xf32>
    %c0_9 = arith.constant 0 : index
    %c0_10 = arith.constant 0 : index
    %18 = vector.load %arg6[%c0_9, %c0_10] : memref<1x256xf32, #tpu.memory_space<vmem>>, vector<1x128xf32>
    %19 = vector.broadcast %18 : vector<1x128xf32> to vector<128x128xf32>
    %20 = arith.mulf %17, %19 : vector<128x128xf32>
    %21 = vector.extract_strided_slice %16 {offsets = [0, 128], sizes = [128, 128], strides = [1, 1]} : vector<128x256xf32> to vector<128x128xf32>
    %c0_11 = arith.constant 0 : index
    %c128 = arith.constant 128 : index
    %22 = vector.load %arg6[%c0_11, %c128] : memref<1x256xf32, #tpu.memory_space<vmem>>, vector<1x128xf32>
    %23 = vector.broadcast %22 : vector<1x128xf32> to vector<128x128xf32>
    %24 = arith.mulf %21, %23 : vector<128x128xf32>
    %25 = arith.addf %20, %24 : vector<128x128xf32>
    %26 = vector.shape_cast %25 : vector<128x128xf32> to vector<16x8x128xf32>
    %cst_12 = arith.constant dense<0.000000e+00> : vector<16x8xf32>
    %27 = vector.multi_reduction <add>, %26, %cst_12 [2] : vector<16x8x128xf32> to vector<16x8xf32>
    %c0_13 = arith.constant 0 : index
    %28 = memref.load %arg7[%c0_13] : memref<1xf32, #tpu.memory_space<smem>>
    %29 = vector.broadcast %28 : f32 to vector<16x8xf32>
    %30 = arith.addf %27, %29 : vector<16x8xf32>
    %c0_14 = arith.constant 0 : index
    %c0_15 = arith.constant 0 : index
    %31 = vector.load %arg8[%c0_14, %c0_15] : memref<16x8xf32, #tpu.memory_space<vmem>>, vector<16x8xf32>
    tpu.vector_store %arg8[%c0_14, %c0_15], %30 {strides = array<i32>} : memref<16x8xf32, #tpu.memory_space<vmem>>, vector<16x8xf32>,
    return
  }
  func.func @transform_0(%arg0: i32, %arg1: i32) -> (i32, i32) {
    %c0_i32 = arith.constant 0 : i32
    %c0_i32_0 = arith.constant 0 : i32
    return %arg0, %c0_i32 : i32, i32
  }
  func.func @transform_1(%arg0: i32, %arg1: i32) -> (i32, i32) {
    %c0_i32 = arith.constant 0 : i32
    %c0_i32_0 = arith.constant 0 : i32
    return %arg1, %c0_i32 : i32, i32
  }
  func.func @transform_2(%arg0: i32, %arg1: i32) -> (i32, i32) {
    %c0_i32 = arith.constant 0 : i32
    %c0_i32_0 = arith.constant 0 : i32
    %c0_i32_1 = arith.constant 0 : i32
    return %c0_i32, %c0_i32_0 : i32, i32
  }
  func.func @transform_3(%arg0: i32, %arg1: i32) -> (i32, i32) {
    %c0_i32 = arith.constant 0 : i32
    %c0_i32_0 = arith.constant 0 : i32
    %c0_i32_1 = arith.constant 0 : i32
    return %c0_i32, %c0_i32_0 : i32, i32
  }
  func.func @transform_4(%arg0: i32, %arg1: i32) -> (i32, i32) {
    %c0_i32 = arith.constant 0 : i32
    %c0_i32_0 = arith.constant 0 : i32
    %c0_i32_1 = arith.constant 0 : i32
    return %c0_i32, %c0_i32_0 : i32, i32
  }
  func.func @transform_5(%arg0: i32, %arg1: i32) -> i32 {
    %c0_i32 = arith.constant 0 : i32
    %c0_i32_0 = arith.constant 0 : i32
    return %c0_i32 : i32
  }
  func.func @transform_6(%arg0: i32, %arg1: i32) -> (i32, i32) {
    %c0_i32 = arith.constant 0 : i32
    return %arg0, %arg1 : i32, i32
  }
}

</mosaic_0001>

<bundles_post_ra>
// kernel: tpu_custom_call.1
= control target key start
LH: loop header
LB: loop body
LE: loop exit
PB: predicated region body
PF: predicated region fallthrough
CT: control target
= control target key end

     0   :  { %12 = vsyncpa [#allocation4], 0  ;;  %s8769_s0 = inlined_call_operand.hbm [shape: bf16[16,1664], index: 0, kind: input, shape index: {}]   ;;  %s8770_s1 = inlined_call_operand.hbm [shape: bf16[8,1664], index: 1, kind: input, shape index: {}]   ;;  %s8771_s2 = inlined_call_operand.hbm [shape: bf16[1664,256], index: 2, kind: input, shape index: {}]   ;;  %s8772_s3 = inlined_call_operand.vmem [shape: f32[1,256], index: 3, kind: input, shape index: {}]   ;;  %s8773_s4 = inlined_call_operand.vmem [shape: f32[1,256], index: 4, kind: input, shape index: {}]   ;;  %s8774_s5 = inlined_call_operand.<no memory space> [shape: f32[1], index: 5, kind: input, shape index: {}]   ;;  %s8775_s6 = inlined_call_operand.vmem [shape: f32[16,8], index: 6, kind: output, shape index: {}]  }
   0x1   :  { %13 = vsyncpa [#allocation6], 0  ;;  %s7129_s21 = smov [#allocation5]   ;;  %s7130_s23 = smov [#allocation3]  }
   0x2   :  { %s32_s22 = sshll.u32 %s7129_s21, 4  ;;  %s19_s24 = sshll.u32 %s7130_s23, 4  ;;  %s33_s22 = int_to_ptr.vmem [resolvable:$true] %s32_s22  ;;  %s7173_s24 = int_to_ptr.vmem [resolvable:$true] %s19_s24 }
   0x3   :  { %s7059_s27 = scalar_lea.hbm %s8770_s1, 832 }
   0x4   :  { %p7060_p0 = scmp.ne.s32.totalorder %s8770_s1, %s7059_s27  ;;  %p7063_p1 = scmp.lt.u32.totalorder %s7059_s27, %s8770_s1 }
   0x6   :  { %p7065_p2 = pnand %p7063_p1, %p7060_p0 }
   0x8   :  { %7068 = shalt.err (!%p7065_p2)
}
   0x9   :  { %s7069_s8 = scalar_lea.vmem %s33_s22, 832  ;;  %p7074_p4 = scmp.lt.s32.totalorder %s33_s22, %s33_s22 }
   0xa   :  { %p7070_p3 = scmp.ne.s32.totalorder %s33_s22, %s7069_s8  ;;  %p7075_p5 = scmp.lt.s32.totalorder %s7069_s8, %s7069_s8 }
   0xc   :  { %p7076_p6 = por %p7075_p5, %p7074_p4 }
   0xe   :  { %p7077_p7 = pnand %p7076_p6, %p7070_p3 }
  0x10   :  { %7080 = shalt.err (!%p7077_p7)
}
  0x11   :  { %35 = dma.hbm_to_vmem [thread:$0]  %s8770_s1, 832, %s33_s22, [#allocation6]  }
  0x12   :  { %s7081_s13 = scalar_lea.hbm %s8769_s0, 1664 }
  0x13   :  { %p7082_p8 = scmp.ne.s32.totalorder %s8769_s0, %s7081_s13  ;;  %p7085_p9 = scmp.lt.u32.totalorder %s7081_s13, %s8769_s0 }
  0x15   :  { %p7087_p10 = pnand %p7085_p9, %p7082_p8 }
  0x17   :  { %7090 = shalt.err (!%p7087_p10)
}
  0x18   :  { %s7091_s18 = scalar_lea.vmem %s7173_s24, 1664  ;;  %p7096_p12 = scmp.lt.s32.totalorder %s7173_s24, %s7173_s24 }
  0x19   :  { %p7092_p11 = scmp.ne.s32.totalorder %s7173_s24, %s7091_s18  ;;  %p7097_p13 = scmp.lt.s32.totalorder %s7091_s18, %s7091_s18 }
  0x1b   :  { %p7098_p0 = por %p7097_p13, %p7096_p12 }
  0x1d   :  { %p7099_p1 = pnand %p7098_p0, %p7092_p11 }
  0x1f   :  { %7102 = shalt.err (!%p7099_p1)
}
  0x20   :  { %s7131_s1 = smov 832   ;;  %s7132_s19 = smov 52  }
  0x21   :  { %25 = dma.hbm_to_vmem [thread:$0]  %s8769_s0, 1664, %s7173_s24, [#allocation4], %s7131_s1, %s7131_s1, %s7132_s19  }
  0x22   :  { %s7133_s22 = smov [#allocation7]   ;;  %s7103_s27 = scalar_lea.hbm %s8771_s2, 26624 }
  0x23   :  { %s41_s23 = sshll.u32 %s7133_s22, 4  ;;  %p7104_p2 = scmp.ne.s32.totalorder %s8771_s2, %s7103_s27  ;;  %s42_s23 = int_to_ptr.vmem [resolvable:$true] %s41_s23 }
  0x24   :  { %p7107_p3 = scmp.lt.u32.totalorder %s7103_s27, %s8771_s2 }
  0x26   :  { %p7109_p4 = pnand %p7107_p3, %p7104_p2 }
  0x28   :  { %7112 = shalt.err (!%p7109_p4)
}
  0x29   :  { %s7113_s8 = scalar_lea.vmem %s42_s23, 26624  ;;  %p7118_p6 = scmp.lt.s32.totalorder %s42_s23, %s42_s23 }
  0x2a   :  { %p7114_p5 = scmp.ne.s32.totalorder %s42_s23, %s7113_s8  ;;  %p7119_p7 = scmp.lt.s32.totalorder %s7113_s8, %s7113_s8 }
  0x2c   :  { %p7120_p8 = por %p7119_p7, %p7118_p6 }
  0x2e   :  { %p7121_p9 = pnand %p7120_p8, %p7114_p5 }
  0x30   :  { %7124 = shalt.err (!%p7121_p9)
}
  0x31   :  { %s7134_s0 = smov 128   ;;  %s7135_s24 = smov 8  }
  0x32   :  { %47 = dma.hbm_to_vmem [thread:$0]  %s8771_s2, 26624, %s42_s23, [#allocation6], %s7134_s0, %s7134_s0, %s7135_s24  }
  0x33   :  { %7125 = dma.done.wait [#allocation4], 1664  }
  0x34   :  { %7126 = vsyncadd [#allocation4], 4294965632 }
  0x35   :  { %7127 = dma.done.wait [#allocation6], 27456  }
  0x36   :  { %7128 = vsyncadd [#allocation6], 4294939840  ;;  %v6708_v0 = vld [vmem:[#allocation7 + $0x4] ss:$8 sps:$4 sm:$0xff]   ;;  %v6712_v2 = vld [vmem:[#allocation7] ss:$8 sps:$4 sm:$0xff]   ;;  %v8776_v40 = vlaneseq }
  0x37   :  { %v6710_v1 = vld [vmem:[#allocation7 + $0x304] ss:$8 sps:$4 sm:$0xff]   ;;  %5037 = vmatprep.subr.bf16.mxu1 %v6708_v0  ;;  %v6713_v3 = vld [vmem:[#allocation7 + $0x300] ss:$8 sps:$4 sm:$0xff]   ;;  %v6714_v4 = vld [vmem:[#allocation7 + $0x14] ss:$8 sps:$4 sm:$0xff]  }
  0x38   :  { %5376 = vmatprep.subr.bf16.mxu0 %v6710_v1  ;;  %5038 = vmatpush1.bf16.msra.mxu1 %v6712_v2  ;;  %v6716_v5 = vld [vmem:[#allocation7 + $0x314] ss:$8 sps:$4 sm:$0xff]   ;;  %v6718_v6 = vld [vmem:[#allocation7 + $0x10] ss:$8 sps:$4 sm:$0xff]   ;;  %v6720_v8 = vld [vmem:[#allocation7 + $0x24] ss:$8 sps:$4 sm:$0xff]  }
  0x39   :  { %5377 = vmatpush1.bf16.msra.mxu0 %v6713_v3  ;;  %5039 = vmatprep.subr.bf16.mxu1 %v6714_v4  ;;  %v6719_v7 = vld [vmem:[#allocation7 + $0x310] ss:$8 sps:$4 sm:$0xff]   ;;  %v6722_v9 = vld [vmem:[#allocation7 + $0x324] ss:$8 sps:$4 sm:$0xff]   ;;  %v6724_v10 = vld [vmem:[#allocation7 + $0x20] ss:$8 sps:$4 sm:$0xff]  }
  0x3a   :  { %5378 = vmatprep.subr.bf16.mxu0 %v6716_v5  ;;  %v6725_v11 = vld [vmem:[#allocation7 + $0x320] ss:$8 sps:$4 sm:$0xff]   ;;  %v6726_v12 = vld [vmem:[#allocation7 + $0x34] ss:$8 sps:$4 sm:$0xff]   ;;  %v6730_v14 = vld [vmem:[#allocation7 + $0x30] ss:$8 sps:$4 sm:$0xff]  }
  0x3b   :  { %v6728_v13 = vld [vmem:[#allocation7 + $0x334] ss:$8 sps:$4 sm:$0xff]   ;;  %v6731_v15 = vld [vmem:[#allocation7 + $0x330] ss:$8 sps:$4 sm:$0xff]   ;;  %v6732_v16 = vld [vmem:[#allocation7 + $0x44] ss:$8 sps:$4 sm:$0xff]  }
  0x3c   :  { %5040 = vmatpush1.bf16.msra.mxu1 %v6718_v6  ;;  %v6734_v17 = vld [vmem:[#allocation7 + $0x344] ss:$8 sps:$4 sm:$0xff]   ;;  %v6736_v18 = vld [vmem:[#allocation7 + $0x40] ss:$8 sps:$4 sm:$0xff]   ;;  %v6738_v20 = vld [vmem:[#allocation7 + $0x54] ss:$8 sps:$4 sm:$0xff]  }
  0x3d   :  { %5379 = vmatpush1.bf16.msra.mxu0 %v6719_v7  ;;  %5041 = vmatprep.subr.bf16.mxu1 %v6720_v8  ;;  %v6737_v19 = vld [vmem:[#allocation7 + $0x340] ss:$8 sps:$4 sm:$0xff]   ;;  %v6740_v21 = vld [vmem:[#allocation7 + $0x354] ss:$8 sps:$4 sm:$0xff]   ;;  %v6742_v22 = vld [vmem:[#allocation7 + $0x50] ss:$8 sps:$4 sm:$0xff]  }
  0x3e   :  { %5380 = vmatprep.subr.bf16.mxu0 %v6722_v9  ;;  %v6743_v23 = vld [vmem:[#allocation7 + $0x350] ss:$8 sps:$4 sm:$0xff]   ;;  %v6744_v24 = vld [vmem:[#allocation7 + $0x64] ss:$8 sps:$4 sm:$0xff]   ;;  %v6748_v26 = vld [vmem:[#allocation7 + $0x60] ss:$8 sps:$4 sm:$0xff]  }
  0x3f   :  { %v6746_v25 = vld [vmem:[#allocation7 + $0x364] ss:$8 sps:$4 sm:$0xff]   ;;  %v6749_v27 = vld [vmem:[#allocation7 + $0x360] ss:$8 sps:$4 sm:$0xff]   ;;  %v6750_v28 = vld [vmem:[#allocation7 + $0x74] ss:$8 sps:$4 sm:$0xff]  }
  0x40   :  { %5042 = vmatpush1.bf16.msra.mxu1 %v6724_v10  ;;  %v6752_v29 = vld [vmem:[#allocation7 + $0x374] ss:$8 sps:$4 sm:$0xff]   ;;  %v6754_v30 = vld [vmem:[#allocation7 + $0x70] ss:$8 sps:$4 sm:$0xff]   ;;  %v6756_v32 = vld [vmem:[#allocation7 + $0x84] ss:$8 sps:$4 sm:$0xff]  }
  0x41   :  { %5381 = vmatpush1.bf16.msra.mxu0 %v6725_v11  ;;  %5043 = vmatprep.subr.bf16.mxu1 %v6726_v12  ;;  %v6755_v31 = vld [vmem:[#allocation7 + $0x370] ss:$8 sps:$4 sm:$0xff]   ;;  %v6758_v33 = vld [vmem:[#allocation7 + $0x384] ss:$8 sps:$4 sm:$0xff]   ;;  %v6760_v34 = vld [vmem:[#allocation7 + $0x80] ss:$8 sps:$4 sm:$0xff]  }
  0x42   :  { %5382 = vmatprep.subr.bf16.mxu0 %v6728_v13  ;;  %v6761_v35 = vld [vmem:[#allocation7 + $0x380] ss:$8 sps:$4 sm:$0xff]   ;;  %v6762_v36 = vld [vmem:[#allocation7 + $0x94] ss:$8 sps:$4 sm:$0xff]   ;;  %v7136_v38 = vmov 1966171168  }
  0x43   :  { %v6764_v37 = vld [vmem:[#allocation7 + $0x394] ss:$8 sps:$4 sm:$0xff]   ;;  %v132_v39 = vunpack.c.l.s4 %v7136_v38  ;;  %v6766_v41 = vld [vmem:[#allocation7 + $0x90] ss:$8 sps:$4 sm:$0xff]   ;;  %v6768_v43 = vld [vmem:[#allocation7 + $0xa4] ss:$8 sps:$4 sm:$0xff]  }
  0x44   :  { %5044 = vmatpush1.bf16.msra.mxu1 %v6730_v14  ;;  %v6767_v42 = vld [vmem:[#allocation7 + $0x390] ss:$8 sps:$4 sm:$0xff]   ;;  %v6770_v44 = vld [vmem:[#allocation7 + $0x3a4] ss:$8 sps:$4 sm:$0xff]   ;;  %v7217_v46 = vshrl.u32 %v8776_v40, 7  ;;  %vm6054_vm0 = vcmask 1041409  }
  0x45   :  { %5383 = vmatpush1.bf16.msra.mxu0 %v6731_v15  ;;  %5045 = vmatprep.subr.bf16.mxu1 %v6732_v16  ;;  %v133_v45 = vunpack.c.0.s8 %v132_v39  ;;  %v6772_v47 = vld [vmem:[#allocation7 + $0xa0] ss:$8 sps:$4 sm:$0xff]   ;;  %v6774_v49 = vld [vmem:[#allocation7 + $0xb4] ss:$8 sps:$4 sm:$0xff]   ;;  %v6778_v51 = vld [vmem:[#allocation7 + $0xb0] ss:$8 sps:$4 sm:$0xff]  }
  0x46   :  { %5384 = vmatprep.subr.bf16.mxu0 %v6734_v17  ;;  %8787 = vst [vmem:[#allocation10_spill] sm:$0xff] %v7217_v46  ;;  %v6773_v48 = vld [vmem:[#allocation7 + $0x3a0] ss:$8 sps:$4 sm:$0xff]   ;;  %v6776_v50 = vld [vmem:[#allocation7 + $0x3b4] ss:$8 sps:$4 sm:$0xff]   ;;  %v78_v1 = vld [vmem:[#allocation5] sm:$0xff] }
  0x47   :  { %v6779_v52 = vld [vmem:[#allocation7 + $0x3b0] ss:$8 sps:$4 sm:$0xff]   ;;  %v7220_v53 = vsub.s32 %v133_v45, %v7217_v46  ;;  %v6780_v54 = vld [vmem:[#allocation7 + $0xc4] ss:$8 sps:$4 sm:$0xff]   ;;  %v6784_v0 = vld [vmem:[#allocation7 + $0xc0] ss:$8 sps:$4 sm:$0xff]   ;;  %v7235_v14 = vcombine.low %v78_v1, %v78_v1  ;;  %v7240_v17 = vcombine.high %v78_v1, %v78_v1 }
  0x48   :  { %5046 = vmatpush1.bf16.msra.mxu1 %v6736_v18  ;;  %v6086_v55 = vld.sshfl [vmem:[#allocation3] sm:$0xff pattern:$0x75316420]  ;;  %v6087_v56 = vld.sshfl [vmem:[#allocation3 + $0x8] sm:$0xff pattern:$0x75316420] }
  0x49   :  { %5385 = vmatpush1.bf16.msra.mxu0 %v6737_v19  ;;  %5047 = vmatprep.subr.bf16.mxu1 %v6738_v20  ;;  %v6088_v57 = vld.sshfl [vmem:[#allocation3 + $0x10] sm:$0xff pattern:$0x75316420]  ;;  %v6089_v58 = vld.sshfl [vmem:[#allocation3 + $0x18] sm:$0xff pattern:$0x75316420]  ;;  %v127_v59 = vcombine.low %v6086_v55, %v6087_v56  ;;  %v128_v60 = vcombine.high %v6086_v55, %v6087_v56 }
  0x4a   :  { %5386 = vmatprep.subr.bf16.mxu0 %v6740_v21  ;;  %v6782_v61 = vld [vmem:[#allocation7 + $0x3c4] ss:$8 sps:$4 sm:$0xff]   ;;  %v129_v62 = vcombine.low %v6088_v57, %v6089_v58  ;;  %v130_v63 = vcombine.high %v6088_v57, %v6089_v58  ;;  %v6785_v4 = vld [vmem:[#allocation7 + $0x3c0] ss:$8 sps:$4 sm:$0xff]   ;;  %v7226_v6 = vsub.s32 0, %v7217_v46  ;;  %v7230_v10 = vsub.s32 1, %v7217_v46 }
  0x4b   :  { %v137_v2 = vrot.slane %v127_v59, %v7220_v53  ;;  %v144_v3 = vrot.slane %v128_v60, %v7220_v53  ;;  %v81_v7 = vld [vmem:[#allocation5 + $0x18] sm:$0xff]  ;;  %v6786_v9 = vld [vmem:[#allocation7 + $0xd4] ss:$8 sps:$4 sm:$0xff]   ;;  %v7233_v11 = vsub.s32 7, %v7217_v46  ;;  %v7238_v15 = vsub.s32 6, %v7217_v46 }
  0x4c   :  { %5048 = vmatpush1.bf16.msra.mxu1 %v6742_v22  ;;  %v151_v5 = vrot.slane %v129_v62, %v7220_v53  ;;  %v158_v8 = vrot.slane %v130_v63, %v7220_v53  ;;  %v6788_v12 = vld [vmem:[#allocation7 + $0x3d4] ss:$8 sps:$4 sm:$0xff]   ;;  %v7242_v18 = vcombine.low %v81_v7, %v81_v7  ;;  %v6790_v21 = vld [vmem:[#allocation7 + $0xd0] ss:$8 sps:$4 sm:$0xff]   ;;  %v6796_v39 = vld [vmem:[#allocation7 + $0xe0] ss:$8 sps:$4 sm:$0xff]  }
  0x4d   :  { %5387 = vmatpush1.bf16.msra.mxu0 %v6743_v23  ;;  %5049 = vmatprep.subr.bf16.mxu1 %v6744_v24  ;;  %v6791_v22 = vld [vmem:[#allocation7 + $0x3d0] ss:$8 sps:$4 sm:$0xff]   ;;  %vm6056_vm1 = vcmask 1042434   ;;  %vm6058_vm2 = vcmask 1043459   ;;  %vm6060_vm3 = vcmask 1044484   ;;  %vm6062_vm4 = vcmask 1045509  }
  0x4e   :  { %5388 = vmatprep.subr.bf16.mxu0 %v6746_v25  ;;  %v159_v13 = vcombine.low %v137_v2, %v151_v5  ;;  %v161_v16 = vcombine.low %v144_v3, %v158_v8  ;;  %v7244_v19 = vcombine.high %v137_v2, %v151_v5  ;;  %v7246_v20 = vcombine.high %v144_v3, %v158_v8  ;;  %v6802_v60 = vld [vmem:[#allocation7 + $0xf0] ss:$8 sps:$4 sm:$0xff]   ;;  %v6810_v5 = vld [vmem:[#allocation7 + $0x104] ss:$8 sps:$4 sm:$0xff]  }
  0x4f   :  { %v7137_v8 = vmov 0   ;;  %vm6064_vm5 = vcmask 1046534   ;;  %vm6066_vm6 = vcmask 1047559   ;;  %vm6077_vm7 = vcmask 64512  }
  0x50   :  { %5050 = vmatpush1.bf16.msra.mxu1 %v6748_v26  ;;  %v341_v23 = vunpack.i.h.s16 %v159_v13  ;;  %v7248_v24 = vpack.i.b16 %v159_v13, %v159_v13  ;;  %v345_v25 = vunpack.i.h.s16 %v161_v16  ;;  %v7250_v26 = vpack.i.b16 %v161_v16, %v161_v16  ;;  %v6813_v13 = vld [vmem:[#allocation7 + $0x404] ss:$8 sps:$4 sm:$0xff]  }
  0x51   :  { %5389 = vmatpush1.bf16.msra.mxu0 %v6749_v27  ;;  %5051 = vmatprep.subr.bf16.mxu1 %v6750_v28  ;;  %v6792_v27 = vld [vmem:[#allocation7 + $0xe4] ss:$8 sps:$4 sm:$0xff]   ;;  %v7252_v28 = vcombine.high %v81_v7, %v81_v7 }
  0x52   :  { %5390 = vmatprep.subr.bf16.mxu0 %v6752_v29  ;;  %v7256_v29 = vpack.i.b16 %v7244_v19, %v7244_v19  ;;  %v514_v38 = vrot.slane %v7250_v26, %v7230_v10 }
  0x54   :  { %5052 = vmatpush1.bf16.msra.mxu1 %v6754_v30  ;;  %v7260_v30 = vpack.i.b16 %v7246_v20, %v7246_v20 }
  0x55   :  { %5391 = vmatpush1.bf16.msra.mxu0 %v6755_v31  ;;  %5053 = vmatprep.subr.bf16.mxu1 %v6756_v32  ;;  %v6794_v31 = vld [vmem:[#allocation7 + $0x3e4] ss:$8 sps:$4 sm:$0xff]   ;;  %v7262_v32 = vpack.i.b16 %v341_v23, %v341_v23 }
  0x56   :  { %5392 = vmatprep.subr.bf16.mxu0 %v6758_v33  ;;  %v410_v33 = vrot.slane %v7248_v24, %v7230_v10 }
  0x58   :  { %5054 = vmatpush1.bf16.msra.mxu1 %v6760_v34  ;;  %v434_v34 = vrot.slane %v7248_v24, %v7233_v11 }
  0x59   :  { %5393 = vmatpush1.bf16.msra.mxu0 %v6761_v35  ;;  %5055 = vmatprep.subr.bf16.mxu1 %v6762_v36  ;;  %v406_v35 = vrot.slane %v7248_v24, %v7226_v6  ;;  %v430_v36 = vrot.slane %v7248_v24, %v7238_v15 }
  0x5a   :  { %5394 = vmatprep.subr.bf16.mxu0 %v6764_v37  ;;  %v7272_v37 = vpack.i.b16 %v345_v25, %v345_v25  ;;  %v1285_v45 = vpack.i.b16 %v434_v34, %v434_v34 }
  0x5b   :  { %v1278_v59 = vpack.i.b16 %v430_v36, %v430_v36 }
  0x5c   :  { %5056 = vmatpush1.bf16.msra.mxu1 %v6766_v41  ;;  %v6797_v41 = vld [vmem:[#allocation7 + $0x3e0] ss:$8 sps:$4 sm:$0xff]   ;;  %v1290_v55 = vrot.slane %v1285_v45, %v7226_v6 }
  0x5d   :  { %5395 = vmatpush1.bf16.msra.mxu0 %v6767_v42  ;;  %5057 = vmatprep.subr.bf16.mxu1 %v6768_v43  ;;  %v462_v42 = vrot.slane %v7262_v32, %v7230_v10  ;;  %v1243_v43 = vpack.i.b16 %v410_v33, %v410_v33  ;;  %v1283_v23 = vrot.slane %v1278_v59, %v7226_v6  ;;  %v6814_v59 = vld [vmem:[#allocation7 + $0x110] ss:$8 sps:$4 sm:$0xff]  }
  0x5e   :  { %5396 = vmatprep.subr.bf16.mxu0 %v6770_v44  ;;  %v486_v44 = vrot.slane %v7262_v32, %v7233_v11  ;;  %v1425_v33 = vpack.i.b16 %v514_v38, %v514_v38 }
  0x5f   :  { %v2743_v36 = vadd.bf16 %v7242_v18, %v1283_v23 }
  0x60   :  { %5058 = vmatpush1.bf16.msra.mxu1 %v6772_v47  ;;  %v6798_v47 = vld [vmem:[#allocation7 + $0xf4] ss:$8 sps:$4 sm:$0xff]   ;;  %v1376_v56 = vpack.i.b16 %v486_v44, %v486_v44  ;;  %v349_v44 = vunpack.i.h.s16 %v7244_v19  ;;  %v6811_v19 = vld [vmem:[#allocation7 + $0x400] ss:$8 sps:$4 sm:$0xff]  }
  0x61   :  { %5397 = vmatpush1.bf16.msra.mxu0 %v6773_v48  ;;  %5059 = vmatprep.subr.bf16.mxu1 %v6774_v49  ;;  %v458_v48 = vrot.slane %v7262_v32, %v7226_v6  ;;  %v1236_v49 = vpack.i.b16 %v406_v35, %v406_v35 }
  0x62   :  { %5398 = vmatprep.subr.bf16.mxu0 %v6776_v50  ;;  %v482_v50 = vrot.slane %v7262_v32, %v7238_v15  ;;  %v1381_v2 = vrot.slane %v1376_v56, %v7226_v6  ;;  %v510_v56 = vrot.slane %v7250_v26, %v7226_v6 }
  0x63   :  { %v1241_v57 = vrot.slane %v1236_v49, %v7226_v6  ;;  %v1327_v58 = vpack.i.b16 %v458_v48, %v458_v48  ;;  %v6816_v48 = vld [vmem:[#allocation7 + $0x114] ss:$8 sps:$4 sm:$0xff]  }
  0x64   :  { %5060 = vmatpush1.bf16.msra.mxu1 %v6778_v51  ;;  %v6800_v51 = vld [vmem:[#allocation7 + $0x3f4] ss:$8 sps:$4 sm:$0xff]   ;;  %v1369_v1 = vpack.i.b16 %v482_v50, %v482_v50  ;;  %v2757_v16 = vadd.bf16 %v7252_v28, %v1381_v2 }
  0x65   :  { %5399 = vmatpush1.bf16.msra.mxu0 %v6779_v52  ;;  %5061 = vmatprep.subr.bf16.mxu1 %v6780_v54  ;;  %v1248_v52 = vrot.slane %v1243_v43, %v7226_v6  ;;  %v1334_v54 = vpack.i.b16 %v462_v42, %v462_v42  ;;  %v1332_v3 = vrot.slane %v1327_v58, %v7226_v6 }
  0x66   :  { %5400 = vmatprep.subr.bf16.mxu0 %v6782_v61  ;;  %v6803_v61 = vld [vmem:[#allocation7 + $0x3f0] ss:$8 sps:$4 sm:$0xff]   ;;  %v2965_v34 = vmax.bf16 %v7137_v8, %v2757_v16  ;;  %v1430_v43 = vrot.slane %v1425_v33, %v7226_v6 }
  0x67   :  { %v1339_v62 = vrot.slane %v1334_v54, %v7226_v6  ;;  %v2738_v63 = vadd.bf16 %v7240_v17, %v1248_v52  ;;  %v538_v52 = vrot.slane %v7250_v26, %v7233_v11  ;;  %v590_v54 = vrot.slane %v7272_v37, %v7233_v11 }
  0x68   :  { %5062 = vmatpush1.bf16.msra.mxu1 %v6784_v0  ;;  %v2744_v0 = vadd.bf16 %v7252_v28, %v1290_v55 }
  0x69   :  { %5401 = vmatpush1.bf16.msra.mxu0 %v6785_v4  ;;  %5063 = vmatprep.subr.bf16.mxu1 %v6786_v9  ;;  %v2737_v4 = vadd.bf16 %v7235_v14, %v1241_v57  ;;  %v2751_v7 = vadd.bf16 %v7240_v17, %v1339_v62  ;;  %v2946_v9 = vmax.bf16 %v7137_v8, %v2738_v63 }
  0x6a   :  { %5402 = vmatprep.subr.bf16.mxu0 %v6788_v12  ;;  %v2952_v12 = vmax.bf16 %v7137_v8, %v2744_v0  ;;  %v562_v57 = vrot.slane %v7272_v37, %v7226_v6  ;;  %v1467_v62 = vpack.i.b16 %v538_v52, %v538_v52  ;;  %v1558_v63 = vpack.i.b16 %v590_v54, %v590_v54  ;;  %v6826_v54 = vld [vmem:[#allocation7 + $0x130] ss:$8 sps:$4 sm:$0xff]  }
  0x6b   :  { %v2959_v25 = vmax.bf16 %v7137_v8, %v2751_v7 }
  0x6c   :  { %5064 = vmatpush1.bf16.msra.mxu1 %v6790_v21  ;;  %v2750_v21 = vadd.bf16 %v7235_v14, %v1332_v3  ;;  %v6136_v45 = vcombine.low %v2952_v12, %v2965_v34  ;;  %v1509_v2 = vpack.i.b16 %v562_v57, %v562_v57  ;;  %v6822_v3 = vld [vmem:[#allocation7 + $0x124] ss:$8 sps:$4 sm:$0xff]   ;;  %v1563_v7 = vrot.slane %v1558_v63, %v7226_v6 }
  0x6d   :  { %5403 = vmatpush1.bf16.msra.mxu0 %v6791_v22  ;;  %5065 = vmatprep.subr.bf16.mxu1 %v6792_v27  ;;  %v2945_v22 = vmax.bf16 %v7137_v8, %v2737_v4  ;;  %v1374_v27 = vrot.slane %v1369_v1, %v7226_v6  ;;  %v1418_v1 = vpack.i.b16 %v510_v56, %v510_v56  ;;  %v6825_v34 = vld [vmem:[#allocation7 + $0x424] ss:$8 sps:$4 sm:$0xff]  }
  0x6e   :  { %5404 = vmatprep.subr.bf16.mxu0 %v6794_v31  ;;  %v566_v31 = vrot.slane %v7272_v37, %v7230_v10  ;;  %v2958_v35 = vmax.bf16 %v7137_v8, %v2750_v21  ;;  %5408 = vmatprep.mubr.bf16.mxu0 %v6136_v45  ;;  %v534_v4 = vrot.slane %v7250_v26, %v7238_v15 }
  0x6f   :  { %v2756_v42 = vadd.bf16 %v7242_v18, %v1374_v27  ;;  %v7330_v12 = vpack.i.b16 %v349_v44, %v349_v44  ;;  %v1423_v21 = vrot.slane %v1418_v1, %v7226_v6  ;;  %v2783_v27 = vadd.bf16 %v7252_v28, %v1563_v7  ;;  %v6829_v1 = vld [vmem:[#allocation7 + $0x430] ss:$8 sps:$4 sm:$0xff]  }
  0x70   :  { %5066 = vmatpush1.bf16.msra.mxu1 %v6796_v39  ;;  %v6130_v39 = vcombine.low %v2946_v9, %v2959_v25  ;;  %v6129_v38 = vcombine.low %v2945_v22, %v2958_v35  ;;  %v1516_v49 = vpack.i.b16 %v566_v31, %v566_v31  ;;  %v586_v9 = vrot.slane %v7272_v37, %v7238_v15  ;;  %v6820_v31 = vld [vmem:[#allocation7 + $0x120] ss:$8 sps:$4 sm:$0xff]  }
  0x71   :  { %5405 = vmatpush1.bf16.msra.mxu0 %v6797_v41  ;;  %5067 = vmatprep.subr.bf16.mxu1 %v6798_v47  ;;  %v6808_v41 = vld [vmem:[#allocation7 + $0x100] ss:$8 sps:$4 sm:$0xff]   ;;  %v2951_v47 = vmax.bf16 %v7137_v8, %v2743_v36  ;;  %v2964_v50 = vmax.bf16 %v7137_v8, %v2756_v42  ;;  %v1514_v22 = vrot.slane %v1509_v2, %v7226_v6  ;;  %v6828_v42 = vld [vmem:[#allocation7 + $0x134] ss:$8 sps:$4 sm:$0xff]  }
  0x72   :  { %5406 = vmatprep.subr.bf16.mxu0 %v6800_v51  ;;  %5069 = vmatprep.mubr.bf16.mxu1 %v6130_v39  ;;  %v2764_v51 = vadd.bf16 %v7240_v17, %v1430_v43  ;;  %v1521_v55 = vrot.slane %v1516_v49, %v7226_v6  ;;  %v1460_v23 = vpack.i.b16 %v534_v4, %v534_v4 }
  0x73   :  { %v6135_v58 = vcombine.low %v2951_v47, %v2964_v50  ;;  %v1551_v33 = vpack.i.b16 %v586_v9, %v586_v9  ;;  %v2763_v36 = vadd.bf16 %v7235_v14, %v1423_v21  ;;  %v2776_v39 = vadd.bf16 %v7235_v14, %v1514_v22  ;;  %v6823_v50 = vld [vmem:[#allocation7 + $0x420] ss:$8 sps:$4 sm:$0xff]  }
  0x74   :  { %5068 = vmatpush1.bf16.msra.mxu1 %v6802_v60  ;;  %v6819_v60 = vld [vmem:[#allocation7 + $0x414] ss:$8 sps:$4 sm:$0xff]   ;;  %v2777_v0 = vadd.bf16 %v7240_v17, %v1521_v55  ;;  %v2991_v44 = vmax.bf16 %v7137_v8, %v2783_v27  ;;  %v670_v55 = vrot.slane %v7330_v12, %v7230_v10  ;;  %v694_v63 = vrot.slane %v7330_v12, %v7233_v11  ;;  %v6832_v27 = vld [vmem:[#allocation7 + $0x140] ss:$8 sps:$4 sm:$0xff]  }
  0x75   :  { %5407 = vmatpush1.bf16.msra.mxu0 %v6803_v61  ;;  %5150 = vmatprep.subr.bf16.mxu1 %v6810_v5  ;;  %v2972_v61 = vmax.bf16 %v7137_v8, %v2764_v51  ;;  %v1472_v5 = vrot.slane %v1467_v62, %v7226_v6  ;;  %v1556_v45 = vrot.slane %v1551_v33, %v7226_v6 }
  0x76   :  { %5489 = vmatprep.subr.bf16.mxu0 %v6813_v13  ;;  %v6817_v13 = vld [vmem:[#allocation7 + $0x410] ss:$8 sps:$4 sm:$0xff]   ;;  %v2985_v16 = vmax.bf16 %v7137_v8, %v2777_v0  ;;  %v2971_v47 = vmax.bf16 %v7137_v8, %v2763_v36  ;;  %v1698_v62 = vpack.i.b16 %v670_v55, %v670_v55  ;;  %v614_v0 = vrot.slane %v7256_v29, %v7226_v6 }
  0x77   :  { %5070 = vmatmul.mubr.bf16.vlgmr.msra.gmra.mrb[0].mxu1 %v6129_v38  ;;  %v2770_v25 = vadd.bf16 %v7252_v28, %v1472_v5  ;;  %v618_v38 = vrot.slane %v7256_v29, %v7230_v10  ;;  %v2782_v52 = vadd.bf16 %v7242_v18, %v1556_v45  ;;  %v666_v4 = vrot.slane %v7330_v12, %v7226_v6 }
  0x78   :  { %5151 = vmatpush1.bf16.msra.mxu1 %v6808_v41  ;;  %5409 = vmatmul.mubr.bf16.vlgmr.msra.gmra.mrb[0].mxu0 %v6135_v58  ;;  %v6143_v35 = vcombine.low %v2972_v61, %v2985_v16  ;;  %v1465_v41 = vrot.slane %v1460_v23, %v7226_v6  ;;  %v1703_v7 = vrot.slane %v1698_v62, %v7226_v6  ;;  %v353_v16 = vunpack.i.h.s16 %v7246_v20  ;;  %v6840_v20 = vld [vmem:[#allocation7 + $0x154] ss:$8 sps:$4 sm:$0xff]  }
  0x79   :  { %5152 = vmatprep.subr.bf16.mxu1 %v6816_v48  ;;  %5490 = vmatpush1.bf16.msra.mxu0 %v6811_v19  ;;  %v2978_v43 = vmax.bf16 %v7137_v8, %v2770_v25  ;;  %v2984_v48 = vmax.bf16 %v7137_v8, %v2776_v39  ;;  %v6831_v19 = vld [vmem:[#allocation7 + $0x434] ss:$8 sps:$4 sm:$0xff]   ;;  %v1607_v58 = vpack.i.b16 %v618_v38, %v618_v38 }
  0x7a   :  { %5491 = vmatprep.subr.bf16.mxu0 %v6819_v60  ;;  %5079 = vmatprep.mubr.bf16.mxu1 %v6143_v35  ;;  %v2769_v49 = vadd.bf16 %v7242_v18, %v1465_v41  ;;  %v6834_v60 = vld [vmem:[#allocation7 + $0x144] ss:$8 sps:$4 sm:$0xff]   ;;  %v2990_v61 = vmax.bf16 %v7137_v8, %v2782_v52  ;;  %v1740_v9 = vpack.i.b16 %v694_v63, %v694_v63  ;;  %v6838_v52 = vld [vmem:[#allocation7 + $0x150] ss:$8 sps:$4 sm:$0xff]  }
  0x7b   :  { %v6149_v51 = vcombine.low %v2978_v43, %v2991_v44  ;;  %v6142_v56 = vcombine.low %v2971_v47, %v2984_v48  ;;  %v1612_v2 = vrot.slane %v1607_v58, %v7226_v6  ;;  %v1600_v23 = vpack.i.b16 %v614_v0, %v614_v0  ;;  %v6835_v43 = vld [vmem:[#allocation7 + $0x440] ss:$8 sps:$4 sm:$0xff]   ;;  %v6843_v48 = vld [vmem:[#allocation7 + $0x454] ss:$8 sps:$4 sm:$0xff]  }
  0x7c   :  { %5153 = vmatpush1.bf16.msra.mxu1 %v6814_v59  ;;  %v2977_v57 = vmax.bf16 %v7137_v8, %v2769_v49  ;;  %v642_v59 = vrot.slane %v7256_v29, %v7233_v11  ;;  %v1691_v25 = vpack.i.b16 %v666_v4, %v666_v4  ;;  %v1745_v33 = vrot.slane %v1740_v9, %v7226_v6  ;;  %v6849_v9 = vld [vmem:[#allocation7 + $0x464] ss:$8 sps:$4 sm:$0xff]  }
  0x7d   :  { %5154 = vmatprep.subr.bf16.mxu1 %v6822_v3  ;;  %5492 = vmatpush1.bf16.msra.mxu0 %v6817_v13  ;;  %v6837_v13 = vld [vmem:[#allocation7 + $0x444] ss:$8 sps:$4 sm:$0xff]   ;;  %v2790_v21 = vadd.bf16 %v7240_v17, %v1612_v2  ;;  %v690_v35 = vrot.slane %v7330_v12, %v7238_v15  ;;  %v1605_v41 = vrot.slane %v1600_v23, %v7226_v6 }
  0x7e   :  { %5493 = vmatprep.subr.bf16.mxu0 %v6825_v34  ;;  %5418 = vmatprep.mubr.bf16.mxu0 %v6149_v51  ;;  %v1649_v3 = vpack.i.b16 %v642_v59, %v642_v59  ;;  %v6148_v5 = vcombine.low %v2977_v57, %v2990_v61  ;;  %v638_v34 = vrot.slane %v7256_v29, %v7238_v15  ;;  %v6846_v2 = vld [vmem:[#allocation7 + $0x164] ss:$8 sps:$4 sm:$0xff]  }
  0x7f   :  { %5080 = vmatmul.mubr.bf16.gmra.mrb[4].mxu1 %v6142_v56  ;;  %v2998_v36 = vmax.bf16 %v7137_v8, %v2790_v21  ;;  %v2809_v45 = vadd.bf16 %v7252_v28, %v1745_v33  ;;  %v1733_v47 = vpack.i.b16 %v690_v35, %v690_v35  ;;  %v722_v61 = vrot.slane %v7260_v30, %v7230_v10 }
  0x80   :  { %5155 = vmatpush1.bf16.msra.mxu1 %v6820_v31  ;;  %v1654_v22 = vrot.slane %v1649_v3, %v7226_v6  ;;  %5419 = vmatmul.mubr.bf16.gmra.mrb[4].mxu0 %v6148_v5  ;;  %v2803_v31 = vadd.bf16 %v7240_v17, %v1703_v7  ;;  %v1642_v38 = vpack.i.b16 %v638_v34, %v638_v34 }
  0x81   :  { %5156 = vmatprep.subr.bf16.mxu1 %v6828_v42  ;;  %5494 = vmatpush1.bf16.msra.mxu0 %v6823_v50  ;;  %v1696_v42 = vrot.slane %v1691_v25, %v7226_v6  ;;  %v2789_v50 = vadd.bf16 %v7235_v14, %v1605_v41  ;;  %v3017_v55 = vmax.bf16 %v7137_v8, %v2809_v45  ;;  %v6852_v45 = vld [vmem:[#allocation7 + $0x174] ss:$8 sps:$4 sm:$0xff]  }
  0x82   :  { %5495 = vmatprep.subr.bf16.mxu0 %v6831_v19  ;;  %v2796_v39 = vadd.bf16 %v7252_v28, %v1654_v22  ;;  %v3011_v44 = vmax.bf16 %v7137_v8, %v2803_v31  ;;  %v1647_v56 = vrot.slane %v1642_v38, %v7226_v6  ;;  %v1738_v57 = vrot.slane %v1733_v47, %v7226_v6  ;;  %v6844_v31 = vld [vmem:[#allocation7 + $0x160] ss:$8 sps:$4 sm:$0xff]   ;;  %v6855_v38 = vld [vmem:[#allocation7 + $0x474] ss:$8 sps:$4 sm:$0xff]  }
  0x83   :  { %v2802_v51 = vadd.bf16 %v7235_v14, %v1696_v42  ;;  %v2997_v58 = vmax.bf16 %v7137_v8, %v2789_v50  ;;  %v1789_v4 = vpack.i.b16 %v722_v61, %v722_v61  ;;  %v746_v7 = vrot.slane %v7260_v30, %v7233_v11 }
  0x84   :  { %5157 = vmatpush1.bf16.msra.mxu1 %v6826_v54  ;;  %v3004_v49 = vmax.bf16 %v7137_v8, %v2796_v39  ;;  %v7381_v54 = vpack.i.b16 %v353_v16, %v353_v16  ;;  %v6156_v19 = vcombine.low %v2998_v36, %v3011_v44  ;;  %v2795_v0 = vadd.bf16 %v7242_v18, %v1647_v56  ;;  %v6847_v36 = vld [vmem:[#allocation7 + $0x460] ss:$8 sps:$4 sm:$0xff]   ;;  %v6850_v44 = vld [vmem:[#allocation7 + $0x170] ss:$8 sps:$4 sm:$0xff]  }
  0x85   :  { %5158 = vmatprep.subr.bf16.mxu1 %v6834_v60  ;;  %5496 = vmatpush1.bf16.msra.mxu0 %v6829_v1  ;;  %v3010_v59 = vmax.bf16 %v7137_v8, %v2802_v51  ;;  %v6841_v60 = vld [vmem:[#allocation7 + $0x450] ss:$8 sps:$4 sm:$0xff]   ;;  %v2808_v1 = vadd.bf16 %v7242_v18, %v1738_v57  ;;  %v718_v22 = vrot.slane %v7260_v30, %v7226_v6 }
  0x86   :  { %5497 = vmatprep.subr.bf16.mxu0 %v6837_v13  ;;  %v774_v62 = vrot.slane %v7381_v54, %v7230_v10  ;;  %5089 = vmatprep.mubr.bf16.mxu1 %v6156_v19  ;;  %v6162_v63 = vcombine.low %v3004_v49, %v3017_v55  ;;  %v3003_v13 = vmax.bf16 %v7137_v8, %v2795_v0  ;;  %v6853_v51 = vld [vmem:[#allocation7 + $0x470] ss:$8 sps:$4 sm:$0xff]   ;;  %v6094_v19 = vld.sshfl [vmem:[#allocation3 + $0x3c] sm:$0xff pattern:$0x75316420] }
  0x87   :  { %v6155_v3 = vcombine.low %v2997_v58, %v3010_v59  ;;  %v3016_v16 = vmax.bf16 %v7137_v8, %v2808_v1  ;;  %v798_v21 = vrot.slane %v7381_v54, %v7233_v11  ;;  %v1794_v23 = vrot.slane %v1789_v4, %v7226_v6  ;;  %v6095_v55 = vld.sshfl [vmem:[#allocation3 + $0x44] sm:$0xff pattern:$0x75316420] }
  0x88   :  { %5159 = vmatpush1.bf16.msra.mxu1 %v6832_v27  ;;  %v1880_v5 = vpack.i.b16 %v774_v62, %v774_v62  ;;  %5428 = vmatprep.mubr.bf16.mxu0 %v6162_v63  ;;  %v1831_v27 = vpack.i.b16 %v746_v7, %v746_v7  ;;  %v770_v35 = vrot.slane %v7381_v54, %v7226_v6  ;;  %v6858_v1 = vld [vmem:[#allocation7 + $0x184] ss:$8 sps:$4 sm:$0xff]  }
  0x89   :  { %5160 = vmatprep.subr.bf16.mxu1 %v6840_v20  ;;  %5498 = vmatpush1.bf16.msra.mxu0 %v6835_v43  ;;  %v6161_v33 = vcombine.low %v3003_v13, %v3016_v16  ;;  %v1922_v34 = vpack.i.b16 %v798_v21, %v798_v21  ;;  %v1782_v20 = vpack.i.b16 %v718_v22, %v718_v22  ;;  %v6861_v7 = vld [vmem:[#allocation7 + $0x484] ss:$8 sps:$4 sm:$0xff]  }
  0x8a   :  { %5499 = vmatprep.subr.bf16.mxu0 %v6843_v48  ;;  %5090 = vmatmul.mubr.bf16.gmra.mrb[8].mxu1 %v6155_v3  ;;  %v1885_v25 = vrot.slane %v1880_v5, %v7226_v6  ;;  %v2816_v39 = vadd.bf16 %v7240_v17, %v1794_v23  ;;  %v1836_v42 = vrot.slane %v1831_v27, %v7226_v6  ;;  %v6856_v27 = vld [vmem:[#allocation7 + $0x180] ss:$8 sps:$4 sm:$0xff]  }
  0x8b   :  { %v742_v43 = vrot.slane %v7260_v30, %v7238_v15  ;;  %5429 = vmatmul.mubr.bf16.gmra.mrb[8].mxu0 %v6161_v33  ;;  %v1927_v47 = vrot.slane %v1922_v34, %v7226_v6  ;;  %v1787_v48 = vrot.slane %v1782_v20, %v7226_v6  ;;  %v1873_v49 = vpack.i.b16 %v770_v35, %v770_v35  ;;  %v6859_v35 = vld [vmem:[#allocation7 + $0x480] ss:$8 sps:$4 sm:$0xff]  }
  0x8c   :  { %5161 = vmatpush1.bf16.msra.mxu1 %v6838_v52  ;;  %v2829_v41 = vadd.bf16 %v7240_v17, %v1885_v25  ;;  %v794_v50 = vrot.slane %v7381_v54, %v7238_v15  ;;  %v6093_v52 = vld.sshfl [vmem:[#allocation3 + $0x34] sm:$0xff pattern:$0x75316420]  ;;  %v3024_v56 = vmax.bf16 %v7137_v8, %v2816_v39  ;;  %v2822_v58 = vadd.bf16 %v7252_v28, %v1836_v42 }
  0x8d   :  { %5500 = vmatpush1.bf16.msra.mxu0 %v6841_v60  ;;  %5162 = vmatprep.subr.bf16.mxu1 %v6846_v2  ;;  %v1824_v59 = vpack.i.b16 %v742_v43, %v742_v43  ;;  %v6096_v60 = vld.sshfl [vmem:[#allocation3 + $0x4c] sm:$0xff pattern:$0x75316420]  ;;  %v2835_v61 = vadd.bf16 %v7252_v28, %v1927_v47  ;;  %v1878_v62 = vrot.slane %v1873_v49, %v7226_v6  ;;  %v7422_v2 = vsub.s32 3, %v7217_v46 }
  0x8e   :  { %5501 = vmatprep.subr.bf16.mxu0 %v6849_v9  ;;  %v3037_v57 = vmax.bf16 %v7137_v8, %v2829_v41  ;;  %v2815_v63 = vadd.bf16 %v7235_v14, %v1787_v48  ;;  %v1915_v0 = vpack.i.b16 %v794_v50, %v794_v50  ;;  %v3030_v4 = vmax.bf16 %v7137_v8, %v2822_v58  ;;  %v6864_v41 = vld [vmem:[#allocation7 + $0x194] ss:$8 sps:$4 sm:$0xff]   ;;  %v6865_v50 = vld [vmem:[#allocation7 + $0x490] ss:$8 sps:$4 sm:$0xff]   ;;  %v6870_v58 = vld [vmem:[#allocation7 + $0x1a4] ss:$8 sps:$4 sm:$0xff]  }
  0x8f   :  { %v1829_v5 = vrot.slane %v1824_v59, %v7226_v6  ;;  %v3043_v9 = vmax.bf16 %v7137_v8, %v2835_v61  ;;  %v2828_v13 = vadd.bf16 %v7235_v14, %v1878_v62  ;;  %v247_v23 = vcombine.low %v6093_v52, %v6094_v19  ;;  %v6867_v42 = vld [vmem:[#allocation7 + $0x494] ss:$8 sps:$4 sm:$0xff]   ;;  %v6873_v61 = vld [vmem:[#allocation7 + $0x4a4] ss:$8 sps:$4 sm:$0xff]  }
  0x90   :  { %5163 = vmatpush1.bf16.msra.mxu1 %v6844_v31  ;;  %v6169_v3 = vcombine.low %v3024_v56, %v3037_v57  ;;  %v3023_v16 = vmax.bf16 %v7137_v8, %v2815_v63  ;;  %v1920_v21 = vrot.slane %v1915_v0, %v7226_v6  ;;  %v249_v25 = vcombine.low %v6095_v55, %v6096_v60 }
  0x91   :  { %5502 = vmatpush1.bf16.msra.mxu0 %v6847_v36  ;;  %5164 = vmatprep.subr.bf16.mxu1 %v6852_v45  ;;  %v2821_v22 = vadd.bf16 %v7242_v18, %v1829_v5  ;;  %v6175_v31 = vcombine.low %v3030_v4, %v3043_v9  ;;  %v3036_v33 = vmax.bf16 %v7137_v8, %v2828_v13 }
  0x92   :  { %5503 = vmatprep.subr.bf16.mxu0 %v6855_v38  ;;  %5099 = vmatprep.mubr.bf16.mxu1 %v6169_v3  ;;  %v2834_v34 = vadd.bf16 %v7242_v18, %v1920_v21  ;;  %v257_v36 = vrot.slane %v247_v23, %v7220_v53  ;;  %v271_v39 = vrot.slane %v249_v25, %v7220_v53  ;;  %v6862_v38 = vld [vmem:[#allocation7 + $0x190] ss:$8 sps:$4 sm:$0xff]   ;;  %v6871_v25 = vld [vmem:[#allocation7 + $0x4a0] ss:$8 sps:$4 sm:$0xff]  }
  0x93   :  { %v3029_v20 = vmax.bf16 %v7137_v8, %v2821_v22  ;;  %v248_v43 = vcombine.high %v6093_v52, %v6094_v19  ;;  %5438 = vmatprep.mubr.bf16.mxu0 %v6175_v31  ;;  %v250_v47 = vcombine.high %v6095_v55, %v6096_v60  ;;  %v418_v48 = vrot.slane %v7248_v24, %v7422_v2 }
  0x94   :  { %5165 = vmatpush1.bf16.msra.mxu1 %v6850_v44  ;;  %v6168_v44 = vcombine.low %v3023_v16, %v3036_v33  ;;  %v3042_v45 = vmax.bf16 %v7137_v8, %v2834_v34  ;;  %v279_v49 = vcombine.low %v257_v36, %v271_v39  ;;  %v280_v56 = vcombine.high %v257_v36, %v271_v39  ;;  %v6868_v16 = vld [vmem:[#allocation7 + $0x1a0] ss:$8 sps:$4 sm:$0xff]  }
  0x95   :  { %5504 = vmatpush1.bf16.msra.mxu0 %v6853_v51  ;;  %5166 = vmatprep.subr.bf16.mxu1 %v6858_v1  ;;  %v264_v51 = vrot.slane %v248_v43, %v7220_v53  ;;  %v7442_v57 = vrot.slane %v7262_v32, %v7422_v2  ;;  %v278_v19 = vrot.slane %v250_v47, %v7220_v53  ;;  %v6879_v43 = vld [vmem:[#allocation7 + $0x4b4] ss:$8 sps:$4 sm:$0xff]  }
  0x96   :  { %5505 = vmatprep.subr.bf16.mxu0 %v6861_v7  ;;  %5100 = vmatmul.mubr.bf16.gmra.mrb[12].mxu1 %v6168_v44  ;;  %v6174_v52 = vcombine.low %v3029_v20, %v3042_v45  ;;  %v1257_v55 = vpack.i.b16 %v418_v48, %v418_v48  ;;  %v357_v59 = vunpack.i.h.s16 %v279_v49  ;;  %v7445_v60 = vpack.i.b16 %v279_v49, %v279_v49  ;;  %v6876_v20 = vld [vmem:[#allocation7 + $0x1b4] ss:$8 sps:$4 sm:$0xff]   ;;  %v6874_v48 = vld [vmem:[#allocation7 + $0x1b0] ss:$8 sps:$4 sm:$0xff]  }
  0x97   :  { %v365_v62 = vunpack.i.h.s16 %v280_v56  ;;  %v7447_v63 = vpack.i.b16 %v280_v56, %v280_v56  ;;  %v7449_v0 = vcombine.low %v264_v51, %v278_v19  ;;  %v7451_v1 = vcombine.high %v264_v51, %v278_v19 }
  0x98   :  { %5167 = vmatpush1.bf16.msra.mxu1 %v6856_v27  ;;  %5439 = vmatmul.mubr.bf16.gmra.mrb[12].mxu0 %v6174_v52  ;;  %v7454_v3 = vrot.slane %v1257_v55, %v7226_v6  ;;  %v1348_v4 = vpack.i.b16 %v7442_v57, %v7442_v57  ;;  %v7458_v5 = vpack.i.b16 %v357_v59, %v357_v59  ;;  %v6877_v52 = vld [vmem:[#allocation7 + $0x4b0] ss:$8 sps:$4 sm:$0xff]  }
  0x99   :  { %5506 = vmatpush1.bf16.msra.mxu0 %v6859_v35  ;;  %5168 = vmatprep.subr.bf16.mxu1 %v6864_v41  ;;  %v826_v7 = vrot.slane %v7445_v60, %v7230_v10  ;;  %v850_v9 = vrot.slane %v7445_v60, %v7233_v11  ;;  %v822_v13 = vrot.slane %v7445_v60, %v7226_v6  ;;  %v361_v22 = vunpack.i.h.s16 %v7449_v0 }
  0x9a   :  { %5507 = vmatprep.subr.bf16.mxu0 %v6867_v42  ;;  %v846_v21 = vrot.slane %v7445_v60, %v7238_v15  ;;  %v7471_v23 = vpack.i.b16 %v7449_v0, %v7449_v0  ;;  %v7473_v27 = vpack.i.b16 %v365_v62, %v365_v62  ;;  %v878_v31 = vrot.slane %v7458_v5, %v7230_v10 }
  0x9b   :  { %v1971_v33 = vpack.i.b16 %v826_v7, %v826_v7  ;;  %v902_v34 = vrot.slane %v7458_v5, %v7233_v11  ;;  %v2013_v35 = vpack.i.b16 %v850_v9, %v850_v9  ;;  %v874_v36 = vrot.slane %v7458_v5, %v7226_v6 }
  0x9c   :  { %5169 = vmatpush1.bf16.msra.mxu1 %v6862_v38  ;;  %v1964_v39 = vpack.i.b16 %v822_v13, %v822_v13  ;;  %v898_v41 = vrot.slane %v7458_v5, %v7238_v15  ;;  %v2006_v42 = vpack.i.b16 %v846_v21, %v846_v21  ;;  %v2062_v45 = vpack.i.b16 %v878_v31, %v878_v31  ;;  %v6885_v13 = vld [vmem:[#allocation7 + $0x4c4] ss:$8 sps:$4 sm:$0xff]  }
  0x9d   :  { %5508 = vmatpush1.bf16.msra.mxu0 %v6865_v50  ;;  %5170 = vmatprep.subr.bf16.mxu1 %v6870_v58  ;;  %v1976_v44 = vrot.slane %v1971_v33, %v7226_v6  ;;  %v2018_v38 = vrot.slane %v2013_v35, %v7226_v6  ;;  %v2104_v47 = vpack.i.b16 %v902_v34, %v902_v34  ;;  %v6880_v33 = vld [vmem:[#allocation7 + $0x1c0] ss:$8 sps:$4 sm:$0xff]  }
  0x9e   :  { %5509 = vmatprep.subr.bf16.mxu0 %v6873_v61  ;;  %v1969_v49 = vrot.slane %v1964_v39, %v7226_v6  ;;  %v2055_v50 = vpack.i.b16 %v874_v36, %v874_v36  ;;  %v2011_v51 = vrot.slane %v2006_v42, %v7226_v6  ;;  %v2097_v56 = vpack.i.b16 %v898_v41, %v898_v41  ;;  %v6882_v61 = vld [vmem:[#allocation7 + $0x1c4] ss:$8 sps:$4 sm:$0xff]   ;;  %v6883_v39 = vld [vmem:[#allocation7 + $0x4c0] ss:$8 sps:$4 sm:$0xff]  }
  0x9f   :  { %v2067_v19 = vrot.slane %v2062_v45, %v7226_v6  ;;  %v2842_v58 = vadd.bf16 %v7240_v17, %v1976_v44  ;;  %v2109_v55 = vrot.slane %v2104_v47, %v7226_v6  ;;  %v2848_v59 = vadd.bf16 %v7252_v28, %v2018_v38 }
  0xa0   :  { %5171 = vmatpush1.bf16.msra.mxu1 %v6868_v16  ;;  %v2060_v62 = vrot.slane %v2055_v50, %v7226_v6  ;;  %v2841_v0 = vadd.bf16 %v7235_v14, %v1969_v49  ;;  %v2102_v7 = vrot.slane %v2097_v56, %v7226_v6  ;;  %v2847_v9 = vadd.bf16 %v7242_v18, %v2011_v51  ;;  %v6888_v56 = vld [vmem:[#allocation7 + $0x1d4] ss:$8 sps:$4 sm:$0xff]  }
  0xa1   :  { %5510 = vmatpush1.bf16.msra.mxu0 %v6871_v25  ;;  %5172 = vmatprep.subr.bf16.mxu1 %v6876_v20  ;;  %v2855_v16 = vadd.bf16 %v7240_v17, %v2067_v19  ;;  %v3050_v21 = vmax.bf16 %v7137_v8, %v2842_v58  ;;  %v2861_v25 = vadd.bf16 %v7252_v28, %v2109_v55 }
  0xa2   :  { %5511 = vmatprep.subr.bf16.mxu0 %v6879_v43  ;;  %v3056_v31 = vmax.bf16 %v7137_v8, %v2848_v59  ;;  %v2854_v34 = vadd.bf16 %v7235_v14, %v2060_v62  ;;  %v3049_v35 = vmax.bf16 %v7137_v8, %v2841_v0  ;;  %v2860_v20 = vadd.bf16 %v7242_v18, %v2102_v7  ;;  %v6891_v59 = vld [vmem:[#allocation7 + $0x4d4] ss:$8 sps:$4 sm:$0xff]  }
  0xa3   :  { %v3055_v36 = vmax.bf16 %v7137_v8, %v2847_v9  ;;  %v3063_v41 = vmax.bf16 %v7137_v8, %v2855_v16  ;;  %v3069_v42 = vmax.bf16 %v7137_v8, %v2861_v25  ;;  %v7505_v43 = vpack.i.b16 %v361_v22, %v361_v22  ;;  %v6886_v9 = vld [vmem:[#allocation7 + $0x1d0] ss:$8 sps:$4 sm:$0xff]  }
  0xa4   :  { %5173 = vmatpush1.bf16.msra.mxu1 %v6874_v48  ;;  %v930_v44 = vrot.slane %v7471_v23, %v7230_v10  ;;  %v3062_v45 = vmax.bf16 %v7137_v8, %v2854_v34  ;;  %v3068_v38 = vmax.bf16 %v7137_v8, %v2860_v20  ;;  %v954_v47 = vrot.slane %v7471_v23, %v7233_v11  ;;  %v6889_v25 = vld [vmem:[#allocation7 + $0x4d0] ss:$8 sps:$4 sm:$0xff]  }
  0xa5   :  { %5512 = vmatpush1.bf16.msra.mxu0 %v6877_v52  ;;  %5174 = vmatprep.subr.bf16.mxu1 %v6882_v61  ;;  %v926_v48 = vrot.slane %v7471_v23, %v7226_v6  ;;  %v6182_v49 = vcombine.low %v3050_v21, %v3063_v41  ;;  %v6188_v50 = vcombine.low %v3056_v31, %v3069_v42  ;;  %v7520_v61 = vsub.s32 2, %v7217_v46 }
  0xa6   :  { %5513 = vmatprep.subr.bf16.mxu0 %v6885_v13  ;;  %v982_v22 = vrot.slane %v7505_v43, %v7230_v10  ;;  %v2153_v51 = vpack.i.b16 %v930_v44, %v930_v44  ;;  %v6181_v52 = vcombine.low %v3049_v35, %v3062_v45  ;;  %v6187_v19 = vcombine.low %v3055_v36, %v3068_v38  ;;  %v6894_v36 = vld [vmem:[#allocation7 + $0x1e4] ss:$8 sps:$4 sm:$0xff]  }
  0xa7   :  { %v1006_v58 = vrot.slane %v7505_v43, %v7233_v11  ;;  %v2195_v55 = vpack.i.b16 %v954_v47, %v954_v47  ;;  %5109 = vmatprep.mubr.bf16.mxu1 %v6182_v49  ;;  %5448 = vmatprep.mubr.bf16.mxu0 %v6188_v50  ;;  %v978_v7 = vrot.slane %v7505_v43, %v7226_v6  ;;  %v369_v31 = vunpack.i.h.s16 %v7451_v1  ;;  %v6897_v45 = vld [vmem:[#allocation7 + $0x4e4] ss:$8 sps:$4 sm:$0xff]   ;;  %v6892_v50 = vld [vmem:[#allocation7 + $0x1e0] ss:$8 sps:$4 sm:$0xff]  }
  0xa8   :  { %5175 = vmatpush1.bf16.msra.mxu1 %v6880_v33  ;;  %v2158_v62 = vrot.slane %v2153_v51, %v7226_v6  ;;  %v2244_v0 = vpack.i.b16 %v982_v22, %v982_v22  ;;  %5449 = vmatmul.mubr.bf16.gmra.mrb[16].mxu0 %v6187_v19  ;;  %v2146_v21 = vpack.i.b16 %v926_v48, %v926_v48  ;;  %v6895_v19 = vld [vmem:[#allocation7 + $0x4e0] ss:$8 sps:$4 sm:$0xff]  }
  0xa9   :  { %5514 = vmatpush1.bf16.msra.mxu0 %v6883_v39  ;;  %5110 = vmatmul.mubr.bf16.gmra.mrb[16].mxu1 %v6181_v52  ;;  %v2200_v13 = vrot.slane %v2195_v55, %v7226_v6  ;;  %v2286_v16 = vpack.i.b16 %v1006_v58, %v1006_v58  ;;  %v2237_v35 = vpack.i.b16 %v978_v7, %v978_v7 }
  0xaa   :  { %v2249_v33 = vrot.slane %v2244_v0, %v7226_v6  ;;  %v2868_v34 = vadd.bf16 %v7240_v17, %v2158_v62  ;;  %v950_v20 = vrot.slane %v7471_v23, %v7238_v15  ;;  %5176 = vmatprep.subr.bf16.mxu1 %v6888_v56  ;;  %v2151_v42 = vrot.slane %v2146_v21, %v7226_v6 }
  0xab   :  { %v2291_v39 = vrot.slane %v2286_v16, %v7226_v6  ;;  %v2874_v41 = vadd.bf16 %v7252_v28, %v2200_v13  ;;  %v1002_v44 = vrot.slane %v7505_v43, %v7238_v15  ;;  %5515 = vmatprep.subr.bf16.mxu0 %v6891_v59  ;;  %v2242_v48 = vrot.slane %v2237_v35, %v7226_v6  ;;  %v6903_v35 = vld [vmem:[#allocation7 + $0x4f4] ss:$8 sps:$4 sm:$0xff]  }
  0xac   :  { %v2881_v38 = vadd.bf16 %v7240_v17, %v2249_v33  ;;  %v3076_v47 = vmax.bf16 %v7137_v8, %v2868_v34  ;;  %v2188_v49 = vpack.i.b16 %v950_v20, %v950_v20  ;;  %5177 = vmatpush1.bf16.msra.mxu1 %v6886_v9  ;;  %v2867_v56 = vadd.bf16 %v7235_v14, %v2151_v42  ;;  %v6900_v34 = vld [vmem:[#allocation7 + $0x1f4] ss:$8 sps:$4 sm:$0xff]  }
  0xad   :  { %v2887_v22 = vadd.bf16 %v7252_v28, %v2291_v39  ;;  %v3082_v51 = vmax.bf16 %v7137_v8, %v2874_v41  ;;  %v2279_v52 = vpack.i.b16 %v1002_v44, %v1002_v44  ;;  %5516 = vmatpush1.bf16.msra.mxu0 %v6889_v25  ;;  %v2880_v55 = vadd.bf16 %v7235_v14, %v2242_v48 }
  0xae   :  { %v3089_v58 = vmax.bf16 %v7137_v8, %v2881_v38  ;;  %v2193_v59 = vrot.slane %v2188_v49, %v7226_v6  ;;  %v1034_v62 = vrot.slane %v7447_v63, %v7230_v10  ;;  %5178 = vmatprep.subr.bf16.mxu1 %v6894_v36  ;;  %v3075_v7 = vmax.bf16 %v7137_v8, %v2867_v56 }
  0xaf   :  { %v3095_v0 = vmax.bf16 %v7137_v8, %v2887_v22  ;;  %v2284_v9 = vrot.slane %v2279_v52, %v7226_v6  ;;  %v1086_v13 = vrot.slane %v7473_v27, %v7230_v10  ;;  %5517 = vmatprep.subr.bf16.mxu0 %v6897_v45  ;;  %v3088_v21 = vmax.bf16 %v7137_v8, %v2880_v55 }
  0xb0   :  { %v6195_v16 = vcombine.low %v3076_v47, %v3089_v58  ;;  %v2873_v25 = vadd.bf16 %v7242_v18, %v2193_v59  ;;  %v2335_v33 = vpack.i.b16 %v1034_v62, %v1034_v62  ;;  %5179 = vmatpush1.bf16.msra.mxu1 %v6892_v50  ;;  %v1058_v41 = vrot.slane %v7447_v63, %v7233_v11 }
  0xb1   :  { %v6201_v20 = vcombine.low %v3082_v51, %v3095_v0  ;;  %v2886_v36 = vadd.bf16 %v7242_v18, %v2284_v9  ;;  %v2426_v39 = vpack.i.b16 %v1086_v13, %v1086_v13  ;;  %5518 = vmatpush1.bf16.msra.mxu0 %v6895_v19  ;;  %v6194_v42 = vcombine.low %v3075_v7, %v3088_v21  ;;  %v6898_v19 = vld [vmem:[#allocation7 + $0x1f0] ss:$8 sps:$4 sm:$0xff]   ;;  %v6910_v21 = vld [vmem:[#allocation7 + $0x204] ss:$8 sps:$4 sm:$0xff]  }
  0xb2   :  { %5119 = vmatprep.mubr.bf16.mxu1 %v6195_v16  ;;  %v3081_v44 = vmax.bf16 %v7137_v8, %v2873_v25  ;;  %v2340_v45 = vrot.slane %v2335_v33, %v7226_v6  ;;  %v1110_v38 = vrot.slane %v7473_v27, %v7233_v11  ;;  %v2377_v49 = vpack.i.b16 %v1058_v41, %v1058_v41  ;;  %v6901_v0 = vld [vmem:[#allocation7 + $0x4f0] ss:$8 sps:$4 sm:$0xff]   ;;  %v6913_v25 = vld [vmem:[#allocation7 + $0x504] ss:$8 sps:$4 sm:$0xff]  }
  0xb3   :  { %5458 = vmatprep.mubr.bf16.mxu0 %v6201_v20  ;;  %v3094_v47 = vmax.bf16 %v7137_v8, %v2886_v36  ;;  %v2431_v48 = vrot.slane %v2426_v39, %v7226_v6  ;;  %v1030_v50 = vrot.slane %v7447_v63, %v7226_v6  ;;  %5120 = vmatmul.mubr.bf16.gmra.mrb[20].mxu1 %v6194_v42 }
  0xb4   :  { %v2894_v22 = vadd.bf16 %v7240_v17, %v2340_v45  ;;  %v2468_v51 = vpack.i.b16 %v1110_v38, %v1110_v38  ;;  %v1082_v56 = vrot.slane %v7473_v27, %v7226_v6  ;;  %v1054_v52 = vrot.slane %v7447_v63, %v7238_v15  ;;  %5180 = vmatprep.subr.bf16.mxu1 %v6900_v34 }
  0xb5   :  { %v6200_v58 = vcombine.low %v3081_v44, %v3094_v47  ;;  %v2907_v55 = vadd.bf16 %v7240_v17, %v2431_v48  ;;  %v2382_v59 = vrot.slane %v2377_v49, %v7226_v6  ;;  %v2328_v62 = vpack.i.b16 %v1030_v50, %v1030_v50  ;;  %5519 = vmatprep.subr.bf16.mxu0 %v6903_v35 }
  0xb6   :  { %v3102_v7 = vmax.bf16 %v7137_v8, %v2894_v22  ;;  %v2473_v9 = vrot.slane %v2468_v51, %v7226_v6  ;;  %v2419_v13 = vpack.i.b16 %v1082_v56, %v1082_v56  ;;  %v1106_v16 = vrot.slane %v7473_v27, %v7238_v15  ;;  %5181 = vmatpush1.bf16.msra.mxu1 %v6898_v19 }
  0xb7   :  { %5459 = vmatmul.mubr.bf16.gmra.mrb[20].mxu0 %v6200_v58  ;;  %v3115_v33 = vmax.bf16 %v7137_v8, %v2907_v55  ;;  %v2900_v20 = vadd.bf16 %v7252_v28, %v2382_v59  ;;  %v2333_v36 = vrot.slane %v2328_v62, %v7226_v6  ;;  %v2370_v34 = vpack.i.b16 %v1054_v52, %v1054_v52 }
  0xb8   :  { %v2913_v39 = vadd.bf16 %v7252_v28, %v2473_v9  ;;  %v2424_v41 = vrot.slane %v2419_v13, %v7226_v6  ;;  %v2461_v42 = vpack.i.b16 %v1106_v16, %v1106_v16  ;;  %v7583_v44 = vpack.i.b16 %v7451_v1, %v7451_v1  ;;  %5520 = vmatpush1.bf16.msra.mxu0 %v6901_v0 }
  0xb9   :  { %v6208_v35 = vcombine.low %v3102_v7, %v3115_v33  ;;  %v3108_v45 = vmax.bf16 %v7137_v8, %v2900_v20  ;;  %v2893_v38 = vadd.bf16 %v7235_v14, %v2333_v36  ;;  %v2375_v47 = vrot.slane %v2370_v34, %v7226_v6  ;;  %5263 = vmatprep.subr.bf16.mxu1 %v6910_v21 }
  0xba   :  { %v3121_v48 = vmax.bf16 %v7137_v8, %v2913_v39  ;;  %v2906_v49 = vadd.bf16 %v7235_v14, %v2424_v41  ;;  %v2466_v50 = vrot.slane %v2461_v42, %v7226_v6  ;;  %v7594_v22 = vpack.i.b16 %v369_v31, %v369_v31  ;;  %5602 = vmatprep.subr.bf16.mxu0 %v6913_v25 }
  0xbb   :  { %5129 = vmatprep.mubr.bf16.mxu1 %v6208_v35  ;;  %v3101_v51 = vmax.bf16 %v7137_v8, %v2893_v38  ;;  %v2899_v56 = vadd.bf16 %v7242_v18, %v2375_v47  ;;  %v1138_v52 = vrot.slane %v7583_v44, %v7230_v10  ;;  %v1162_v19 = vrot.slane %v7583_v44, %v7233_v11 }
  0xbc   :  { %v6214_v58 = vcombine.low %v3108_v45, %v3121_v48  ;;  %v3114_v55 = vmax.bf16 %v7137_v8, %v2906_v49  ;;  %v2912_v1 = vadd.bf16 %v7242_v18, %v2466_v50  ;;  %v1190_v31 = vrot.slane %v7594_v22, %v7230_v10 }
  0xbd   :  { %v3107_v59 = vmax.bf16 %v7137_v8, %v2899_v56  ;;  %v2517_v62 = vpack.i.b16 %v1138_v52, %v1138_v52  ;;  %v1214_v0 = vrot.slane %v7594_v22, %v7233_v11  ;;  %v2559_v7 = vpack.i.b16 %v1162_v19, %v1162_v19 }
  0xbe   :  { %5468 = vmatprep.mubr.bf16.mxu0 %v6214_v58  ;;  %v6207_v9 = vcombine.low %v3101_v51, %v3114_v55  ;;  %v3120_v13 = vmax.bf16 %v7137_v8, %v2912_v1  ;;  %v2608_v16 = vpack.i.b16 %v1190_v31, %v1190_v31  ;;  %v1134_v21 = vrot.slane %v7583_v44, %v7226_v6  ;;  %v79_v51 = vld [vmem:[#allocation5 + $0x8] sm:$0xff] }
  0xbf   :  { %v2522_v33 = vrot.slane %v2517_v62, %v7226_v6  ;;  %v2564_v20 = vrot.slane %v2559_v7, %v7226_v6  ;;  %v2650_v25 = vpack.i.b16 %v1214_v0, %v1214_v0  ;;  %v1186_v36 = vrot.slane %v7594_v22, %v7226_v6 }
  0xc0   :  { %5130 = vmatmul.mubr.bf16.gmra.mrb[24].mxu1 %v6207_v9  ;;  %v6213_v34 = vcombine.low %v3107_v59, %v3120_v13  ;;  %v2613_v11 = vrot.slane %v2608_v16, %v7226_v6  ;;  %v2510_v39 = vpack.i.b16 %v1134_v21, %v1134_v21  ;;  %v1158_v41 = vrot.slane %v7583_v44, %v7238_v15  ;;  %v7633_v59 = vld.sshfl [vmem:[#allocation3 + $0x20] sm:$0xff pattern:$0x75316420]  ;;  %v82_v13 = vld [vmem:[#allocation5 + $0x20] sm:$0xff] }
  0xc1   :  { %v2920_v42 = vadd.bf16 %v7240_v17, %v2522_v33  ;;  %v2655_v35 = vrot.slane %v2650_v25, %v7226_v6  ;;  %v2926_v45 = vadd.bf16 %v7252_v28, %v2564_v20  ;;  %v2601_v38 = vpack.i.b16 %v1186_v36, %v1186_v36  ;;  %v7645_v9 = vld.sshfl [vmem:[#allocation3 + $0x30] sm:$0x33 pattern:$0x75316420] }
  0xc2   :  { %5469 = vmatmul.mubr.bf16.gmra.mrb[24].mxu0 %v6213_v34  ;;  %v2933_v47 = vadd.bf16 %v7240_v17, %v2613_v11  ;;  %v2515_v48 = vrot.slane %v2510_v39, %v7226_v6  ;;  %v1210_v49 = vrot.slane %v7594_v22, %v7238_v15  ;;  %v2552_v50 = vpack.i.b16 %v1158_v41, %v1158_v41  ;;  %v7635_v15 = vld.sshfl [vmem:[#allocation3 + $0x28] sm:$0xff pattern:$0x75316420] }
  0xc3   :  { %v3128_v56 = vmax.bf16 %v7137_v8, %v2920_v42  ;;  %v2939_v52 = vadd.bf16 %v7252_v28, %v2655_v35  ;;  %v3134_v19 = vmax.bf16 %v7137_v8, %v2926_v45  ;;  %v2606_v58 = vrot.slane %v2601_v38, %v7226_v6 }
  0xc4   :  { %v3141_v55 = vmax.bf16 %v7137_v8, %v2933_v47  ;;  %v2919_v1 = vadd.bf16 %v7235_v14, %v2515_v48  ;;  %v2557_v17 = vrot.slane %v2552_v50, %v7226_v6  ;;  %v2643_v31 = vpack.i.b16 %v1210_v49, %v1210_v49 }
  0xc5   :  { %v3147_v62 = vmax.bf16 %v7137_v8, %v2939_v52  ;;  %v2932_v0 = vadd.bf16 %v7235_v14, %v2606_v58  ;;  %v1353_v28 = vrot.slane %v1348_v4, %v7226_v6  ;;  %v7643_v7 = vcombine.low %v79_v51, %v79_v51 }
  0xc6   :  { %v6221_v16 = vcombine.low %v3128_v56, %v3141_v55  ;;  %v3127_v21 = vmax.bf16 %v7137_v8, %v2919_v1  ;;  %v2648_v33 = vrot.slane %v2643_v31, %v7226_v6  ;;  %v2925_v20 = vadd.bf16 %v7242_v18, %v2557_v17 }
  0xc7   :  { %v6227_v25 = vcombine.low %v3134_v19, %v3147_v62  ;;  %v3140_v14 = vmax.bf16 %v7137_v8, %v2932_v0  ;;  %v7651_v36 = vcombine.high %v79_v51, %v79_v51  ;;  %v184_v57 = vcombine.low %v7633_v59, %v7635_v15 }
  0xc8   :  { %5139 = vmatprep.mubr.bf16.mxu1 %v6221_v16  ;;  %v2938_v4 = vadd.bf16 %v7242_v18, %v2648_v33  ;;  %v3133_v34 = vmax.bf16 %v7137_v8, %v2925_v20  ;;  %v7659_v11 = vrot.slane %v7645_v9, %v7220_v53  ;;  %v7661_v39 = vcombine.low %v82_v13, %v82_v13 }
  0xc9   :  { %5478 = vmatprep.mubr.bf16.mxu0 %v6227_v25  ;;  %v6220_v41 = vcombine.low %v3127_v21, %v3140_v14  ;;  %v2740_v42 = vadd.bf16 %v7651_v36, %v7454_v3  ;;  %v2753_v35 = vadd.bf16 %v7651_v36, %v1353_v28  ;;  %v7667_v45 = vrot.slane %v184_v57, %v7220_v53 }
  0xca   :  { %v3146_v18 = vmax.bf16 %v7137_v8, %v2938_v4  ;;  %v7670_v38 = vcombine.high %v82_v13, %v82_v13  ;;  %v414_v47 = vrot.slane %v7248_v24, %v7520_v61  ;;  %v466_v48 = vrot.slane %v7262_v32, %v7520_v61 }
  0xcb   :  { %5140 = vmatmul.mubr.bf16.gmra.mrb[28].mxu1 %v6220_v41  ;;  %v2948_v49 = vmax.bf16 %v7137_v8, %v2740_v42  ;;  %v2961_v3 = vmax.bf16 %v7137_v8, %v2753_v35  ;;  %v215_v50 = vcombine.low %v7667_v45, %v7659_v11  ;;  %v522_v51 = vrot.slane %v7250_v26, %v7422_v2 }
  0xcc   :  { %v6226_v56 = vcombine.low %v3133_v34, %v3146_v18  ;;  %v1250_v52 = vpack.i.b16 %v414_v47, %v414_v47  ;;  %v1341_v19 = vpack.i.b16 %v466_v48, %v466_v48  ;;  %v574_v58 = vrot.slane %v7272_v37, %v7422_v2 }
  0xcd   :  { %v6132_v55 = vcombine.low %v2948_v49, %v2961_v3  ;;  %v342_v1 = vunpack.i.h.s16 %v215_v50  ;;  %v7684_v17 = vpack.i.b16 %v215_v50, %v215_v50  ;;  %v1439_v31 = vpack.i.b16 %v522_v51, %v522_v51 }
  0xce   :  { %5479 = vmatmul.mubr.bf16.gmra.mrb[28].mxu0 %v6226_v56  ;;  %v1255_v62 = vrot.slane %v1250_v52, %v7226_v6  ;;  %v1346_v0 = vrot.slane %v1341_v19, %v7226_v6  ;;  %v1530_v28 = vpack.i.b16 %v574_v58, %v574_v58  ;;  %v185_v13 = vcombine.high %v7633_v59, %v7635_v15  ;;  %v6916_v56 = vld [vmem:[#allocation7 + $0x214] ss:$8 sps:$4 sm:$0xff]  }
  0xcf   :  { %5182 = vmatprep.mubr.bf16.mxu1 %v6132_v55  ;;  %v7690_v16 = vpack.i.b16 %v342_v1, %v342_v1  ;;  %v442_v21 = vrot.slane %v7684_v17, %v7230_v10  ;;  %v438_v33 = vrot.slane %v7684_v17, %v7226_v6  ;;  %v1444_v20 = vrot.slane %v1439_v31, %v7226_v6 }
  0xd0   :  { %v2739_v25 = vadd.bf16 %v7643_v7, %v1255_v62  ;;  %v2752_v14 = vadd.bf16 %v7643_v7, %v1346_v0  ;;  %v1535_v57 = vrot.slane %v1530_v28, %v7226_v6  ;;  %v186_v59 = vcombine.high %v7645_v9, %v7645_v9  ;;  %v6908_v9 = vld [vmem:[#allocation7 + $0x200] ss:$8 sps:$4 sm:$0xff]  }
  0xd1   :  { %v494_v15 = vrot.slane %v7690_v16, %v7230_v10  ;;  %v1299_v4 = vpack.i.b16 %v442_v21, %v442_v21  ;;  %v490_v34 = vrot.slane %v7690_v16, %v7226_v6  ;;  %v1292_v41 = vpack.i.b16 %v438_v33, %v438_v33 }
  0xd2   :  { %v2947_v42 = vmax.bf16 %v7137_v8, %v2739_v25  ;;  %v2960_v35 = vmax.bf16 %v7137_v8, %v2752_v14  ;;  %v2766_v18 = vadd.bf16 %v7651_v36, %v1444_v20  ;;  %v2779_v47 = vadd.bf16 %v7651_v36, %v1535_v57  ;;  %v6914_v57 = vld [vmem:[#allocation7 + $0x210] ss:$8 sps:$4 sm:$0xff]  }
  0xd3   :  { %v1304_v48 = vrot.slane %v1299_v4, %v7226_v6  ;;  %v1390_v49 = vpack.i.b16 %v494_v15, %v494_v15  ;;  %v1297_v3 = vrot.slane %v1292_v41, %v7226_v6  ;;  %v1383_v50 = vpack.i.b16 %v490_v34, %v490_v34  ;;  %v6922_v34 = vld [vmem:[#allocation7 + $0x224] ss:$8 sps:$4 sm:$0xff]  }
  0xd4   :  { %v6131_v51 = vcombine.low %v2947_v42, %v2960_v35  ;;  %v2974_v52 = vmax.bf16 %v7137_v8, %v2766_v18  ;;  %v2987_v19 = vmax.bf16 %v7137_v8, %v2779_v47  ;;  %v7715_v58 = vrot.slane %v185_v13, %v7220_v53 }
  0xd5   :  { %v1395_v55 = vrot.slane %v1390_v49, %v7226_v6  ;;  %v2746_v1 = vadd.bf16 %v7670_v38, %v1304_v48  ;;  %v1388_v31 = vrot.slane %v1383_v50, %v7226_v6  ;;  %v2745_v62 = vadd.bf16 %v7661_v39, %v1297_v3 }
  0xd6   :  { %5183 = vmatmul.mubr.bf16.vlgmr.msra.gmra.mrb[0].mxu1 %v6131_v51  ;;  %v6145_v0 = vcombine.low %v2974_v52, %v2987_v19  ;;  %v7722_v28 = vrot.slane %v186_v59, %v7220_v53  ;;  %v518_v21 = vrot.slane %v7250_v26, %v7520_v61  ;;  %v570_v13 = vrot.slane %v7272_v37, %v7520_v61  ;;  %v6911_v51 = vld [vmem:[#allocation7 + $0x500] ss:$8 sps:$4 sm:$0xff]  }
  0xd7   :  { %v2759_v33 = vadd.bf16 %v7670_v38, %v1395_v55  ;;  %v2954_v20 = vmax.bf16 %v7137_v8, %v2746_v1  ;;  %v2758_v25 = vadd.bf16 %v7661_v39, %v1388_v31  ;;  %v2953_v14 = vmax.bf16 %v7137_v8, %v2745_v62  ;;  %5264 = vmatpush1.bf16.msra.mxu1 %v6908_v9  ;;  %v6919_v55 = vld [vmem:[#allocation7 + $0x514] ss:$8 sps:$4 sm:$0xff]  }
  0xd8   :  { %5265 = vmatprep.subr.bf16.mxu1 %v6916_v56  ;;  %5192 = vmatprep.mubr.bf16.mxu1 %v6145_v0  ;;  %v217_v59 = vcombine.low %v7715_v58, %v7722_v28  ;;  %v1432_v15 = vpack.i.b16 %v518_v21, %v518_v21  ;;  %v1523_v4 = vpack.i.b16 %v570_v13, %v570_v13  ;;  %v6920_v56 = vld [vmem:[#allocation7 + $0x220] ss:$8 sps:$4 sm:$0xff]   ;;  %v6928_v21 = vld [vmem:[#allocation7 + $0x234] ss:$8 sps:$4 sm:$0xff]  }
  0xd9   :  { %v2967_v41 = vmax.bf16 %v7137_v8, %v2759_v33  ;;  %v2966_v42 = vmax.bf16 %v7137_v8, %v2758_v25  ;;  %v626_v35 = vrot.slane %v7256_v29, %v7422_v2  ;;  %v678_v18 = vrot.slane %v7330_v12, %v7422_v2 }
  0xda   :  { %v346_v47 = vunpack.i.h.s16 %v217_v59  ;;  %v7740_v48 = vpack.i.b16 %v217_v59, %v217_v59  ;;  %v1437_v49 = vrot.slane %v1432_v15, %v7226_v6  ;;  %v1528_v9 = vrot.slane %v1523_v4, %v7226_v6  ;;  %v6917_v4 = vld [vmem:[#allocation7 + $0x510] ss:$8 sps:$4 sm:$0xff]  }
  0xdb   :  { %v6138_v3 = vcombine.low %v2954_v20, %v2967_v41  ;;  %v6137_v50 = vcombine.low %v2953_v14, %v2966_v42  ;;  %5266 = vmatpush1.bf16.msra.mxu1 %v6914_v57  ;;  %v1621_v52 = vpack.i.b16 %v626_v35, %v626_v35  ;;  %v1712_v19 = vpack.i.b16 %v678_v18, %v678_v18  ;;  %v6926_v42 = vld [vmem:[#allocation7 + $0x230] ss:$8 sps:$4 sm:$0xff]  }
  0xdc   :  { %v7744_v1 = vpack.i.b16 %v346_v47, %v346_v47  ;;  %v546_v31 = vrot.slane %v7740_v48, %v7230_v10  ;;  %v2765_v62 = vadd.bf16 %v7643_v7, %v1437_v49  ;;  %v2778_v0 = vadd.bf16 %v7643_v7, %v1528_v9  ;;  %5267 = vmatprep.subr.bf16.mxu1 %v6922_v34  ;;  %v6925_v49 = vld [vmem:[#allocation7 + $0x524] ss:$8 sps:$4 sm:$0xff]  }
  0xdd   :  { %5521 = vmatprep.mubr.bf16.mxu0 %v6138_v3  ;;  %v542_v13 = vrot.slane %v7740_v48, %v7226_v6  ;;  %v1626_v33 = vrot.slane %v1621_v52, %v7226_v6  ;;  %v1717_v20 = vrot.slane %v1712_v19, %v7226_v6  ;;  %v216_v25 = vcombine.high %v7667_v45, %v7659_v11  ;;  %v6934_v52 = vld [vmem:[#allocation7 + $0x244] ss:$8 sps:$4 sm:$0xff]  }
  0xde   :  { %5522 = vmatmul.mubr.bf16.vlgmr.msra.gmra.mrb[0].mxu0 %v6137_v50  ;;  %v598_v14 = vrot.slane %v7744_v1, %v7230_v10  ;;  %v1481_v57 = vpack.i.b16 %v546_v31, %v546_v31  ;;  %v2973_v59 = vmax.bf16 %v7137_v8, %v2765_v62  ;;  %v2986_v15 = vmax.bf16 %v7137_v8, %v2778_v0 }
  0xdf   :  { %5603 = vmatpush1.bf16.msra.mxu0 %v6911_v51  ;;  %v594_v34 = vrot.slane %v7744_v1, %v7226_v6  ;;  %v1474_v41 = vpack.i.b16 %v542_v13, %v542_v13  ;;  %5268 = vmatpush1.bf16.msra.mxu1 %v6920_v56  ;;  %v2792_v35 = vadd.bf16 %v7651_v36, %v1626_v33  ;;  %v350_v11 = vunpack.i.h.s16 %v216_v25 }
  0xe0   :  { %5604 = vmatprep.subr.bf16.mxu0 %v6919_v55  ;;  %v1486_v45 = vrot.slane %v1481_v57, %v7226_v6  ;;  %v1572_v18 = vpack.i.b16 %v598_v14, %v598_v14  ;;  %v6144_v47 = vcombine.low %v2973_v59, %v2986_v15  ;;  %5269 = vmatprep.subr.bf16.mxu1 %v6928_v21  ;;  %v6923_v21 = vld [vmem:[#allocation7 + $0x520] ss:$8 sps:$4 sm:$0xff]   ;;  %v6931_v14 = vld [vmem:[#allocation7 + $0x534] ss:$8 sps:$4 sm:$0xff]  }
  0xe1   :  { %v1479_v9 = vrot.slane %v1474_v41, %v7226_v6  ;;  %v1565_v3 = vpack.i.b16 %v594_v34, %v594_v34  ;;  %v2805_v50 = vadd.bf16 %v7651_v36, %v1717_v20  ;;  %v3000_v51 = vmax.bf16 %v7137_v8, %v2792_v35  ;;  %v6932_v41 = vld [vmem:[#allocation7 + $0x240] ss:$8 sps:$4 sm:$0xff]  }
  0xe2   :  { %v1577_v56 = vrot.slane %v1572_v18, %v7226_v6  ;;  %v2772_v19 = vadd.bf16 %v7670_v38, %v1486_v45  ;;  %5193 = vmatmul.mubr.bf16.gmra.mrb[4].mxu1 %v6144_v47  ;;  %v7769_v55 = vpack.i.b16 %v216_v25, %v216_v25  ;;  %v7771_v31 = vpack.i.b16 %v350_v11, %v350_v11  ;;  %v6940_v18 = vld [vmem:[#allocation7 + $0x254] ss:$8 sps:$4 sm:$0xff]  }
  0xe3   :  { %5605 = vmatpush1.bf16.msra.mxu0 %v6917_v4  ;;  %v1570_v62 = vrot.slane %v1565_v3, %v7226_v6  ;;  %v2771_v0 = vadd.bf16 %v7661_v39, %v1479_v9  ;;  %5270 = vmatpush1.bf16.msra.mxu1 %v6926_v42  ;;  %v3013_v13 = vmax.bf16 %v7137_v8, %v2805_v50  ;;  %v6929_v50 = vld [vmem:[#allocation7 + $0x530] ss:$8 sps:$4 sm:$0xff]  }
  0xe4   :  { %v2785_v33 = vadd.bf16 %v7670_v38, %v1577_v56  ;;  %v2980_v20 = vmax.bf16 %v7137_v8, %v2772_v19  ;;  %5606 = vmatprep.subr.bf16.mxu0 %v6925_v49  ;;  %v650_v25 = vrot.slane %v7769_v55, %v7230_v10  ;;  %v702_v57 = vrot.slane %v7771_v31, %v7230_v10 }
  0xe5   :  { %v2784_v59 = vadd.bf16 %v7661_v39, %v1570_v62  ;;  %v2979_v15 = vmax.bf16 %v7137_v8, %v2771_v0  ;;  %v6158_v4 = vcombine.low %v3000_v51, %v3013_v13  ;;  %v622_v34 = vrot.slane %v7256_v29, %v7520_v61  ;;  %5271 = vmatprep.subr.bf16.mxu1 %v6934_v52  ;;  %v6937_v13 = vld [vmem:[#allocation7 + $0x544] ss:$8 sps:$4 sm:$0xff]  }
  0xe6   :  { %v2993_v42 = vmax.bf16 %v7137_v8, %v2785_v33  ;;  %v1663_v35 = vpack.i.b16 %v650_v25, %v650_v25  ;;  %v1754_v11 = vpack.i.b16 %v702_v57, %v702_v57  ;;  %v674_v45 = vrot.slane %v7330_v12, %v7520_v61  ;;  %v6938_v33 = vld [vmem:[#allocation7 + $0x250] ss:$8 sps:$4 sm:$0xff]   ;;  %v6946_v57 = vld [vmem:[#allocation7 + $0x264] ss:$8 sps:$4 sm:$0xff]  }
  0xe7   :  { %v2992_v47 = vmax.bf16 %v7137_v8, %v2784_v59  ;;  %5607 = vmatpush1.bf16.msra.mxu0 %v6923_v21  ;;  %5202 = vmatprep.mubr.bf16.mxu1 %v6158_v4  ;;  %v1614_v49 = vpack.i.b16 %v622_v34, %v622_v34  ;;  %v646_v9 = vrot.slane %v7769_v55, %v7226_v6 }
  0xe8   :  { %v6151_v3 = vcombine.low %v2980_v20, %v2993_v42  ;;  %5608 = vmatprep.subr.bf16.mxu0 %v6931_v14  ;;  %v1668_v51 = vrot.slane %v1663_v35, %v7226_v6  ;;  %v1759_v52 = vrot.slane %v1754_v11, %v7226_v6  ;;  %v1705_v56 = vpack.i.b16 %v674_v45, %v674_v45  ;;  %v6935_v11 = vld [vmem:[#allocation7 + $0x540] ss:$8 sps:$4 sm:$0xff]  }
  0xe9   :  { %v6150_v19 = vcombine.low %v2979_v15, %v2992_v47  ;;  %v1619_v62 = vrot.slane %v1614_v49, %v7226_v6  ;;  %v698_v0 = vrot.slane %v7771_v31, %v7226_v6  ;;  %v1656_v21 = vpack.i.b16 %v646_v9, %v646_v9  ;;  %5272 = vmatpush1.bf16.msra.mxu1 %v6932_v41  ;;  %v6943_v9 = vld [vmem:[#allocation7 + $0x554] ss:$8 sps:$4 sm:$0xff]  }
  0xea   :  { %5531 = vmatprep.mubr.bf16.mxu0 %v6151_v3  ;;  %v2798_v20 = vadd.bf16 %v7670_v38, %v1668_v51  ;;  %v2811_v14 = vadd.bf16 %v7670_v38, %v1759_v52  ;;  %v1710_v25 = vrot.slane %v1705_v56, %v7226_v6  ;;  %5273 = vmatprep.subr.bf16.mxu1 %v6940_v18  ;;  %v6944_v3 = vld [vmem:[#allocation7 + $0x260] ss:$8 sps:$4 sm:$0xff]  }
  0xeb   :  { %5532 = vmatmul.mubr.bf16.gmra.mrb[4].mxu0 %v6150_v19  ;;  %v2791_v59 = vadd.bf16 %v7643_v7, %v1619_v62  ;;  %v1661_v15 = vrot.slane %v1656_v21, %v7226_v6  ;;  %v1747_v4 = vpack.i.b16 %v698_v0, %v698_v0  ;;  %v730_v34 = vrot.slane %v7260_v30, %v7422_v2  ;;  %v6952_v19 = vld [vmem:[#allocation7 + $0x274] ss:$8 sps:$4 sm:$0xff]  }
  0xec   :  { %5609 = vmatpush1.bf16.msra.mxu0 %v6929_v50  ;;  %v3006_v41 = vmax.bf16 %v7137_v8, %v2798_v20  ;;  %v3019_v42 = vmax.bf16 %v7137_v8, %v2811_v14  ;;  %v2804_v35 = vadd.bf16 %v7643_v7, %v1710_v25  ;;  %v782_v45 = vrot.slane %v7381_v54, %v7422_v2  ;;  %v6941_v20 = vld [vmem:[#allocation7 + $0x550] ss:$8 sps:$4 sm:$0xff]  }
  0xed   :  { %v2999_v18 = vmax.bf16 %v7137_v8, %v2791_v59  ;;  %v1752_v47 = vrot.slane %v1747_v4, %v7226_v6  ;;  %v2797_v49 = vadd.bf16 %v7661_v39, %v1661_v15  ;;  %5610 = vmatprep.subr.bf16.mxu0 %v6937_v13  ;;  %5274 = vmatpush1.bf16.msra.mxu1 %v6938_v33 }
  0xee   :  { %v6164_v50 = vcombine.low %v3006_v41, %v3019_v42  ;;  %v3012_v51 = vmax.bf16 %v7137_v8, %v2804_v35  ;;  %v1803_v52 = vpack.i.b16 %v730_v34, %v730_v34  ;;  %v1894_v56 = vpack.i.b16 %v782_v45, %v782_v45  ;;  %5275 = vmatprep.subr.bf16.mxu1 %v6946_v57  ;;  %v6949_v41 = vld [vmem:[#allocation7 + $0x564] ss:$8 sps:$4 sm:$0xff]   ;;  %v6950_v42 = vld [vmem:[#allocation7 + $0x270] ss:$8 sps:$4 sm:$0xff]  }
  0xef   :  { %v2810_v62 = vadd.bf16 %v7661_v39, %v1752_v47  ;;  %v3005_v0 = vmax.bf16 %v7137_v8, %v2797_v49  ;;  %v218_v21 = vcombine.high %v7715_v58, %v7722_v28  ;;  %v726_v13 = vrot.slane %v7260_v30, %v7520_v61  ;;  %v6958_v47 = vld [vmem:[#allocation7 + $0x284] ss:$8 sps:$4 sm:$0xff]  }
  0xf0   :  { %5541 = vmatprep.mubr.bf16.mxu0 %v6164_v50  ;;  %v6157_v33 = vcombine.low %v2999_v18, %v3012_v51  ;;  %5611 = vmatpush1.bf16.msra.mxu0 %v6935_v11  ;;  %v1808_v14 = vrot.slane %v1803_v52, %v7226_v6  ;;  %v1899_v25 = vrot.slane %v1894_v56, %v7226_v6  ;;  %v6947_v51 = vld [vmem:[#allocation7 + $0x560] ss:$8 sps:$4 sm:$0xff]  }
  0xf1   :  { %v3018_v57 = vmax.bf16 %v7137_v8, %v2810_v62  ;;  %5612 = vmatprep.subr.bf16.mxu0 %v6943_v9  ;;  %v354_v59 = vunpack.i.h.s16 %v218_v21  ;;  %v7822_v15 = vpack.i.b16 %v218_v21, %v218_v21  ;;  %v778_v58 = vrot.slane %v7381_v54, %v7520_v61  ;;  %5276 = vmatpush1.bf16.msra.mxu1 %v6944_v3 }
  0xf2   :  { %5203 = vmatmul.mubr.bf16.gmra.mrb[8].mxu1 %v6157_v33  ;;  %v2818_v28 = vadd.bf16 %v7651_v36, %v1808_v14  ;;  %v2831_v4 = vadd.bf16 %v7651_v36, %v1899_v25  ;;  %v1796_v34 = vpack.i.b16 %v726_v13, %v726_v13  ;;  %5277 = vmatprep.subr.bf16.mxu1 %v6952_v19  ;;  %v6956_v14 = vld [vmem:[#allocation7 + $0x280] ss:$8 sps:$4 sm:$0xff]  }
  0xf3   :  { %v6163_v35 = vcombine.low %v3005_v0, %v3018_v57  ;;  %v7828_v11 = vpack.i.b16 %v354_v59, %v354_v59  ;;  %v754_v45 = vrot.slane %v7822_v15, %v7230_v10  ;;  %v1887_v18 = vpack.i.b16 %v778_v58, %v778_v58  ;;  %v6955_v0 = vld [vmem:[#allocation7 + $0x574] ss:$8 sps:$4 sm:$0xff]  }
  0xf4   :  { %5613 = vmatpush1.bf16.msra.mxu0 %v6941_v20  ;;  %v3026_v49 = vmax.bf16 %v7137_v8, %v2818_v28  ;;  %v3039_v9 = vmax.bf16 %v7137_v8, %v2831_v4  ;;  %v1801_v3 = vrot.slane %v1796_v34, %v7226_v6  ;;  %v750_v50 = vrot.slane %v7822_v15, %v7226_v6  ;;  %v7843_v20 = vld.sshfl [vmem:[#allocation3 + $0x54] sm:$0xff pattern:$0x75316420]  ;;  %v7847_v28 = vld.sshfl [vmem:[#allocation3 + $0x5c] sm:$0xff pattern:$0x75316420] }
  0xf5   :  { %5542 = vmatmul.mubr.bf16.gmra.mrb[8].mxu0 %v6163_v35  ;;  %v806_v52 = vrot.slane %v7828_v11, %v7230_v10  ;;  %v1845_v56 = vpack.i.b16 %v754_v45, %v754_v45  ;;  %v1892_v19 = vrot.slane %v1887_v18, %v7226_v6  ;;  %v802_v62 = vrot.slane %v7828_v11, %v7226_v6  ;;  %v6964_v4 = vld [vmem:[#allocation7 + $0x294] ss:$8 sps:$4 sm:$0xff]  }
  0xf6   :  { %v6171_v21 = vcombine.low %v3026_v49, %v3039_v9  ;;  %v2817_v13 = vadd.bf16 %v7643_v7, %v1801_v3  ;;  %v1838_v33 = vpack.i.b16 %v750_v50, %v750_v50  ;;  %5614 = vmatprep.subr.bf16.mxu0 %v6949_v41  ;;  %5278 = vmatpush1.bf16.msra.mxu1 %v6950_v42  ;;  %v6953_v41 = vld [vmem:[#allocation7 + $0x570] ss:$8 sps:$4 sm:$0xff]  }
  0xf7   :  { %v1850_v25 = vrot.slane %v1845_v56, %v7226_v6  ;;  %v1936_v57 = vpack.i.b16 %v806_v52, %v806_v52  ;;  %v2830_v59 = vadd.bf16 %v7643_v7, %v1892_v19  ;;  %v1929_v58 = vpack.i.b16 %v802_v62, %v802_v62  ;;  %5279 = vmatprep.subr.bf16.mxu1 %v6958_v47  ;;  %v7857_v47 = vld.sshfl [vmem:[#allocation3 + $0x64] sm:$0x33 pattern:$0x75316420]  ;;  %v6961_v56 = vld [vmem:[#allocation7 + $0x584] ss:$8 sps:$4 sm:$0xff]  }
  0xf8   :  { %5212 = vmatprep.mubr.bf16.mxu1 %v6171_v21  ;;  %v3025_v34 = vmax.bf16 %v7137_v8, %v2817_v13  ;;  %v1843_v35 = vrot.slane %v1838_v33, %v7226_v6  ;;  %5615 = vmatpush1.bf16.msra.mxu0 %v6947_v51  ;;  %v834_v42 = vrot.slane %v7445_v60, %v7422_v2  ;;  %v6962_v19 = vld [vmem:[#allocation7 + $0x290] ss:$8 sps:$4 sm:$0xff]   ;;  %v6970_v33 = vld [vmem:[#allocation7 + $0x2a4] ss:$8 sps:$4 sm:$0xff]  }
  0xf9   :  { %v1941_v45 = vrot.slane %v1936_v57, %v7226_v6  ;;  %v2824_v18 = vadd.bf16 %v7670_v38, %v1850_v25  ;;  %v3038_v49 = vmax.bf16 %v7137_v8, %v2830_v59  ;;  %v1934_v9 = vrot.slane %v1929_v58, %v7226_v6  ;;  %5616 = vmatprep.subr.bf16.mxu0 %v6955_v0 }
  0xfa   :  { %v2823_v3 = vadd.bf16 %v7661_v39, %v1843_v35  ;;  %v886_v50 = vrot.slane %v7458_v5, %v7422_v2  ;;  %v1985_v51 = vpack.i.b16 %v834_v42, %v834_v42  ;;  %v304_v52 = vcombine.low %v7843_v20, %v7847_v28  ;;  %5280 = vmatpush1.bf16.msra.mxu1 %v6956_v14  ;;  %v6959_v14 = vld [vmem:[#allocation7 + $0x580] ss:$8 sps:$4 sm:$0xff]  }
  0xfb   :  { %v2837_v62 = vadd.bf16 %v7670_v38, %v1941_v45  ;;  %v3032_v21 = vmax.bf16 %v7137_v8, %v2824_v18  ;;  %v6170_v13 = vcombine.low %v3025_v34, %v3038_v49  ;;  %v2836_v0 = vadd.bf16 %v7661_v39, %v1934_v9  ;;  %5281 = vmatprep.subr.bf16.mxu1 %v6964_v4 }
  0xfc   :  { %v3031_v25 = vmax.bf16 %v7137_v8, %v2823_v3  ;;  %5617 = vmatpush1.bf16.msra.mxu0 %v6953_v41  ;;  %v1990_v57 = vrot.slane %v1985_v51, %v7226_v6  ;;  %v2076_v59 = vpack.i.b16 %v886_v50, %v886_v50  ;;  %v7870_v58 = vrot.slane %v304_v52, %v7220_v53  ;;  %v6967_v41 = vld [vmem:[#allocation7 + $0x594] ss:$8 sps:$4 sm:$0xff]  }
  0xfd   :  { %v3045_v35 = vmax.bf16 %v7137_v8, %v2837_v62  ;;  %5213 = vmatmul.mubr.bf16.gmra.mrb[12].mxu1 %v6170_v13  ;;  %v3044_v42 = vmax.bf16 %v7137_v8, %v2836_v0  ;;  %v7876_v34 = vrot.slane %v7857_v47, %v7220_v53  ;;  %v830_v4 = vrot.slane %v7445_v60, %v7520_v61  ;;  %v6968_v62 = vld [vmem:[#allocation7 + $0x2a0] ss:$8 sps:$4 sm:$0xff]  }
  0xfe   :  { %v2081_v45 = vrot.slane %v2076_v59, %v7226_v6  ;;  %v2844_v18 = vadd.bf16 %v7651_v36, %v1990_v57  ;;  %v882_v49 = vrot.slane %v7458_v5, %v7520_v61  ;;  %5618 = vmatprep.subr.bf16.mxu0 %v6961_v56  ;;  %5282 = vmatpush1.bf16.msra.mxu1 %v6962_v19  ;;  %v7885_v9 = vsub.s32 5, %v7217_v46  ;;  %v6965_v59 = vld [vmem:[#allocation7 + $0x590] ss:$8 sps:$4 sm:$0xff]  }
  0xff   :  { %v6177_v3 = vcombine.low %v3032_v21, %v3045_v35  ;;  %v6176_v50 = vcombine.low %v3031_v25, %v3044_v42  ;;  %v335_v51 = vcombine.low %v7870_v58, %v7876_v34  ;;  %v1978_v52 = vpack.i.b16 %v830_v4, %v830_v4  ;;  %5283 = vmatprep.subr.bf16.mxu1 %v6970_v33  ;;  %v6973_v35 = vld [vmem:[#allocation7 + $0x5a4] ss:$8 sps:$4 sm:$0xff]  }
 0x100   :  { %v2857_v13 = vadd.bf16 %v7651_v36, %v2081_v45  ;;  %v3052_v0 = vmax.bf16 %v7137_v8, %v2844_v18  ;;  %v2069_v57 = vpack.i.b16 %v882_v49, %v882_v49  ;;  %5619 = vmatpush1.bf16.msra.mxu0 %v6959_v14  ;;  %v938_v56 = vrot.slane %v7471_v23, %v7422_v2 }
 0x101   :  { %5551 = vmatprep.mubr.bf16.mxu0 %v6177_v3  ;;  %v358_v19 = vunpack.i.h.s16 %v335_v51  ;;  %v7893_v21 = vpack.i.b16 %v335_v51, %v335_v51  ;;  %v1983_v25 = vrot.slane %v1978_v52, %v7226_v6  ;;  %5620 = vmatprep.subr.bf16.mxu0 %v6967_v41  ;;  %v990_v33 = vrot.slane %v7505_v43, %v7422_v2 }
 0x102   :  { %5552 = vmatmul.mubr.bf16.gmra.mrb[12].mxu0 %v6176_v50  ;;  %v3065_v42 = vmax.bf16 %v7137_v8, %v2857_v13  ;;  %v2074_v14 = vrot.slane %v2069_v57, %v7226_v6  ;;  %v2167_v4 = vpack.i.b16 %v938_v56, %v938_v56  ;;  %v305_v45 = vcombine.high %v7843_v20, %v7847_v28  ;;  %v6976_v50 = vld [vmem:[#allocation7 + $0x2b4] ss:$8 sps:$4 sm:$0xff]   ;;  %v6971_v20 = vld [vmem:[#allocation7 + $0x5a0] ss:$8 sps:$4 sm:$0xff]  }
 0x103   :  { %8788 = vst [vmem:[#allocation11_spill] sm:$0xff] %v7893_v21  ;;  %v7902_v18 = vpack.i.b16 %v358_v19, %v358_v19  ;;  %v858_v49 = vrot.slane %v7893_v21, %v7230_v10  ;;  %v2843_v41 = vadd.bf16 %v7643_v7, %v1983_v25  ;;  %v854_v3 = vrot.slane %v7893_v21, %v7226_v6 }
 0x104   :  { %5284 = vmatpush1.bf16.msra.mxu1 %v6968_v62  ;;  %v6184_v51 = vcombine.low %v3052_v0, %v3065_v42  ;;  %v2856_v52 = vadd.bf16 %v7643_v7, %v2074_v14  ;;  %5621 = vmatpush1.bf16.msra.mxu0 %v6965_v59  ;;  %v2172_v13 = vrot.slane %v2167_v4, %v7226_v6  ;;  %v6979_v62 = vld [vmem:[#allocation7 + $0x5b4] ss:$8 sps:$4 sm:$0xff]  }
 0x105   :  { %8789 = vst [vmem:[#allocation12_spill] sm:$0xff] %v7902_v18  ;;  %v2258_v57 = vpack.i.b16 %v990_v33, %v990_v33  ;;  %v910_v28 = vrot.slane %v7902_v18, %v7230_v10  ;;  %v2027_v56 = vpack.i.b16 %v858_v49, %v858_v49  ;;  %v3051_v19 = vmax.bf16 %v7137_v8, %v2843_v41  ;;  %v6974_v41 = vld [vmem:[#allocation7 + $0x2b0] ss:$8 sps:$4 sm:$0xff]  }
 0x106   :  { %v906_v25 = vrot.slane %v7902_v18, %v7226_v6  ;;  %5622 = vmatprep.subr.bf16.mxu0 %v6973_v35  ;;  %5222 = vmatprep.mubr.bf16.mxu1 %v6184_v51  ;;  %v3064_v0 = vmax.bf16 %v7137_v8, %v2856_v52  ;;  %v2020_v42 = vpack.i.b16 %v854_v3, %v854_v3  ;;  %v6977_v52 = vld [vmem:[#allocation7 + $0x5b0] ss:$8 sps:$4 sm:$0xff]  }
 0x107   :  { %v2263_v59 = vrot.slane %v2258_v57, %v7226_v6  ;;  %v2870_v33 = vadd.bf16 %v7651_v36, %v2172_v13  ;;  %v2032_v14 = vrot.slane %v2027_v56, %v7226_v6  ;;  %v2118_v4 = vpack.i.b16 %v910_v28, %v910_v28  ;;  %5285 = vmatprep.subr.bf16.mxu1 %v6976_v50 }
 0x108   :  { %v2111_v40 = vpack.i.b16 %v906_v25, %v906_v25  ;;  %v306_v49 = vcombine.high %v7857_v47, %v7857_v47  ;;  %v6183_v18 = vcombine.low %v3051_v19, %v3064_v0  ;;  %v2025_v35 = vrot.slane %v2020_v42, %v7226_v6  ;;  %5623 = vmatpush1.bf16.msra.mxu0 %v6971_v20  ;;  %v6982_v47 = vld [vmem:[#allocation7 + $0x2c4] ss:$8 sps:$4 sm:$0xff]  }
 0x109   :  { %v2883_v51 = vadd.bf16 %v7651_v36, %v2263_v59  ;;  %v3078_v3 = vmax.bf16 %v7137_v8, %v2870_v33  ;;  %v2123_v13 = vrot.slane %v2118_v4, %v7226_v6  ;;  %v2850_v57 = vadd.bf16 %v7670_v38, %v2032_v14  ;;  %5624 = vmatprep.subr.bf16.mxu0 %v6979_v62  ;;  %v6985_v0 = vld [vmem:[#allocation7 + $0x5c4] ss:$8 sps:$4 sm:$0xff]   ;;  %v6980_v62 = vld [vmem:[#allocation7 + $0x2c0] ss:$8 sps:$4 sm:$0xff]  }
 0x10a   :  { %v2116_v28 = vrot.slane %v2111_v40, %v7226_v6  ;;  %v7929_v56 = vrot.slane %v305_v45, %v7220_v53  ;;  %5223 = vmatmul.mubr.bf16.gmra.mrb[16].mxu1 %v6183_v18  ;;  %v2849_v50 = vadd.bf16 %v7661_v39, %v2025_v35  ;;  %v7934_v25 = vrot.slane %v306_v49, %v7220_v53  ;;  %v6983_v4 = vld [vmem:[#allocation7 + $0x5c0] ss:$8 sps:$4 sm:$0xff]  }
 0x10b   :  { %v3091_v19 = vmax.bf16 %v7137_v8, %v2883_v51  ;;  %v934_v20 = vrot.slane %v7471_v23, %v7520_v61  ;;  %v2863_v42 = vadd.bf16 %v7670_v38, %v2123_v13  ;;  %v3058_v40 = vmax.bf16 %v7137_v8, %v2850_v57  ;;  %5286 = vmatpush1.bf16.msra.mxu1 %v6974_v41 }
 0x10c   :  { %v2862_v45 = vadd.bf16 %v7661_v39, %v2116_v28  ;;  %v986_v18 = vrot.slane %v7505_v43, %v7520_v61  ;;  %v3057_v59 = vmax.bf16 %v7137_v8, %v2849_v50  ;;  %v337_v53 = vcombine.low %v7929_v56, %v7934_v25  ;;  %5625 = vmatpush1.bf16.msra.mxu0 %v6977_v52 }
 0x10d   :  { %v6197_v33 = vcombine.low %v3078_v3, %v3091_v19  ;;  %v2160_v14 = vpack.i.b16 %v934_v20, %v934_v20  ;;  %v3071_v49 = vmax.bf16 %v7137_v8, %v2863_v42  ;;  %v1042_v13 = vrot.slane %v7447_v63, %v7422_v2  ;;  %5287 = vmatprep.subr.bf16.mxu1 %v6982_v47  ;;  %v6988_v42 = vld [vmem:[#allocation7 + $0x2d4] ss:$8 sps:$4 sm:$0xff]  }
 0x10e   :  { %v3070_v35 = vmax.bf16 %v7137_v8, %v2862_v45  ;;  %v2251_v51 = vpack.i.b16 %v986_v18, %v986_v18  ;;  %v362_v41 = vunpack.i.h.s16 %v337_v53  ;;  %v7950_v57 = vpack.i.b16 %v337_v53, %v337_v53  ;;  %5626 = vmatprep.subr.bf16.mxu0 %v6985_v0  ;;  %v6986_v53 = vld [vmem:[#allocation7 + $0x2d0] ss:$8 sps:$4 sm:$0xff]   ;;  %v7963_v0 = vld [vmem:[#allocation7 + $0x5d4] ss:$8 sps:$4 sm:$0xff]  }
 0x10f   :  { %5232 = vmatprep.mubr.bf16.mxu1 %v6197_v33  ;;  %v2165_v3 = vrot.slane %v2160_v14, %v7226_v6  ;;  %v1094_v28 = vrot.slane %v7473_v27, %v7422_v2  ;;  %v6190_v52 = vcombine.low %v3058_v40, %v3071_v49  ;;  %v2349_v20 = vpack.i.b16 %v1042_v13, %v1042_v13  ;;  %v7969_v49 = vld [vmem:[#allocation7 + $0x5d0] ss:$8 sps:$4 sm:$0xff]  }
 0x110   :  { %8790 = vst [vmem:[#allocation13_spill] sm:$0xff] %v7950_v57  ;;  %v6189_v50 = vcombine.low %v3057_v59, %v3070_v35  ;;  %v2256_v19 = vrot.slane %v2251_v51, %v7226_v6  ;;  %5288 = vmatpush1.bf16.msra.mxu1 %v6980_v62  ;;  %v7956_v45 = vpack.i.b16 %v362_v41, %v362_v41  ;;  %v6994_v41 = vld [vmem:[#allocation7 + $0x2e4] ss:$8 sps:$4 sm:$0xff]  }
 0x111   :  { %v962_v47 = vrot.slane %v7950_v57, %v7230_v10  ;;  %v2869_v18 = vadd.bf16 %v7643_v7, %v2165_v3  ;;  %v958_v33 = vrot.slane %v7950_v57, %v7226_v6  ;;  %5627 = vmatpush1.bf16.msra.mxu0 %v6983_v4  ;;  %5561 = vmatprep.mubr.bf16.mxu0 %v6190_v52 }
 0x112   :  { %8791 = vst [vmem:[#allocation14_spill] sm:$0xff] %v7956_v45  ;;  %v2882_v40 = vadd.bf16 %v7643_v7, %v2256_v19  ;;  %v2354_v62 = vrot.slane %v2349_v20, %v7226_v6  ;;  %v2440_v59 = vpack.i.b16 %v1094_v28, %v1094_v28  ;;  %v336_v14 = vcombine.high %v7870_v58, %v7876_v34 }
 0x113   :  { %5562 = vmatmul.mubr.bf16.gmra.mrb[16].mxu0 %v6189_v50  ;;  %v1014_v35 = vrot.slane %v7956_v45, %v7230_v10  ;;  %v2209_v51 = vpack.i.b16 %v962_v47, %v962_v47  ;;  %v3077_v4 = vmax.bf16 %v7137_v8, %v2869_v18  ;;  %v1010_v13 = vrot.slane %v7956_v45, %v7226_v6  ;;  %v7981_v47 = vld [vmem:[#allocation7 + $0x5e4] ss:$8 sps:$4 sm:$0xff]  }
 0x114   :  { %v3090_v3 = vmax.bf16 %v7137_v8, %v2882_v40  ;;  %v2202_v52 = vpack.i.b16 %v958_v33, %v958_v33  ;;  %v2445_v28 = vrot.slane %v2440_v59, %v7226_v6  ;;  %v2896_v58 = vadd.bf16 %v7651_v36, %v2354_v62  ;;  %5289 = vmatprep.subr.bf16.mxu1 %v6988_v42  ;;  %v6992_v42 = vld [vmem:[#allocation7 + $0x2e0] ss:$8 sps:$4 sm:$0xff]  }
 0x115   :  { %v2214_v34 = vrot.slane %v2209_v51, %v7226_v6  ;;  %v2300_v50 = vpack.i.b16 %v1014_v35, %v1014_v35  ;;  %v2293_v19 = vpack.i.b16 %v1010_v13, %v1010_v13  ;;  %v366_v20 = vunpack.i.h.s16 %v336_v14  ;;  %5628 = vmatprep.subr.bf16.mxu0 %v7963_v0  ;;  %5290 = vmatpush1.bf16.msra.mxu1 %v6986_v53  ;;  %v7992_v53 = vld [vmem:[#allocation7 + $0x5e0] ss:$8 sps:$4 sm:$0xff]  }
 0x116   :  { %8792 = vst [vmem:[#allocation15_spill] sm:$0xff] %v7981_v47  ;;  %v6196_v18 = vcombine.low %v3077_v4, %v3090_v3  ;;  %v2207_v45 = vrot.slane %v2202_v52, %v7226_v6  ;;  %v2909_v33 = vadd.bf16 %v7651_v36, %v2445_v28  ;;  %v3104_v40 = vmax.bf16 %v7137_v8, %v2896_v58 }
 0x117   :  { %5629 = vmatpush1.bf16.msra.mxu0 %v7969_v49  ;;  %v2305_v62 = vrot.slane %v2300_v50, %v7226_v6  ;;  %v2876_v59 = vadd.bf16 %v7670_v38, %v2214_v34  ;;  %v2298_v35 = vrot.slane %v2293_v19, %v7226_v6  ;;  %v7990_v51 = vpack.i.b16 %v336_v14, %v336_v14  ;;  %v7000_v34 = vld [vmem:[#allocation7 + $0x2f4] ss:$8 sps:$4 sm:$0xff]  }
 0x118   :  { %5291 = vmatprep.subr.bf16.mxu1 %v6994_v41  ;;  %5233 = vmatmul.mubr.bf16.gmra.mrb[20].mxu1 %v6196_v18  ;;  %v2875_v4 = vadd.bf16 %v7661_v39, %v2207_v45  ;;  %v3117_v13 = vmax.bf16 %v7137_v8, %v2909_v33  ;;  %v7996_v3 = vpack.i.b16 %v366_v20, %v366_v20  ;;  %v8011_v18 = vld [vmem:[#allocation7 + $0x5f4] ss:$8 sps:$4 sm:$0xff]  }
 0x119   :  { %v1038_v52 = vrot.slane %v7447_v63, %v7520_v61  ;;  %v2889_v28 = vadd.bf16 %v7670_v38, %v2305_v62  ;;  %v3084_v58 = vmax.bf16 %v7137_v8, %v2876_v59  ;;  %v2888_v14 = vadd.bf16 %v7661_v39, %v2298_v35  ;;  %5630 = vmatprep.subr.bf16.mxu0 %v7981_v47 }
 0x11a   :  { %v1066_v41 = vrot.slane %v7990_v51, %v7230_v10  ;;  %v3083_v45 = vmax.bf16 %v7137_v8, %v2875_v4  ;;  %v6210_v50 = vcombine.low %v3104_v40, %v3117_v13  ;;  %v1118_v19 = vrot.slane %v7996_v3, %v7230_v10  ;;  %5292 = vmatpush1.bf16.msra.mxu1 %v6992_v42 }
 0x11b   :  { %v1090_v20 = vrot.slane %v7473_v27, %v7520_v61  ;;  %v3097_v33 = vmax.bf16 %v7137_v8, %v2889_v28  ;;  %v3096_v62 = vmax.bf16 %v7137_v8, %v2888_v14  ;;  %v2342_v35 = vpack.i.b16 %v1038_v52, %v1038_v52  ;;  %5631 = vmatpush1.bf16.msra.mxu0 %v7992_v53  ;;  %v6998_v14 = vld [vmem:[#allocation7 + $0x2f0] ss:$8 sps:$4 sm:$0xff]  }
 0x11c   :  { %v2391_v59 = vpack.i.b16 %v1066_v41, %v1066_v41  ;;  %5242 = vmatprep.mubr.bf16.mxu1 %v6210_v50  ;;  %v2482_v4 = vpack.i.b16 %v1118_v19, %v1118_v19  ;;  %v1062_v13 = vrot.slane %v7990_v51, %v7226_v6  ;;  %v1114_v57 = vrot.slane %v7996_v3, %v7226_v6 }
 0x11d   :  { %v2433_v40 = vpack.i.b16 %v1090_v20, %v1090_v20  ;;  %v6203_v42 = vcombine.low %v3084_v58, %v3097_v33  ;;  %v6202_v21 = vcombine.low %v3083_v45, %v3096_v62  ;;  %v2347_v28 = vrot.slane %v2342_v35, %v7226_v6  ;;  %5293 = vmatprep.subr.bf16.mxu1 %v7000_v34  ;;  %v8024_v20 = vld [vmem:[#allocation7 + $0x5f0] ss:$8 sps:$4 sm:$0xff]  }
 0x11e   :  { %v2396_v47 = vrot.slane %v2391_v59, %v7226_v6  ;;  %v2487_v52 = vrot.slane %v2482_v4, %v7226_v6  ;;  %v2384_v50 = vpack.i.b16 %v1062_v13, %v1062_v13  ;;  %v2475_v19 = vpack.i.b16 %v1114_v57, %v1114_v57  ;;  %5632 = vmatprep.subr.bf16.mxu0 %v8011_v18  ;;  %v7010_v4 = vld [vmem:[#allocation7 + $0x604] ss:$8 sps:$4 sm:$0xff]  }
 0x11f   :  { %v2438_v41 = vrot.slane %v2433_v40, %v7226_v6  ;;  %5571 = vmatprep.mubr.bf16.mxu0 %v6203_v42  ;;  %v2895_v45 = vadd.bf16 %v7643_v7, %v2347_v28  ;;  %v1146_v33 = vrot.slane %v7583_v44, %v7422_v2  ;;  %v1198_v34 = vrot.slane %v7594_v22, %v7422_v2 }
 0x120   :  { %v2902_v58 = vadd.bf16 %v7670_v38, %v2396_v47  ;;  %5572 = vmatmul.mubr.bf16.gmra.mrb[20].mxu0 %v6202_v21  ;;  %v2915_v62 = vadd.bf16 %v7670_v38, %v2487_v52  ;;  %v2389_v59 = vrot.slane %v2384_v50, %v7226_v6  ;;  %v2480_v35 = vrot.slane %v2475_v19, %v7226_v6 }
 0x121   :  { %v2908_v57 = vadd.bf16 %v7643_v7, %v2438_v41  ;;  %v3103_v40 = vmax.bf16 %v7137_v8, %v2895_v45  ;;  %v2531_v13 = vpack.i.b16 %v1146_v33, %v1146_v33  ;;  %v2622_v42 = vpack.i.b16 %v1198_v34, %v1198_v34  ;;  %5294 = vmatpush1.bf16.msra.mxu1 %v6998_v14  ;;  %v7033_v45 = vld [vmem:[#allocation7 + $0x504] ss:$8 sps:$4 sm:$0xff]  }
 0x122   :  { %v3110_v47 = vmax.bf16 %v7137_v8, %v2902_v58  ;;  %v3123_v28 = vmax.bf16 %v7137_v8, %v2915_v62  ;;  %v2901_v52 = vadd.bf16 %v7661_v39, %v2389_v59  ;;  %v2914_v41 = vadd.bf16 %v7661_v39, %v2480_v35  ;;  %5633 = vmatpush1.bf16.msra.mxu0 %v8024_v20 }
 0x123   :  { %v3116_v21 = vmax.bf16 %v7137_v8, %v2908_v57  ;;  %v2536_v50 = vrot.slane %v2531_v13, %v7226_v6  ;;  %v2627_v19 = vrot.slane %v2622_v42, %v7226_v6  ;;  %v338_v58 = vcombine.high %v7929_v56, %v7934_v25  ;;  %6443 = vmatprep.subr.bf16.mxu1 %v7033_v45 }
 0x124   :  { %v1142_v14 = vrot.slane %v7583_v44, %v7520_v61  ;;  %v6216_v33 = vcombine.low %v3110_v47, %v3123_v28  ;;  %v3109_v62 = vmax.bf16 %v7137_v8, %v2901_v52  ;;  %v3122_v57 = vmax.bf16 %v7137_v8, %v2914_v41  ;;  %5715 = vmatprep.subr.bf16.mxu0 %v7010_v4 }
 0x125   :  { %v6209_v34 = vcombine.low %v3103_v40, %v3116_v21  ;;  %v2922_v59 = vadd.bf16 %v7651_v36, %v2536_v50  ;;  %v2935_v35 = vadd.bf16 %v7651_v36, %v2627_v19  ;;  %v370_v13 = vunpack.i.h.s16 %v338_v58 }
 0x126   :  { %v8054_v42 = vpack.i.b16 %v338_v58, %v338_v58  ;;  %v8057_v56 = vsub.s32 4, %v7217_v46  ;;  %5581 = vmatprep.mubr.bf16.mxu0 %v6216_v33  ;;  %v6215_v25 = vcombine.low %v3109_v62, %v3122_v57  ;;  %v1194_v47 = vrot.slane %v7594_v22, %v7520_v61 }
 0x127   :  { %5243 = vmatmul.mubr.bf16.gmra.mrb[24].mxu1 %v6209_v34  ;;  %v2524_v40 = vpack.i.b16 %v1142_v14, %v1142_v14  ;;  %v3130_v28 = vmax.bf16 %v7137_v8, %v2922_v59  ;;  %v3143_v4 = vmax.bf16 %v7137_v8, %v2935_v35  ;;  %v8063_v21 = vpack.i.b16 %v370_v13, %v370_v13 }
 0x128   :  { %v1170_v36 = vrot.slane %v8054_v42, %v7230_v10  ;;  %5582 = vmatmul.mubr.bf16.gmra.mrb[24].mxu0 %v6215_v25  ;;  %v2615_v41 = vpack.i.b16 %v1194_v47, %v1194_v47  ;;  %v1166_v50 = vrot.slane %v8054_v42, %v7226_v6  ;;  %v426_v19 = vrot.slane %v7248_v24, %v7885_v9  ;;  %v80_v47 = vld [vmem:[#allocation5 + $0x10] sm:$0xff] }
 0x129   :  { %v2529_v52 = vrot.slane %v2524_v40, %v7226_v6  ;;  %v6223_v58 = vcombine.low %v3130_v28, %v3143_v4  ;;  %v1222_v14 = vrot.slane %v8063_v21, %v7230_v10  ;;  %v1218_v33 = vrot.slane %v8063_v21, %v7226_v6 }
 0x12a   :  { %v2573_v45 = vpack.i.b16 %v1170_v36, %v1170_v36  ;;  %v2620_v34 = vrot.slane %v2615_v41, %v7226_v6  ;;  %v2566_v57 = vpack.i.b16 %v1166_v50, %v1166_v50  ;;  %v478_v59 = vrot.slane %v7262_v32, %v7885_v9 }
 0x12b   :  { %v2921_v62 = vadd.bf16 %v7643_v7, %v2529_v52  ;;  %5252 = vmatprep.mubr.bf16.mxu1 %v6223_v58  ;;  %v2664_v13 = vpack.i.b16 %v1222_v14, %v1222_v14  ;;  %v2657_v25 = vpack.i.b16 %v1218_v33, %v1218_v33  ;;  %v1271_v40 = vpack.i.b16 %v426_v19, %v426_v19 }
 0x12c   :  { %v2578_v35 = vrot.slane %v2573_v45, %v7226_v6  ;;  %v2934_v28 = vadd.bf16 %v7643_v7, %v2620_v34  ;;  %v2571_v36 = vrot.slane %v2566_v57, %v7226_v6  ;;  %v1362_v41 = vpack.i.b16 %v478_v59, %v478_v59  ;;  %v83_v59 = vld [vmem:[#allocation5 + $0x28] sm:$0xff] }
 0x12d   :  { %v3129_v4 = vmax.bf16 %v7137_v8, %v2921_v62  ;;  %v2669_v52 = vrot.slane %v2664_v13, %v7226_v6  ;;  %v2662_v46 = vrot.slane %v2657_v25, %v7226_v6  ;;  %v1276_v58 = vrot.slane %v1271_v40, %v7226_v6 }
 0x12e   :  { %v2928_v50 = vadd.bf16 %v7670_v38, %v2578_v35  ;;  %v3142_v14 = vmax.bf16 %v7137_v8, %v2934_v28  ;;  %v2927_v45 = vadd.bf16 %v7661_v39, %v2571_v36  ;;  %v1367_v19 = vrot.slane %v1362_v41, %v7226_v6 }
 0x12f   :  { %v8091_v7 = vcombine.low %v80_v47, %v80_v47  ;;  %v2941_v33 = vadd.bf16 %v7670_v38, %v2669_v52  ;;  %v2940_v62 = vadd.bf16 %v7661_v39, %v2662_v46  ;;  %v8096_v57 = vcombine.high %v80_v47, %v80_v47 }
 0x130   :  { %v3136_v34 = vmax.bf16 %v7137_v8, %v2928_v50  ;;  %v6222_v35 = vcombine.low %v3129_v4, %v3142_v14  ;;  %v3135_v13 = vmax.bf16 %v7137_v8, %v2927_v45  ;;  %v450_v25 = vrot.slane %v7684_v17, %v7422_v2 }
 0x131   :  { %v502_v40 = vrot.slane %v7690_v16, %v7422_v2  ;;  %v3149_v28 = vmax.bf16 %v7137_v8, %v2941_v33  ;;  %v3148_v38 = vmax.bf16 %v7137_v8, %v2940_v62  ;;  %v2742_v36 = vadd.bf16 %v8096_v57, %v1276_v58 }
 0x132   :  { %v2755_v46 = vadd.bf16 %v8096_v57, %v1367_v19  ;;  %5253 = vmatmul.mubr.bf16.gmra.mrb[28].mxu1 %v6222_v35  ;;  %v1313_v39 = vpack.i.b16 %v450_v25, %v450_v25  ;;  %v8107_v4 = vcombine.low %v83_v59, %v83_v59  ;;  %v8109_v41 = vcombine.high %v83_v59, %v83_v59 }
 0x133   :  { %v1404_v47 = vpack.i.b16 %v502_v40, %v502_v40  ;;  %v6229_v52 = vcombine.low %v3136_v34, %v3149_v28  ;;  %v6228_v50 = vcombine.low %v3135_v13, %v3148_v38  ;;  %v2950_v14 = vmax.bf16 %v7137_v8, %v2742_v36 }
 0x134   :  { %v2963_v45 = vmax.bf16 %v7137_v8, %v2755_v46  ;;  %v1318_v33 = vrot.slane %v1313_v39, %v7226_v6  ;;  %v422_v58 = vrot.slane %v7248_v24, %v8057_v56  ;;  %v474_v19 = vrot.slane %v7262_v32, %v8057_v56 }
 0x135   :  { %v1409_v62 = vrot.slane %v1404_v47, %v7226_v6  ;;  %5591 = vmatprep.mubr.bf16.mxu0 %v6229_v52  ;;  %v446_v34 = vrot.slane %v7684_v17, %v7520_v61  ;;  %v498_v59 = vrot.slane %v7690_v16, %v7520_v61  ;;  %v530_v13 = vrot.slane %v7250_v26, %v7885_v9 }
 0x136   :  { %v6134_v35 = vcombine.low %v2950_v14, %v2963_v45  ;;  %5592 = vmatmul.mubr.bf16.gmra.mrb[28].mxu0 %v6228_v50  ;;  %v2748_v25 = vadd.bf16 %v8109_v41, %v1318_v33  ;;  %v1264_v24 = vpack.i.b16 %v422_v58, %v422_v58  ;;  %v1355_v28 = vpack.i.b16 %v474_v19, %v474_v19 }
 0x137   :  { %v2761_v40 = vadd.bf16 %v8109_v41, %v1409_v62  ;;  %v1306_v32 = vpack.i.b16 %v446_v34, %v446_v34  ;;  %v1397_v38 = vpack.i.b16 %v498_v59, %v498_v59  ;;  %v582_v36 = vrot.slane %v7272_v37, %v7885_v9 }
 0x138   :  { %5295 = vmatprep.mubr.bf16.mxu1 %v6134_v35  ;;  %v1453_v46 = vpack.i.b16 %v530_v13, %v530_v13  ;;  %v2956_v39 = vmax.bf16 %v7137_v8, %v2748_v25  ;;  %v1269_v52 = vrot.slane %v1264_v24, %v7226_v6  ;;  %v1360_v50 = vrot.slane %v1355_v28, %v7226_v6 }
 0x139   :  { %v2969_v47 = vmax.bf16 %v7137_v8, %v2761_v40  ;;  %v1311_v14 = vrot.slane %v1306_v32, %v7226_v6  ;;  %v1402_v45 = vrot.slane %v1397_v38, %v7226_v6  ;;  %v1544_v62 = vpack.i.b16 %v582_v36, %v582_v36 }
 0x13a   :  { %v1458_v33 = vrot.slane %v1453_v46, %v7226_v6  ;;  %v2741_v19 = vadd.bf16 %v8091_v7, %v1269_v52  ;;  %v2754_v35 = vadd.bf16 %v8091_v7, %v1360_v50  ;;  %v554_v34 = vrot.slane %v7740_v48, %v7422_v2  ;;  %v7008_v50 = vld [vmem:[#allocation7 + $0x600] ss:$8 sps:$4 sm:$0xff]  }
 0x13b   :  { %v6140_v58 = vcombine.low %v2956_v39, %v2969_v47  ;;  %v2747_v59 = vadd.bf16 %v8107_v4, %v1311_v14  ;;  %v2760_v13 = vadd.bf16 %v8107_v4, %v1402_v45  ;;  %v1549_v25 = vrot.slane %v1544_v62, %v7226_v6 }
 0x13c   :  { %v2768_v40 = vadd.bf16 %v8096_v57, %v1458_v33  ;;  %v2949_v24 = vmax.bf16 %v7137_v8, %v2741_v19  ;;  %v2962_v28 = vmax.bf16 %v7137_v8, %v2754_v35  ;;  %v606_v32 = vrot.slane %v7744_v1, %v7422_v2 }
 0x13d   :  { %5634 = vmatprep.mubr.bf16.mxu0 %v6140_v58  ;;  %v1495_v38 = vpack.i.b16 %v554_v34, %v554_v34  ;;  %v2955_v36 = vmax.bf16 %v7137_v8, %v2747_v59  ;;  %v2968_v46 = vmax.bf16 %v7137_v8, %v2760_v13  ;;  %v2781_v39 = vadd.bf16 %v8096_v57, %v1549_v25  ;;  %v7013_v58 = vld [vmem:[#allocation7 + $0x614] ss:$8 sps:$4 sm:$0xff]  }
 0x13e   :  { %v2976_v47 = vmax.bf16 %v7137_v8, %v2768_v40  ;;  %v6133_v52 = vcombine.low %v2949_v24, %v2962_v28  ;;  %v1586_v45 = vpack.i.b16 %v606_v32, %v606_v32  ;;  %v526_v33 = vrot.slane %v7250_v26, %v8057_v56  ;;  %v7034_v26 = vld [vmem:[#allocation7 + $0x500] ss:$8 sps:$4 sm:$0xff]  }
 0x13f   :  { %v1500_v14 = vrot.slane %v1495_v38, %v7226_v6  ;;  %v6139_v62 = vcombine.low %v2955_v36, %v2968_v46  ;;  %v2989_v19 = vmax.bf16 %v7137_v8, %v2781_v39  ;;  %v578_v35 = vrot.slane %v7272_v37, %v8057_v56  ;;  %v7035_v37 = vld [vmem:[#allocation7 + $0x514] ss:$8 sps:$4 sm:$0xff]   ;;  %v7011_v38 = vld [vmem:[#allocation7 + $0x610] ss:$8 sps:$4 sm:$0xff]  }
 0x140   :  { %v550_v34 = vrot.slane %v7740_v48, %v7520_v61  ;;  %5296 = vmatmul.mubr.bf16.vlgmr.msra.gmra.mrb[0].mxu1 %v6133_v52  ;;  %v1591_v59 = vrot.slane %v1586_v45, %v7226_v6  ;;  %v1446_v25 = vpack.i.b16 %v526_v33, %v526_v33  ;;  %v602_v40 = vrot.slane %v7744_v1, %v7520_v61 }
 0x141   :  { %v2774_v13 = vadd.bf16 %v8109_v41, %v1500_v14  ;;  %5635 = vmatmul.mubr.bf16.vlgmr.msra.gmra.mrb[0].mxu0 %v6139_v62  ;;  %6459 = vmatpush1.bf16.msra.mxu1 %v7034_v26  ;;  %v6147_v24 = vcombine.low %v2976_v47, %v2989_v19  ;;  %v1537_v28 = vpack.i.b16 %v578_v35, %v578_v35  ;;  %v7016_v47 = vld [vmem:[#allocation7 + $0x624] ss:$8 sps:$4 sm:$0xff]   ;;  %v7036_v35 = vld [vmem:[#allocation7 + $0x510] ss:$8 sps:$4 sm:$0xff]  }
 0x142   :  { %v1488_v32 = vpack.i.b16 %v550_v34, %v550_v34  ;;  %5716 = vmatpush1.bf16.msra.mxu0 %v7008_v50  ;;  %6444 = vmatprep.subr.bf16.mxu1 %v7035_v37  ;;  %v2787_v36 = vadd.bf16 %v8109_v41, %v1591_v59  ;;  %v1451_v39 = vrot.slane %v1446_v25, %v7226_v6  ;;  %v7037_v26 = vld [vmem:[#allocation7 + $0x524] ss:$8 sps:$4 sm:$0xff]  }
 0x143   :  { %v2982_v46 = vmax.bf16 %v7137_v8, %v2774_v13  ;;  %5717 = vmatprep.subr.bf16.mxu0 %v7013_v58  ;;  %5305 = vmatprep.mubr.bf16.mxu1 %v6147_v24  ;;  %v1542_v52 = vrot.slane %v1537_v28, %v7226_v6  ;;  %v1579_v45 = vpack.i.b16 %v602_v40, %v602_v40  ;;  %v7014_v24 = vld [vmem:[#allocation7 + $0x620] ss:$8 sps:$4 sm:$0xff]  }
 0x144   :  { %v1493_v14 = vrot.slane %v1488_v32, %v7226_v6  ;;  %v2995_v33 = vmax.bf16 %v7137_v8, %v2787_v36  ;;  %v2767_v50 = vadd.bf16 %v8091_v7, %v1451_v39  ;;  %v634_v62 = vrot.slane %v7256_v29, %v7885_v9  ;;  %v7019_v39 = vld [vmem:[#allocation7 + $0x634] ss:$8 sps:$4 sm:$0xff]  }
 0x145   :  { %v686_v19 = vrot.slane %v7330_v12, %v7885_v9  ;;  %6460 = vmatpush1.bf16.msra.mxu1 %v7036_v35  ;;  %v2780_v58 = vadd.bf16 %v8091_v7, %v1542_v52  ;;  %v1584_v34 = vrot.slane %v1579_v45, %v7226_v6  ;;  %v658_v13 = vrot.slane %v7769_v55, %v7422_v2 }
 0x146   :  { %v2773_v59 = vadd.bf16 %v8107_v4, %v1493_v14  ;;  %5718 = vmatpush1.bf16.msra.mxu0 %v7011_v38  ;;  %v6153_v25 = vcombine.low %v2982_v46, %v2995_v33  ;;  %v2975_v40 = vmax.bf16 %v7137_v8, %v2767_v50  ;;  %6445 = vmatprep.subr.bf16.mxu1 %v7037_v26  ;;  %v7022_v26 = vld [vmem:[#allocation7 + $0x644] ss:$8 sps:$4 sm:$0xff]  }
 0x147   :  { %v1635_v28 = vpack.i.b16 %v634_v62, %v634_v62  ;;  %v2988_v32 = vmax.bf16 %v7137_v8, %v2780_v58  ;;  %v2786_v37 = vadd.bf16 %v8107_v4, %v1584_v34  ;;  %5719 = vmatprep.subr.bf16.mxu0 %v7016_v47  ;;  %v1726_v52 = vpack.i.b16 %v686_v19, %v686_v19  ;;  %v7038_v62 = vld [vmem:[#allocation7 + $0x520] ss:$8 sps:$4 sm:$0xff]   ;;  %v7039_v19 = vld [vmem:[#allocation7 + $0x534] ss:$8 sps:$4 sm:$0xff]   ;;  %v7017_v58 = vld [vmem:[#allocation7 + $0x630] ss:$8 sps:$4 sm:$0xff]  }
 0x148   :  { %v2981_v36 = vmax.bf16 %v7137_v8, %v2773_v59  ;;  %5644 = vmatprep.mubr.bf16.mxu0 %v6153_v25  ;;  %v710_v38 = vrot.slane %v7771_v31, %v7422_v2  ;;  %v1677_v46 = vpack.i.b16 %v658_v13, %v658_v13  ;;  %v630_v45 = vrot.slane %v7256_v29, %v8057_v56 }
 0x149   :  { %v1640_v14 = vrot.slane %v1635_v28, %v7226_v6  ;;  %v6146_v33 = vcombine.low %v2975_v40, %v2988_v32  ;;  %v2994_v50 = vmax.bf16 %v7137_v8, %v2786_v37  ;;  %6461 = vmatpush1.bf16.msra.mxu1 %v7038_v62  ;;  %v1731_v35 = vrot.slane %v1726_v52, %v7226_v6  ;;  %v7040_v37 = vld [vmem:[#allocation7 + $0x530] ss:$8 sps:$4 sm:$0xff]  }
 0x14a   :  { %v682_v47 = vrot.slane %v7330_v12, %v8057_v56  ;;  %5720 = vmatpush1.bf16.msra.mxu0 %v7014_v24  ;;  %6446 = vmatprep.subr.bf16.mxu1 %v7039_v19  ;;  %v1682_v59 = vrot.slane %v1677_v46, %v7226_v6  ;;  %v1768_v13 = vpack.i.b16 %v710_v38, %v710_v38  ;;  %v7025_v19 = vld [vmem:[#allocation7 + $0x654] ss:$8 sps:$4 sm:$0xff]  }
 0x14b   :  { %v2794_v34 = vadd.bf16 %v8096_v57, %v1640_v14  ;;  %5306 = vmatmul.mubr.bf16.gmra.mrb[4].mxu1 %v6146_v33  ;;  %v6152_v29 = vcombine.low %v2981_v36, %v2994_v50  ;;  %5721 = vmatprep.subr.bf16.mxu0 %v7019_v39  ;;  %v2807_v25 = vadd.bf16 %v8096_v57, %v1731_v35  ;;  %v7020_v33 = vld [vmem:[#allocation7 + $0x640] ss:$8 sps:$4 sm:$0xff]  }
 0x14c   :  { %v1628_v40 = vpack.i.b16 %v630_v45, %v630_v45  ;;  %v1773_v12 = vrot.slane %v1768_v13, %v7226_v6  ;;  %v2800_v24 = vadd.bf16 %v8109_v41, %v1682_v59  ;;  %v1719_v32 = vpack.i.b16 %v682_v47, %v682_v47  ;;  %v7041_v45 = vld [vmem:[#allocation7 + $0x544] ss:$8 sps:$4 sm:$0xff]  }
 0x14d   :  { %v3002_v28 = vmax.bf16 %v7137_v8, %v2794_v34  ;;  %5645 = vmatmul.mubr.bf16.gmra.mrb[4].mxu0 %v6152_v29  ;;  %6462 = vmatpush1.bf16.msra.mxu1 %v7040_v37  ;;  %v3015_v52 = vmax.bf16 %v7137_v8, %v2807_v25  ;;  %v654_v36 = vrot.slane %v7769_v55, %v7520_v61 }
 0x14e   :  { %v1633_v14 = vrot.slane %v1628_v40, %v7226_v6  ;;  %5722 = vmatpush1.bf16.msra.mxu0 %v7017_v58  ;;  %v2813_v39 = vadd.bf16 %v8109_v41, %v1773_v12  ;;  %v3008_v38 = vmax.bf16 %v7137_v8, %v2800_v24  ;;  %v1724_v46 = vrot.slane %v1719_v32, %v7226_v6  ;;  %v7043_v24 = vld [vmem:[#allocation7 + $0x554] ss:$8 sps:$4 sm:$0xff]   ;;  %v7023_v32 = vld [vmem:[#allocation7 + $0x650] ss:$8 sps:$4 sm:$0xff]  }
 0x14f   :  { %6447 = vmatprep.subr.bf16.mxu1 %v7041_v45  ;;  %v6160_v50 = vcombine.low %v3002_v28, %v3015_v52  ;;  %v706_v35 = vrot.slane %v7771_v31, %v7520_v61  ;;  %v1670_v47 = vpack.i.b16 %v654_v36, %v654_v36  ;;  %5723 = vmatprep.subr.bf16.mxu0 %v7022_v26  ;;  %v7042_v28 = vld [vmem:[#allocation7 + $0x540] ss:$8 sps:$4 sm:$0xff]  }
 0x150   :  { %v2793_v62 = vadd.bf16 %v8091_v7, %v1633_v14  ;;  %v3021_v58 = vmax.bf16 %v7137_v8, %v2813_v39  ;;  %v2806_v34 = vadd.bf16 %v8091_v7, %v1724_v46  ;;  %v738_v59 = vrot.slane %v7260_v30, %v7885_v9 }
 0x151   :  { %v790_v13 = vrot.slane %v7381_v54, %v7885_v9  ;;  %5315 = vmatprep.mubr.bf16.mxu1 %v6160_v50  ;;  %v1675_v25 = vrot.slane %v1670_v47, %v7226_v6  ;;  %v1761_v40 = vpack.i.b16 %v706_v35, %v706_v35  ;;  %6463 = vmatpush1.bf16.msra.mxu1 %v7042_v28  ;;  %v7028_v50 = vld [vmem:[#allocation7 + $0x664] ss:$8 sps:$4 sm:$0xff]   ;;  %v7044_v47 = vld [vmem:[#allocation7 + $0x550] ss:$8 sps:$4 sm:$0xff]  }
 0x152   :  { %v3001_v29 = vmax.bf16 %v7137_v8, %v2793_v62  ;;  %v6166_v26 = vcombine.low %v3008_v38, %v3021_v58  ;;  %v3014_v12 = vmax.bf16 %v7137_v8, %v2806_v34  ;;  %5724 = vmatpush1.bf16.msra.mxu0 %v7020_v33  ;;  %6448 = vmatprep.subr.bf16.mxu1 %v7043_v24 }
 0x153   :  { %v1817_v37 = vpack.i.b16 %v738_v59, %v738_v59  ;;  %v1766_v52 = vrot.slane %v1761_v40, %v7226_v6  ;;  %v2799_v14 = vadd.bf16 %v8107_v4, %v1675_v25  ;;  %5725 = vmatprep.subr.bf16.mxu0 %v7025_v19  ;;  %v1908_v36 = vpack.i.b16 %v790_v13, %v790_v13 }
 0x154   :  { %v762_v39 = vrot.slane %v7822_v15, %v7422_v2  ;;  %5654 = vmatprep.mubr.bf16.mxu0 %v6166_v26  ;;  %v6159_v46 = vcombine.low %v3001_v29, %v3014_v12  ;;  %v814_v45 = vrot.slane %v7828_v11, %v7422_v2  ;;  %v734_v33 = vrot.slane %v7260_v30, %v8057_v56  ;;  %v7026_v29 = vld [vmem:[#allocation7 + $0x660] ss:$8 sps:$4 sm:$0xff]   ;;  %v7045_v26 = vld [vmem:[#allocation7 + $0x564] ss:$8 sps:$4 sm:$0xff]  }
 0x155   :  { %v1822_v38 = vrot.slane %v1817_v37, %v7226_v6  ;;  %v2812_v62 = vadd.bf16 %v8107_v4, %v1766_v52  ;;  %v3007_v35 = vmax.bf16 %v7137_v8, %v2799_v14  ;;  %6464 = vmatpush1.bf16.msra.mxu1 %v7044_v47  ;;  %v1913_v19 = vrot.slane %v1908_v36, %v7226_v6 }
 0x156   :  { %v1859_v58 = vpack.i.b16 %v762_v39, %v762_v39  ;;  %5316 = vmatmul.mubr.bf16.gmra.mrb[8].mxu1 %v6159_v46  ;;  %5726 = vmatpush1.bf16.msra.mxu0 %v7023_v32  ;;  %v1950_v59 = vpack.i.b16 %v814_v45, %v814_v45  ;;  %v786_v13 = vrot.slane %v7381_v54, %v8057_v56  ;;  %v7031_v54 = vld [vmem:[#allocation7 + $0x674] ss:$8 sps:$4 sm:$0xff]   ;;  %v7046_v46 = vld [vmem:[#allocation7 + $0x560] ss:$8 sps:$4 sm:$0xff]  }
 0x157   :  { %v2820_v34 = vadd.bf16 %v8096_v57, %v1822_v38  ;;  %v3020_v30 = vmax.bf16 %v7137_v8, %v2812_v62  ;;  %v2833_v25 = vadd.bf16 %v8096_v57, %v1913_v19  ;;  %v1810_v28 = vpack.i.b16 %v734_v33, %v734_v33  ;;  %6449 = vmatprep.subr.bf16.mxu1 %v7045_v26 }
 0x158   :  { %v1864_v40 = vrot.slane %v1859_v58, %v7226_v6  ;;  %v1955_v24 = vrot.slane %v1950_v59, %v7226_v6  ;;  %v1901_v32 = vpack.i.b16 %v786_v13, %v786_v13  ;;  %v758_v37 = vrot.slane %v7822_v15, %v7520_v61  ;;  %5727 = vmatprep.subr.bf16.mxu0 %v7028_v50  ;;  %v7029_v50 = vld [vmem:[#allocation7 + $0x670] ss:$8 sps:$4 sm:$0xff]   ;;  %v7047_v58 = vld [vmem:[#allocation7 + $0x574] ss:$8 sps:$4 sm:$0xff]  }
 0x159   :  { %v3028_v12 = vmax.bf16 %v7137_v8, %v2820_v34  ;;  %v6165_v52 = vcombine.low %v3007_v35, %v3020_v30  ;;  %v3041_v14 = vmax.bf16 %v7137_v8, %v2833_v25  ;;  %v1815_v39 = vrot.slane %v1810_v28, %v7226_v6  ;;  %6465 = vmatpush1.bf16.msra.mxu1 %v7046_v46  ;;  %v7048_v25 = vld [vmem:[#allocation7 + $0x570] ss:$8 sps:$4 sm:$0xff]  }
 0x15a   :  { %v2826_v36 = vadd.bf16 %v8109_v41, %v1864_v40  ;;  %v2839_v38 = vadd.bf16 %v8109_v41, %v1955_v24  ;;  %v1906_v45 = vrot.slane %v1901_v32, %v7226_v6  ;;  %v810_v33 = vrot.slane %v7828_v11, %v7520_v61  ;;  %5728 = vmatpush1.bf16.msra.mxu0 %v7026_v29 }
 0x15b   :  { %v1852_v62 = vpack.i.b16 %v758_v37, %v758_v37  ;;  %5655 = vmatmul.mubr.bf16.gmra.mrb[8].mxu0 %v6165_v52  ;;  %v6173_v35 = vcombine.low %v3028_v12, %v3041_v14  ;;  %v2819_v19 = vadd.bf16 %v8091_v7, %v1815_v39  ;;  %6450 = vmatprep.subr.bf16.mxu1 %v7047_v58  ;;  %v8273_v58 = vld [vmem:[#allocation5 + $0x30] ss:$0 sps:$4 sm:$0xff]  }
 0x15c   :  { %v3034_v47 = vmax.bf16 %v7137_v8, %v2826_v36  ;;  %v3047_v34 = vmax.bf16 %v7137_v8, %v2839_v38  ;;  %v2832_v59 = vadd.bf16 %v8091_v7, %v1906_v45  ;;  %v1943_v30 = vpack.i.b16 %v810_v33, %v810_v33  ;;  %5729 = vmatprep.subr.bf16.mxu0 %v7031_v54  ;;  %v7049_v36 = vld [vmem:[#allocation7 + $0x584] ss:$8 sps:$4 sm:$0xff]  }
 0x15d   :  { %v1857_v13 = vrot.slane %v1852_v62, %v7226_v6  ;;  %5325 = vmatprep.mubr.bf16.mxu1 %v6173_v35  ;;  %v3027_v29 = vmax.bf16 %v7137_v8, %v2819_v19  ;;  %6466 = vmatpush1.bf16.msra.mxu1 %v7048_v25  ;;  %v842_v40 = vrot.slane %v7445_v60, %v7885_v9  ;;  %v7050_v35 = vld [vmem:[#allocation7 + $0x580] ss:$8 sps:$4 sm:$0xff]  }
 0x15e   :  { %v894_v28 = vrot.slane %v7458_v5, %v7885_v9  ;;  %v6179_v26 = vcombine.low %v3034_v47, %v3047_v34  ;;  %v3040_v12 = vmax.bf16 %v7137_v8, %v2832_v59  ;;  %v1948_v24 = vrot.slane %v1943_v30, %v7226_v6  ;;  %5730 = vmatpush1.bf16.msra.mxu0 %v7029_v50  ;;  %v7051_v34 = vld [vmem:[#allocation7 + $0x594] ss:$8 sps:$4 sm:$0xff]  }
 0x15f   :  { %v2825_v32 = vadd.bf16 %v8107_v4, %v1857_v13  ;;  %v1999_v37 = vpack.i.b16 %v842_v40, %v842_v40  ;;  %v838_v52 = vrot.slane %v7445_v60, %v8057_v56  ;;  %v890_v14 = vrot.slane %v7458_v5, %v8057_v56  ;;  %6451 = vmatprep.subr.bf16.mxu1 %v7049_v36 }
 0x160   :  { %v2090_v54 = vpack.i.b16 %v894_v28, %v894_v28  ;;  %5664 = vmatprep.mubr.bf16.mxu0 %v6179_v26  ;;  %v6172_v39 = vcombine.low %v3027_v29, %v3040_v12  ;;  %v2838_v46 = vadd.bf16 %v8107_v4, %v1948_v24  ;;  %v454_v45 = vrot.slane %v7684_v17, %v8057_v56 }
 0x161   :  { %v3033_v38 = vmax.bf16 %v7137_v8, %v2825_v32  ;;  %v2004_v33 = vrot.slane %v1999_v37, %v7226_v6  ;;  %v1992_v50 = vpack.i.b16 %v838_v52, %v838_v52  ;;  %v2083_v60 = vpack.i.b16 %v890_v14, %v890_v14  ;;  %6467 = vmatpush1.bf16.msra.mxu1 %v7050_v35  ;;  %v7052_v32 = vld [vmem:[#allocation7 + $0x590] ss:$8 sps:$4 sm:$0xff]  }
 0x162   :  { %v2095_v62 = vrot.slane %v2090_v54, %v7226_v6  ;;  %5326 = vmatmul.mubr.bf16.gmra.mrb[12].mxu1 %v6172_v39  ;;  %v3046_v5 = vmax.bf16 %v7137_v8, %v2838_v46  ;;  %v506_v47 = vrot.slane %v7690_v16, %v8057_v56  ;;  %v1320_v19 = vpack.i.b16 %v454_v45, %v454_v45 }
 0x163   :  { %6452 = vmatprep.subr.bf16.mxu1 %v7051_v34  ;;  %v2846_v17 = vadd.bf16 %v8096_v57, %v2004_v33  ;;  %v1997_v13 = vrot.slane %v1992_v50, %v7226_v6  ;;  %v2088_v30 = vrot.slane %v2083_v60, %v7226_v6  ;;  %v946_v16 = vrot.slane %v7471_v23, %v7885_v9  ;;  %v7053_v60 = vld [vmem:[#allocation7 + $0x5a4] ss:$8 sps:$4 sm:$0xff]  }
 0x164   :  { %v2859_v59 = vadd.bf16 %v8096_v57, %v2095_v62  ;;  %v6178_v29 = vcombine.low %v3033_v38, %v3046_v5  ;;  %v1325_v25 = vrot.slane %v1320_v19, %v7226_v6  ;;  %v1411_v40 = vpack.i.b16 %v506_v47, %v506_v47 }
 0x165   :  { %v3054_v28 = vmax.bf16 %v7137_v8, %v2846_v17  ;;  %v2845_v12 = vadd.bf16 %v8091_v7, %v1997_v13  ;;  %v2858_v24 = vadd.bf16 %v8091_v7, %v2088_v30  ;;  %6468 = vmatpush1.bf16.msra.mxu1 %v7052_v32  ;;  %v998_v52 = vrot.slane %v7505_v43, %v7885_v9  ;;  %v7054_v13 = vld [vmem:[#allocation7 + $0x5a0] ss:$8 sps:$4 sm:$0xff]  }
 0x166   :  { %v3067_v26 = vmax.bf16 %v7137_v8, %v2859_v59  ;;  %5665 = vmatmul.mubr.bf16.gmra.mrb[12].mxu0 %v6178_v29  ;;  %v1416_v37 = vrot.slane %v1411_v40, %v7226_v6  ;;  %v2749_v54 = vadd.bf16 %v8273_v58, %v1325_v25  ;;  %v2181_v14 = vpack.i.b16 %v946_v16, %v946_v16  ;;  %v7055_v25 = vld [vmem:[#allocation7 + $0x5b4] ss:$8 sps:$4 sm:$0xff]  }
 0x167   :  { %5747 = vmatprep.mubr.bf16.mxu0 %v7137_v8  ;;  %v3053_v39 = vmax.bf16 %v7137_v8, %v2845_v12  ;;  %v3066_v46 = vmax.bf16 %v7137_v8, %v2858_v24  ;;  %v942_v38 = vrot.slane %v7471_v23, %v8057_v56  ;;  %v2272_v50 = vpack.i.b16 %v998_v52, %v998_v52 }
 0x168   :  { %v6186_v36 = vcombine.low %v3054_v28, %v3067_v26  ;;  %v2762_v45 = vadd.bf16 %v8273_v58, %v1416_v37  ;;  %v2957_v33 = vmax.bf16 %v7137_v8, %v2749_v54  ;;  %v2186_v62 = vrot.slane %v2181_v14, %v7226_v6  ;;  %6453 = vmatprep.subr.bf16.mxu1 %v7053_v60  ;;  %v7056_v54 = vld [vmem:[#allocation7 + $0x5b0] ss:$8 sps:$4 sm:$0xff]  }
 0x169   :  { %v6185_v35 = vcombine.low %v3053_v39, %v3066_v46  ;;  %v994_v5 = vrot.slane %v7505_v43, %v8057_v56  ;;  %v2174_v47 = vpack.i.b16 %v942_v38, %v942_v38  ;;  %v558_v19 = vrot.slane %v7740_v48, %v8057_v56  ;;  %6469 = vmatpush1.bf16.msra.mxu1 %v7054_v13 }
 0x16a   :  { %5335 = vmatprep.mubr.bf16.mxu1 %v6186_v36  ;;  %v2970_v23 = vmax.bf16 %v7137_v8, %v2762_v45  ;;  %v2277_v34 = vrot.slane %v2272_v50, %v7226_v6  ;;  %v2872_v17 = vadd.bf16 %v8096_v57, %v2186_v62  ;;  %v610_v59 = vrot.slane %v7744_v1, %v8057_v56  ;;  %v7057_v50 = vld [vmem:[#allocation7 + $0x5c4] ss:$8 sps:$4 sm:$0xff]  }
 0x16b   :  { %5336 = vmatmul.mubr.bf16.gmra.mrb[16].mxu1 %v6185_v35  ;;  %v2179_v30 = vrot.slane %v2174_v47, %v7226_v6  ;;  %v2265_v29 = vpack.i.b16 %v994_v5, %v994_v5  ;;  %v1502_v43 = vpack.i.b16 %v558_v19, %v558_v19  ;;  %6454 = vmatprep.subr.bf16.mxu1 %v7055_v25 }
 0x16c   :  { %v6141_v40 = vcombine.low %v2957_v33, %v2970_v23  ;;  %v2885_v48 = vadd.bf16 %v8096_v57, %v2277_v34  ;;  %v3080_v16 = vmax.bf16 %v7137_v8, %v2872_v17  ;;  %v1593_v28 = vpack.i.b16 %v610_v59, %v610_v59 }
 0x16d   :  { %v2270_v26 = vrot.slane %v2265_v29, %v7226_v6  ;;  %v2871_v12 = vadd.bf16 %v8091_v7, %v2179_v30  ;;  %v1507_v1 = vrot.slane %v1502_v43, %v7226_v6  ;;  %v1050_v24 = vrot.slane %v7447_v63, %v7885_v9  ;;  %6470 = vmatpush1.bf16.msra.mxu1 %v7056_v54  ;;  %v7058_v29 = vld [vmem:[#allocation7 + $0x5c0] ss:$8 sps:$4 sm:$0xff]  }
 0x16e   :  { %5748 = vmatmul.mubr.bf16.vlgmr.msra.gmra.mrb[0].mxu0 %v6141_v40  ;;  %v3093_v32 = vmax.bf16 %v7137_v8, %v2885_v48  ;;  %v1598_v37 = vrot.slane %v1593_v28, %v7226_v6  ;;  %v1102_v52 = vrot.slane %v7473_v27, %v7885_v9  ;;  %v1046_v62 = vrot.slane %v7447_v63, %v8057_v56 }
 0x16f   :  { %5757 = vmatprep.mubr.bf16.mxu0 %v7137_v8  ;;  %v2884_v14 = vadd.bf16 %v8091_v7, %v2270_v26  ;;  %v3079_v36 = vmax.bf16 %v7137_v8, %v2871_v12  ;;  %v2775_v39 = vadd.bf16 %v8273_v58, %v1507_v1  ;;  %v2363_v46 = vpack.i.b16 %v1050_v24, %v1050_v24 }
 0x170   :  { %v6199_v38 = vcombine.low %v3080_v16, %v3093_v32  ;;  %v2788_v45 = vadd.bf16 %v8273_v58, %v1598_v37  ;;  %v2454_v33 = vpack.i.b16 %v1102_v52, %v1102_v52  ;;  %6455 = vmatprep.subr.bf16.mxu1 %v7057_v50  ;;  %v1098_v47 = vrot.slane %v7473_v27, %v8057_v56 }
 0x171   :  { %v3092_v60 = vmax.bf16 %v7137_v8, %v2884_v14  ;;  %v2983_v35 = vmax.bf16 %v7137_v8, %v2775_v39  ;;  %v2368_v5 = vrot.slane %v2363_v46, %v7226_v6  ;;  %v2356_v34 = vpack.i.b16 %v1046_v62, %v1046_v62  ;;  %6471 = vmatpush1.bf16.msra.mxu1 %v7058_v29 }
 0x172   :  { %5345 = vmatprep.mubr.bf16.mxu1 %v6199_v38  ;;  %v2996_v19 = vmax.bf16 %v7137_v8, %v2788_v45  ;;  %v2459_v23 = vrot.slane %v2454_v33, %v7226_v6  ;;  %v662_v63 = vrot.slane %v7769_v55, %v8057_v56  ;;  %v2447_v13 = vpack.i.b16 %v1098_v47, %v1098_v47 }
 0x173   :  { %v6198_v17 = vcombine.low %v3079_v36, %v3092_v60  ;;  %v2898_v59 = vadd.bf16 %v8096_v57, %v2368_v5  ;;  %v714_v30 = vrot.slane %v7771_v31, %v8057_v56  ;;  %v2361_v25 = vrot.slane %v2356_v34, %v7226_v6  ;;  %6456 = vmatprep.subr.bf16.mxu1 %v7963_v0  ;;  %v8793_v36 = vld [vmem:[#allocation15_spill] sm:$0xff] }
 0x174   :  { %v6154_v43 = vcombine.low %v2983_v35, %v2996_v19  ;;  %v2911_v27 = vadd.bf16 %v8096_v57, %v2459_v23  ;;  %v1684_v40 = vpack.i.b16 %v662_v63, %v662_v63  ;;  %v2452_v48 = vrot.slane %v2447_v13, %v7226_v6  ;;  %v8794_v63 = vld [vmem:[#allocation11_spill] sm:$0xff] }
 0x175   :  { %5346 = vmatmul.mubr.bf16.gmra.mrb[20].mxu1 %v6198_v17  ;;  %v3106_v55 = vmax.bf16 %v7137_v8, %v2898_v59  ;;  %v1775_v16 = vpack.i.b16 %v714_v30, %v714_v30  ;;  %v1154_v28 = vrot.slane %v7583_v44, %v7885_v9  ;;  %v2897_v26 = vadd.bf16 %v8091_v7, %v2361_v25 }
 0x176   :  { %5758 = vmatmul.mubr.bf16.gmra.mrb[4].mxu0 %v6154_v43  ;;  %v3119_v31 = vmax.bf16 %v7137_v8, %v2911_v27  ;;  %v1689_v12 = vrot.slane %v1684_v40, %v7226_v6  ;;  %v1206_v1 = vrot.slane %v7594_v22, %v7885_v9  ;;  %v2910_v0 = vadd.bf16 %v8091_v7, %v2452_v48 }
 0x177   :  { %5767 = vmatprep.mubr.bf16.mxu0 %v7137_v8  ;;  %v1780_v24 = vrot.slane %v1775_v16, %v7226_v6  ;;  %6472 = vmatpush1.bf16.msra.mxu1 %v7969_v49  ;;  %v2545_v32 = vpack.i.b16 %v1154_v28, %v1154_v28  ;;  %v3105_v54 = vmax.bf16 %v7137_v8, %v2897_v26 }
 0x178   :  { %v6212_v37 = vcombine.low %v3106_v55, %v3119_v31  ;;  %v2801_v52 = vadd.bf16 %v8273_v58, %v1689_v12  ;;  %v2636_v14 = vpack.i.b16 %v1206_v1, %v1206_v1  ;;  %6457 = vmatprep.subr.bf16.mxu1 %v8793_v36  ;;  %v3118_v39 = vmax.bf16 %v7137_v8, %v2910_v0 }
 0x179   :  { %v2814_v9 = vadd.bf16 %v8273_v58, %v1780_v24  ;;  %v2550_v46 = vrot.slane %v2545_v32, %v7226_v6  ;;  %v1150_v38 = vrot.slane %v7583_v44, %v8057_v56  ;;  %v1202_v33 = vrot.slane %v7594_v22, %v8057_v56 }
 0x17a   :  { %5355 = vmatprep.mubr.bf16.mxu1 %v6212_v37  ;;  %v3009_v49 = vmax.bf16 %v7137_v8, %v2801_v52  ;;  %v2641_v45 = vrot.slane %v2636_v14, %v7226_v6  ;;  %v766_v62 = vrot.slane %v7822_v15, %v8057_v56  ;;  %v6211_v50 = vcombine.low %v3105_v54, %v3118_v39 }
 0x17b   :  { %v3022_v60 = vmax.bf16 %v7137_v8, %v2814_v9  ;;  %v2924_v35 = vadd.bf16 %v8096_v57, %v2550_v46  ;;  %v2538_v5 = vpack.i.b16 %v1150_v38, %v1150_v38  ;;  %6473 = vmatpush1.bf16.msra.mxu1 %v7992_v53  ;;  %v2629_v47 = vpack.i.b16 %v1202_v33, %v1202_v33 }
 0x17c   :  { %v2937_v44 = vadd.bf16 %v8096_v57, %v2641_v45  ;;  %v818_v19 = vrot.slane %v7828_v11, %v8057_v56  ;;  %v1866_v23 = vpack.i.b16 %v766_v62, %v766_v62  ;;  %6458 = vmatprep.subr.bf16.mxu1 %v8011_v18  ;;  %v866_v17 = vrot.slane %v8794_v63, %v7422_v2  ;;  %v8795_v18 = vld [vmem:[#allocation12_spill] sm:$0xff]  ;;  %v8796_v45 = vld [vmem:[#allocation13_spill] sm:$0xff] }
 0x17d   :  { %5356 = vmatmul.mubr.bf16.gmra.mrb[24].mxu1 %v6211_v50  ;;  %v6167_v22 = vcombine.low %v3009_v49, %v3022_v60  ;;  %v3132_v15 = vmax.bf16 %v7137_v8, %v2924_v35  ;;  %v2543_v34 = vrot.slane %v2538_v5, %v7226_v6  ;;  %v2634_v57 = vrot.slane %v2629_v47, %v7226_v6  ;;  %v8797_v35 = vld [vmem:[#allocation14_spill] sm:$0xff] }
 0x17e   :  { %v3145_v53 = vmax.bf16 %v7137_v8, %v2937_v44  ;;  %v1871_v59 = vrot.slane %v1866_v23, %v7226_v6  ;;  %v1957_v13 = vpack.i.b16 %v818_v19, %v818_v19  ;;  %v918_v30 = vrot.slane %v8795_v18, %v7422_v2 }
 0x17f   :  { %5768 = vmatmul.mubr.bf16.gmra.mrb[8].mxu0 %v6167_v22  ;;  %v2923_v11 = vadd.bf16 %v8091_v7, %v2543_v34  ;;  %6474 = vmatpush1.bf16.msra.mxu1 %v8024_v20  ;;  %v2041_v29 = vpack.i.b16 %v866_v17, %v866_v17  ;;  %v2936_v27 = vadd.bf16 %v8091_v7, %v2634_v57 }
 0x180   :  { %v6225_v43 = vcombine.low %v3132_v15, %v3145_v53  ;;  %5777 = vmatprep.mubr.bf16.mxu0 %v7137_v8  ;;  %v1962_v25 = vrot.slane %v1957_v13, %v7226_v6  ;;  %v2827_v40 = vadd.bf16 %v8273_v58, %v1871_v59  ;;  %v2132_v16 = vpack.i.b16 %v918_v30, %v918_v30 }
 0x181   :  { %v3131_v55 = vmax.bf16 %v7137_v8, %v2923_v11  ;;  %v2046_v48 = vrot.slane %v2041_v29, %v7226_v6  ;;  %v862_v20 = vrot.slane %v8794_v63, %v7520_v61  ;;  %v3144_v28 = vmax.bf16 %v7137_v8, %v2936_v27 }
 0x182   :  { %5365 = vmatprep.mubr.bf16.mxu1 %v6225_v43  ;;  %v2840_v31 = vadd.bf16 %v8273_v58, %v1962_v25  ;;  %v3035_v26 = vmax.bf16 %v7137_v8, %v2827_v40  ;;  %v914_v7 = vrot.slane %v8795_v18, %v7520_v61  ;;  %v2137_v12 = vrot.slane %v2132_v16, %v7226_v6 }
 0x183   :  { %v2852_v1 = vadd.bf16 %v8109_v41, %v2046_v48  ;;  %v2034_v0 = vpack.i.b16 %v862_v20, %v862_v20  ;;  %v870_v24 = vrot.slane %v8794_v63, %v8057_v56  ;;  %v6224_v32 = vcombine.low %v3131_v55, %v3144_v28 }
 0x184   :  { %v3048_v37 = vmax.bf16 %v7137_v8, %v2840_v31  ;;  %v2125_v54 = vpack.i.b16 %v914_v7, %v914_v7  ;;  %v922_v52 = vrot.slane %v8795_v18, %v8057_v56  ;;  %v2865_v14 = vadd.bf16 %v8109_v41, %v2137_v12 }
 0x185   :  { %v3060_v36 = vmax.bf16 %v7137_v8, %v2852_v1  ;;  %v2039_v39 = vrot.slane %v2034_v0, %v7226_v6  ;;  %v2048_v9 = vpack.i.b16 %v870_v24, %v870_v24  ;;  %5366 = vmatmul.mubr.bf16.gmra.mrb[28].mxu1 %v6224_v32  ;;  %v970_v33 = vrot.slane %v8796_v45, %v7422_v2 }
 0x186   :  { %v6180_v46 = vcombine.low %v3035_v26, %v3048_v37  ;;  %v2130_v38 = vrot.slane %v2125_v54, %v7226_v6  ;;  %v2139_v49 = vpack.i.b16 %v922_v52, %v922_v52  ;;  %v3073_v62 = vmax.bf16 %v7137_v8, %v2865_v14 }
 0x187   :  { %v2851_v50 = vadd.bf16 %v8107_v4, %v2039_v39  ;;  %v2053_v60 = vrot.slane %v2048_v9, %v7226_v6  ;;  %v1022_v5 = vrot.slane %v8797_v35, %v7422_v2  ;;  %v2223_v19 = vpack.i.b16 %v970_v33, %v970_v33 }
 0x188   :  { %5778 = vmatmul.mubr.bf16.gmra.mrb[12].mxu0 %v6180_v46  ;;  %v2864_v44 = vadd.bf16 %v8107_v4, %v2130_v38  ;;  %v2144_v47 = vrot.slane %v2139_v49, %v7226_v6  ;;  %v966_v23 = vrot.slane %v8796_v45, %v7520_v61  ;;  %v6192_v22 = vcombine.low %v3060_v36, %v3073_v62 }
 0x189   :  { %5787 = vmatprep.mubr.bf16.mxu0 %v7137_v8  ;;  %v3059_v15 = vmax.bf16 %v7137_v8, %v2851_v50  ;;  %v2853_v34 = vadd.bf16 %v8273_v58, %v2053_v60  ;;  %v2314_v63 = vpack.i.b16 %v1022_v5, %v1022_v5  ;;  %v2228_v57 = vrot.slane %v2223_v19, %v7226_v6 }
 0x18a   :  { %v3072_v17 = vmax.bf16 %v7137_v8, %v2864_v44  ;;  %v2866_v53 = vadd.bf16 %v8273_v58, %v2144_v47  ;;  %v1018_v59 = vrot.slane %v8797_v35, %v7520_v61  ;;  %5674 = vmatprep.mubr.bf16.mxu1 %v6192_v22  ;;  %v2216_v18 = vpack.i.b16 %v966_v23, %v966_v23 }
 0x18b   :  { %v3061_v13 = vmax.bf16 %v7137_v8, %v2853_v34  ;;  %v2319_v11 = vrot.slane %v2314_v63, %v7226_v6  ;;  %v974_v30 = vrot.slane %v8796_v45, %v8057_v56  ;;  %v2878_v27 = vadd.bf16 %v8109_v41, %v2228_v57 }
 0x18c   :  { %v6191_v29 = vcombine.low %v3059_v15, %v3072_v17  ;;  %v3074_v43 = vmax.bf16 %v7137_v8, %v2866_v53  ;;  %v2307_v25 = vpack.i.b16 %v1018_v59, %v1018_v59  ;;  %v2221_v55 = vrot.slane %v2216_v18, %v7226_v6 }
 0x18d   :  { %v2891_v40 = vadd.bf16 %v8109_v41, %v2319_v11  ;;  %v1026_v48 = vrot.slane %v8797_v35, %v8057_v56  ;;  %v2230_v16 = vpack.i.b16 %v974_v30, %v974_v30  ;;  %v3086_v28 = vmax.bf16 %v7137_v8, %v2878_v27 }
 0x18e   :  { %5675 = vmatmul.mubr.bf16.vlgmr.msra.gmra.mrb[32].mxu1 %v6191_v29  ;;  %v6193_v20 = vcombine.low %v3061_v13, %v3074_v43  ;;  %v2312_v31 = vrot.slane %v2307_v25, %v7226_v6  ;;  %v1074_v26 = vrot.slane %v7990_v51, %v7422_v2  ;;  %v2877_v12 = vadd.bf16 %v8107_v4, %v2221_v55 }
 0x18f   :  { %v3099_v7 = vmax.bf16 %v7137_v8, %v2891_v40  ;;  %v2235_v1 = vrot.slane %v2230_v16, %v7226_v6  ;;  %v2321_v0 = vpack.i.b16 %v1026_v48, %v1026_v48  ;;  %v1126_v32 = vrot.slane %v7996_v3, %v7422_v2 }
 0x190   :  { %5788 = vmatmul.mubr.bf16.gmra.mrb[32].mxu0 %v6193_v20  ;;  %v2890_v24 = vadd.bf16 %v8107_v4, %v2312_v31  ;;  %v2405_v37 = vpack.i.b16 %v1074_v26, %v1074_v26  ;;  %v1070_v54 = vrot.slane %v7990_v51, %v7520_v61  ;;  %v3085_v14 = vmax.bf16 %v7137_v8, %v2877_v12 }
 0x191   :  { %v6205_v52 = vcombine.low %v3086_v28, %v3099_v7  ;;  %5797 = vmatprep.mubr.bf16.mxu0 %v7137_v8  ;;  %v2326_v36 = vrot.slane %v2321_v0, %v7226_v6  ;;  %v2879_v39 = vadd.bf16 %v8273_v58, %v2235_v1  ;;  %v2496_v38 = vpack.i.b16 %v1126_v32, %v1126_v32 }
 0x192   :  { %v3098_v9 = vmax.bf16 %v7137_v8, %v2890_v24  ;;  %v2410_v46 = vrot.slane %v2405_v37, %v7226_v6  ;;  %v1122_v49 = vrot.slane %v7996_v3, %v7520_v61  ;;  %v2398_v62 = vpack.i.b16 %v1070_v54, %v1070_v54 }
 0x193   :  { %5684 = vmatprep.mubr.bf16.mxu1 %v6205_v52  ;;  %v2892_v45 = vadd.bf16 %v8273_v58, %v2326_v36  ;;  %v3087_v33 = vmax.bf16 %v7137_v8, %v2879_v39  ;;  %v1078_v50 = vrot.slane %v7990_v51, %v8057_v56  ;;  %v2501_v35 = vrot.slane %v2496_v38, %v7226_v6 }
 0x194   :  { %v6204_v60 = vcombine.low %v3085_v14, %v3098_v9  ;;  %v2904_v5 = vadd.bf16 %v8109_v41, %v2410_v46  ;;  %v2489_v44 = vpack.i.b16 %v1122_v49, %v1122_v49  ;;  %v2403_v19 = vrot.slane %v2398_v62, %v7226_v6 }
 0x195   :  { %v3100_v47 = vmax.bf16 %v7137_v8, %v2892_v45  ;;  %v1130_v23 = vrot.slane %v7996_v3, %v8057_v56  ;;  %v2412_v22 = vpack.i.b16 %v1078_v50, %v1078_v50  ;;  %v2917_v15 = vadd.bf16 %v8109_v41, %v2501_v35 }
 0x196   :  { %5685 = vmatmul.mubr.bf16.gmra.mrb[36].mxu1 %v6204_v60  ;;  %v3112_v34 = vmax.bf16 %v7137_v8, %v2904_v5  ;;  %v2494_v51 = vrot.slane %v2489_v44, %v7226_v6  ;;  %v1178_v63 = vrot.slane %v8054_v42, %v7422_v2  ;;  %v2903_v53 = vadd.bf16 %v8107_v4, %v2403_v19 }
 0x197   :  { %v6206_v17 = vcombine.low %v3087_v33, %v3100_v47  ;;  %v2417_v57 = vrot.slane %v2412_v22, %v7226_v6  ;;  %v2503_v59 = vpack.i.b16 %v1130_v23, %v1130_v23  ;;  %v3125_v13 = vmax.bf16 %v7137_v8, %v2917_v15 }
 0x198   :  { %v2916_v3 = vadd.bf16 %v8107_v4, %v2494_v51  ;;  %v1230_v11 = vrot.slane %v8063_v21, %v7422_v2  ;;  %v2587_v18 = vpack.i.b16 %v1178_v63, %v1178_v63  ;;  %v3111_v30 = vmax.bf16 %v7137_v8, %v2903_v53 }
 0x199   :  { %5798 = vmatmul.mubr.bf16.gmra.mrb[36].mxu0 %v6206_v17  ;;  %v2508_v29 = vrot.slane %v2503_v59, %v7226_v6  ;;  %v2905_v43 = vadd.bf16 %v8273_v58, %v2417_v57  ;;  %v1174_v27 = vrot.slane %v8054_v42, %v7520_v61  ;;  %v6218_v25 = vcombine.low %v3112_v34, %v3125_v13 }
 0x19a   :  { %5807 = vmatprep.mubr.bf16.mxu0 %v7137_v8  ;;  %v3124_v40 = vmax.bf16 %v7137_v8, %v2916_v3  ;;  %v2592_v55 = vrot.slane %v2587_v18, %v7226_v6  ;;  %v2678_v48 = vpack.i.b16 %v1230_v11, %v1230_v11  ;;  %v1226_v20 = vrot.slane %v8063_v21, %v7520_v61 }
 0x19b   :  { %v2918_v2 = vadd.bf16 %v8273_v58, %v2508_v29  ;;  %v3113_v16 = vmax.bf16 %v7137_v8, %v2905_v43  ;;  %v2580_v28 = vpack.i.b16 %v1174_v27, %v1174_v27  ;;  %5694 = vmatprep.mubr.bf16.mxu1 %v6218_v25  ;;  %v1182_v12 = vrot.slane %v8054_v42, %v8057_v56 }
 0x19c   :  { %v6217_v31 = vcombine.low %v3111_v30, %v3124_v40  ;;  %v2683_v26 = vrot.slane %v2678_v48, %v7226_v6  ;;  %v2930_v7 = vadd.bf16 %v8109_v41, %v2592_v55  ;;  %v2671_v24 = vpack.i.b16 %v1226_v20, %v1226_v20  ;;  %v3777_v20 = vld [vmem:[%s8772_s3] sm:$0x3] }
 0x19d   :  { %v3126_v1 = vmax.bf16 %v7137_v8, %v2918_v2  ;;  %v2585_v0 = vrot.slane %v2580_v28, %v7226_v6  ;;  %v1234_v32 = vrot.slane %v8063_v21, %v8057_v56  ;;  %v2594_v54 = vpack.i.b16 %v1182_v12, %v1182_v12 }
 0x19e   :  { %5695 = vmatmul.mubr.bf16.gmra.mrb[40].mxu1 %v6217_v31  ;;  %v2943_v61 = vadd.bf16 %v8109_v41, %v2683_v26  ;;  %v3138_v37 = vmax.bf16 %v7137_v8, %v2930_v7  ;;  %v2676_v14 = vrot.slane %v2671_v24, %v7226_v6  ;;  %v8559_v28 = vrot.slane %v3777_v20, %v7226_v6 }
 0x19f   :  { %v6219_v52 = vcombine.low %v3113_v16, %v3126_v1  ;;  %v2929_v36 = vadd.bf16 %v8107_v4, %v2585_v0  ;;  %v2685_v42 = vpack.i.b16 %v1234_v32, %v1234_v32  ;;  %v2599_v9 = vrot.slane %v2594_v54, %v7226_v6 }
 0x1a0   :  { %v3151_v39 = vmax.bf16 %v7137_v8, %v2943_v61  ;;  %v2942_v46 = vadd.bf16 %v8107_v4, %v2676_v14  ;;  %v8562_v31 = vrot.slane %v3777_v20, %v7230_v10 }
 0x1a1   :  { %5808 = vmatmul.mubr.bf16.gmra.mrb[40].mxu0 %v6219_v52  ;;  %v3137_v56 = vmax.bf16 %v7137_v8, %v2929_v36  ;;  %v2690_v21 = vrot.slane %v2685_v42, %v7226_v6  ;;  %v2931_v38 = vadd.bf16 %v8273_v58, %v2599_v9 }
 0x1a2   :  { %v6231_v41 = vcombine.low %v3138_v37, %v3151_v39  ;;  %5817 = vmatprep.mubr.bf16.mxu0 %v7137_v8  ;;  %v3150_v49 = vmax.bf16 %v7137_v8, %v2942_v46 }
 0x1a3   :  { %v2944_v45 = vadd.bf16 %v8273_v58, %v2690_v21  ;;  %v3139_v33 = vmax.bf16 %v7137_v8, %v2931_v38 }
 0x1a4   :  { %5704 = vmatprep.mubr.bf16.mxu1 %v6231_v41  ;;  %v6230_v62 = vcombine.low %v3137_v56, %v3150_v49  ;;  %v8579_v56 = vld [vmem:[%s8773_s4] ss:$0 sm:$0xff] }
 0x1a5   :  { %v3152_v50 = vmax.bf16 %v7137_v8, %v2944_v45  ;;  %v8586_v45 = vld [vmem:[%s8773_s4 + $0x1] ss:$0 sm:$0xff] }
 0x1a6   :  { %5705 = vmatmul.mubr.bf16.gmra.mrb[44].mxu1 %v6230_v62 }
 0x1a7   :  { %v6232_v4 = vcombine.low %v3139_v33, %v3152_v50 }
 0x1a9   :  { %5818 = vmatmul.mubr.bf16.gmra.mrb[44].mxu0 %v6232_v4 }
 0x1e6   :  { %v5563_v60 = vpop.f32.mrb[16].mxu0 }
 0x1e7   :  { %v5565_v35 = vpop.f32.mrb[17].mxu0 }
 0x1e8   :  { %v5567_v5 = vpop.f32.mrb[18].mxu0 }
 0x1e9   :  { %v5569_v44 = vpop.f32.mrb[19].mxu0 }
 0x1f3   :  { %v8515_v47 = vpop.f32.mrb[20].mxu0 }
 0x1f4   :  { %v8517_v19 = vpop.f32.mrb[21].mxu0 }
 0x1f5   :  { %v8519_v23 = vpop.f32.mrb[22].mxu0 }
 0x1f6   :  { %v8521_v58 = vpop.f32.mrb[23].mxu0 }
 0x1fb   :  { %v8523_v22 = vpop.f32.mrb[24].mxu0 }
 0x1fc   :  { %v8525_v15 = vpop.f32.mrb[25].mxu0 }
 0x1fd   :  { %v8527_v8 = vpop.f32.mrb[26].mxu0 }
 0x1fe   :  { %v8529_v34 = vpop.f32.mrb[27].mxu0 }
 0x209   :  { %v8531_v51 = vpop.f32.mrb[28].mxu0 }
 0x20a   :  { %v8533_v63 = vpop.f32.mrb[29].mxu0 }
 0x20b   :  { %v8535_v17 = vpop.f32.mrb[30].mxu0 }
 0x20c   :  { %v8537_v53 = vpop.f32.mrb[31].mxu0 }
 0x213   :  { %v5297_v57 = vpop.f32.mrb[0].mxu1 }
 0x214   :  { %v5299_v59 = vpop.f32.mrb[1].mxu1  ;;  %v6475_v1 = vadd.f32 %v5297_v57, %v8559_v28 }
 0x215   :  { %v5301_v13 = vpop.f32.mrb[2].mxu1  ;;  %v6477_v32 = vadd.f32 %v5299_v59, %v8562_v31 }
 0x216   :  { %v5303_v3 = vpop.f32.mrb[3].mxu1  ;;  %v6479_v10 = vadd.f32 %v5301_v13, %v8559_v28 }
 0x217   :  { %v6481_v39 = vadd.f32 %v5303_v3, %v8562_v31 }
 0x21e   :  { %v5307_v11 = vpop.f32.mrb[4].mxu1 }
 0x21f   :  { %v5309_v18 = vpop.f32.mrb[5].mxu1 }
 0x220   :  { %v5311_v30 = vpop.f32.mrb[6].mxu1  ;;  %v6485_v3 = vadd.f32 %v5309_v18, %v8562_v31 }
 0x221   :  { %v5313_v29 = vpop.f32.mrb[7].mxu1 }
 0x229   :  { %v8539_v43 = vpop.f32.mrb[8].mxu1 }
 0x22a   :  { %v8541_v27 = vpop.f32.mrb[9].mxu1 }
 0x22b   :  { %v8543_v25 = vpop.f32.mrb[10].mxu1 }
 0x22c   :  { %v8545_v40 = vpop.f32.mrb[11].mxu1 }
 0x235   :  { %v8547_v55 = vpop.f32.mrb[12].mxu1 }
 0x236   :  { %v8549_v48 = vpop.f32.mrb[13].mxu1 }
 0x237   :  { %v8551_v2 = vpop.f32.mrb[14].mxu1 }
 0x238   :  { %v8553_v16 = vpop.f32.mrb[15].mxu1 }
 0x23e   :  { %v5337_v26 = vpop.f32.mrb[16].mxu1 }
 0x23f   :  { %v6507_v7 = vadd.f32 %v5337_v26, %v8559_v28  ;;  %v5339_v12 = vpop.f32.mrb[17].mxu1 }
 0x240   :  { %v6511_v0 = vadd.f32 %v5339_v12, %v8562_v31  ;;  %v5341_v24 = vpop.f32.mrb[18].mxu1 }
 0x241   :  { %v5749_v61 = vpop.f32.mrb[0].mxu0  ;;  %v6515_v37 = vadd.f32 %v5341_v24, %v8559_v28  ;;  %v5343_v54 = vpop.f32.mrb[19].mxu1  ;;  %v8569_v6 = vadd.f32 %v6507_v7, %v5563_v60 }
 0x242   :  { %v6476_v52 = vadd.f32 %v6475_v1, %v5749_v61  ;;  %v5751_v14 = vpop.f32.mrb[1].mxu0  ;;  %v6519_v36 = vadd.f32 %v5343_v54, %v8562_v31  ;;  %v8573_v42 = vadd.f32 %v6511_v0, %v5565_v35  ;;  %v6487_v1 = vadd.f32 %v5311_v30, %v8559_v28 }
 0x243   :  { %v6478_v9 = vadd.f32 %v6477_v32, %v5751_v14  ;;  %v5753_v46 = vpop.f32.mrb[2].mxu0  ;;  %v8581_v21 = vadd.f32 %v6515_v37, %v5567_v5  ;;  %v6483_v5 = vadd.f32 %v5307_v11, %v8559_v28  ;;  %v6489_v0 = vadd.f32 %v5313_v29, %v8562_v31 }
 0x244   :  { %v5828_v41 = vmax.f32 %v6476_v52, 0.0  ;;  %v6480_v38 = vadd.f32 %v6479_v10, %v5753_v46  ;;  %v5755_v49 = vpop.f32.mrb[3].mxu0  ;;  %v8588_v33 = vadd.f32 %v6519_v36, %v5569_v44 }
 0x245   :  { %v5829_v62 = vmax.f32 %v6478_v9, 0.0  ;;  %v6482_v50 = vadd.f32 %v6481_v39, %v5755_v49 }
 0x246   :  { %v5830_v4 = vmax.f32 %v6480_v38, 0.0  ;;  %v5867_v60 = vmul.f32 %v8579_v56, %v5828_v41 }
 0x247   :  { %v5831_v35 = vmax.f32 %v6482_v50, 0.0  ;;  %v5890_v57 = vmul.f32 %v8586_v45, %v5829_v62 }
 0x248   :  { %v5868_v59 = vmul.f32 %v8579_v56, %v5830_v4  ;;  %v5347_v13 = vpop.f32.mrb[20].mxu1 }
 0x249   :  { %v5891_v20 = vmul.f32 %v8586_v45, %v5831_v35  ;;  %v6523_v44 = vadd.f32 %v5347_v13, %v8559_v28  ;;  %v5759_v26 = vpop.f32.mrb[4].mxu0  ;;  %v5349_v7 = vpop.f32.mrb[21].mxu1  ;;  %v5906_v12 = vadd.f32 %v5890_v57, %v5867_v60  ;;  %v6495_v13 = vadd.f32 %v8543_v25, %v8559_v28 }
 0x24a   :  { %v6484_v24 = vadd.f32 %v6483_v5, %v5759_v26  ;;  %v6527_v32 = vadd.f32 %v5349_v7, %v8562_v31  ;;  %v5761_v11 = vpop.f32.mrb[5].mxu0  ;;  %v5351_v61 = vpop.f32.mrb[22].mxu1 }
 0x24b   :  { %v6486_v37 = vadd.f32 %v6485_v3, %v5761_v11  ;;  %v5763_v54 = vpop.f32.mrb[6].mxu0  ;;  %5922 = vadd.xlane.f32.xlu0 %v5906_v12  ;;  %v6531_v18 = vadd.f32 %v5351_v61, %v8559_v28  ;;  %v5353_v10 = vpop.f32.mrb[23].mxu1  ;;  %v5907_v52 = vadd.f32 %v5891_v20, %v5868_v59  ;;  %v8602_v14 = vadd.f32 %v6523_v44, %v8515_v47 }
 0x24c   :  { %v5832_v36 = vmax.f32 %v6484_v24, 0.0  ;;  %v6488_v39 = vadd.f32 %v6487_v1, %v5763_v54  ;;  %v6535_v30 = vadd.f32 %v5353_v10, %v8562_v31  ;;  %v5765_v29 = vpop.f32.mrb[7].mxu0  ;;  %v8606_v9 = vadd.f32 %v6527_v32, %v8517_v19 }
 0x24d   :  { %v5833_v46 = vmax.f32 %v6486_v37, 0.0  ;;  %v6490_v41 = vadd.f32 %v6489_v0, %v5765_v29  ;;  %v8609_v38 = vadd.f32 %v6531_v18, %v8519_v23  ;;  %v6491_v19 = vadd.f32 %v8539_v43, %v8559_v28 }
 0x24e   :  { %v5869_v49 = vmul.f32 %v8579_v56, %v5832_v36  ;;  %v5834_v62 = vmax.f32 %v6488_v39, 0.0  ;;  %v8613_v50 = vadd.f32 %v6535_v30, %v8521_v58  ;;  %v6493_v58 = vadd.f32 %v8541_v27, %v8562_v31 }
 0x24f   :  { %v5892_v47 = vmul.f32 %v8586_v45, %v5833_v46  ;;  %v5835_v4 = vmax.f32 %v6490_v41, 0.0  ;;  %5924 = vadd.xlane.f32.xlu0 %v5907_v52  ;;  %v6497_v27 = vadd.f32 %v8545_v40, %v8562_v31  ;;  %v6499_v46 = vadd.f32 %v8547_v55, %v8559_v28 }
 0x250   :  { %v5870_v60 = vmul.f32 %v8579_v56, %v5834_v62  ;;  %v5357_v35 = vpop.f32.mrb[24].mxu1  ;;  %v6501_v62 = vadd.f32 %v8549_v48, %v8562_v31  ;;  %v6505_v48 = vadd.f32 %v8553_v16, %v8562_v31 }
 0x251   :  { %v5893_v57 = vmul.f32 %v8586_v45, %v5835_v4  ;;  %v6539_v23 = vadd.f32 %v5357_v35, %v8559_v28  ;;  %v5359_v5 = vpop.f32.mrb[25].mxu1  ;;  %v5908_v59 = vadd.f32 %v5892_v47, %v5869_v49  ;;  %v6503_v47 = vadd.f32 %v8551_v2, %v8559_v28 }
 0x252   :  { %v5769_v3 = vpop.f32.mrb[8].mxu0  ;;  %v6543_v20 = vadd.f32 %v5359_v5, %v8562_v31  ;;  %v5361_v44 = vpop.f32.mrb[26].mxu1 }
 0x253   :  { %v6492_v26 = vadd.f32 %v6491_v19, %v5769_v3  ;;  %v5771_v7 = vpop.f32.mrb[9].mxu0  ;;  %5926 = vadd.xlane.f32.xlu0 %v5908_v59  ;;  %v6547_v43 = vadd.f32 %v5361_v44, %v8559_v28  ;;  %v5363_v12 = vpop.f32.mrb[27].mxu1  ;;  %v5909_v1 = vadd.f32 %v5893_v57, %v5870_v60  ;;  %v8628_v0 = vadd.f32 %v6539_v23, %v8523_v22 }
 0x254   :  { %v6494_v24 = vadd.f32 %v6493_v58, %v5771_v7  ;;  %v5773_v32 = vpop.f32.mrb[10].mxu0  ;;  %v6551_v25 = vadd.f32 %v5363_v12, %v8562_v31  ;;  %v8634_v11 = vadd.f32 %v6543_v20, %v8525_v15 }
 0x255   :  { %v5836_v61 = vmax.f32 %v6492_v26, 0.0  ;;  %v6496_v37 = vadd.f32 %v6495_v13, %v5773_v32  ;;  %v5775_v54 = vpop.f32.mrb[11].mxu0  ;;  %v8637_v18 = vadd.f32 %v6547_v43, %v8527_v8 }
 0x256   :  { %v5837_v10 = vmax.f32 %v6494_v24, 0.0  ;;  %v6498_v52 = vadd.f32 %v6497_v27, %v5775_v54  ;;  %v8640_v22 = vadd.f32 %v6551_v25, %v8529_v34 }
 0x257   :  { %v5871_v40 = vmul.f32 %v8579_v56, %v5836_v61  ;;  %v5838_v36 = vmax.f32 %v6496_v37, 0.0  ;;  %5928 = vadd.xlane.f32.xlu0 %v5909_v1 }
 0x258   :  { %v5894_v39 = vmul.f32 %v8586_v45, %v5837_v10  ;;  %v5839_v30 = vmax.f32 %v6498_v52, 0.0  ;;  %v5367_v29 = vpop.f32.mrb[28].mxu1 }
 0x259   :  { %v5872_v15 = vmul.f32 %v8579_v56, %v5838_v36  ;;  %v6555_v41 = vadd.f32 %v5367_v29, %v8559_v28  ;;  %v5369_v49 = vpop.f32.mrb[29].mxu1 }
 0x25a   :  { %v5895_v8 = vmul.f32 %v8586_v45, %v5839_v30  ;;  %v5910_v34 = vadd.f32 %v5894_v39, %v5871_v40  ;;  %v6559_v60 = vadd.f32 %v5369_v49, %v8562_v31  ;;  %v5371_v35 = vpop.f32.mrb[30].mxu1 }
 0x25b   :  { %v5779_v4 = vpop.f32.mrb[12].mxu0  ;;  %v6563_v55 = vadd.f32 %v5371_v35, %v8559_v28  ;;  %v5373_v23 = vpop.f32.mrb[31].mxu1  ;;  %v8656_v59 = vadd.f32 %v6555_v41, %v8531_v51 }
 0x25c   :  { %v6500_v19 = vadd.f32 %v6499_v46, %v5779_v4  ;;  %v5781_v57 = vpop.f32.mrb[13].mxu0  ;;  %5930 = vadd.xlane.f32.xlu0 %v5910_v34  ;;  %v5911_v5 = vadd.f32 %v5895_v8, %v5872_v15  ;;  %v6567_v2 = vadd.f32 %v5373_v23, %v8562_v31  ;;  %v8662_v3 = vadd.f32 %v6559_v60, %v8533_v63 }
 0x25d   :  { %v6502_v58 = vadd.f32 %v6501_v62, %v5781_v57  ;;  %v5783_v13 = vpop.f32.mrb[14].mxu0  ;;  %v8665_v28 = vadd.f32 %v6563_v55, %v8535_v17 }
 0x25e   :  { %v5840_v20 = vmax.f32 %v6500_v19, 0.0  ;;  %v6504_v44 = vadd.f32 %v6503_v47, %v5783_v13  ;;  %v5785_v26 = vpop.f32.mrb[15].mxu0  ;;  %v8668_v51 = vadd.f32 %v6567_v2, %v8537_v53 }
 0x25f   :  { %v5841_v7 = vmax.f32 %v6502_v58, 0.0  ;;  %v6506_v43 = vadd.f32 %v6505_v48, %v5785_v26 }
 0x260   :  { %v5873_v16 = vmul.f32 %v8579_v56, %v5840_v20  ;;  %v5842_v12 = vmax.f32 %v6504_v44, 0.0  ;;  %5932 = vadd.xlane.f32.xlu0 %v5911_v5 }
 0x261   :  { %v5896_v31 = vmul.f32 %v8586_v45, %v5841_v7  ;;  %v5843_v1 = vmax.f32 %v6506_v43, 0.0  ;;  %v5676_v63 = vpop.f32.mrb[32].mxu1 }
 0x262   :  { %v5874_v27 = vmul.f32 %v8579_v56, %v5842_v12  ;;  %v6509_v24 = vadd.f32 %v8569_v6, %v5676_v63  ;;  %v5678_v32 = vpop.f32.mrb[33].mxu1 }
 0x263   :  { %v5897_v17 = vmul.f32 %v8586_v45, %v5843_v1  ;;  %v5789_v25 = vpop.f32.mrb[32].mxu0  ;;  %v6513_v61 = vadd.f32 %v8573_v42, %v5678_v32  ;;  %v5912_v53 = vadd.f32 %v5896_v31, %v5873_v16  ;;  %v5680_v37 = vpop.f32.mrb[34].mxu1 }
 0x264   :  { %v6510_v54 = vadd.f32 %v6509_v24, %v5789_v25  ;;  %v5791_v10 = vpop.f32.mrb[33].mxu0  ;;  %v6517_v52 = vadd.f32 %v8581_v21, %v5680_v37  ;;  %v5682_v40 = vpop.f32.mrb[35].mxu1 }
 0x265   :  { %v6514_v36 = vadd.f32 %v6513_v61, %v5791_v10  ;;  %v5793_v39 = vpop.f32.mrb[34].mxu0  ;;  %5934 = vadd.xlane.f32.xlu0 %v5912_v53  ;;  %v6521_v30 = vadd.f32 %v8588_v33, %v5682_v40  ;;  %v5913_v15 = vadd.f32 %v5897_v17, %v5874_v27 }
 0x266   :  { %v5844_v6 = vmax.f32 %v6510_v54, 0.0  ;;  %v6518_v29 = vadd.f32 %v6517_v52, %v5793_v39  ;;  %v5795_v46 = vpop.f32.mrb[35].mxu0 }
 0x267   :  { %v5845_v8 = vmax.f32 %v6514_v36, 0.0  ;;  %v6522_v41 = vadd.f32 %v6521_v30, %v5795_v46 }
 0x268   :  { %v5846_v49 = vmax.f32 %v6518_v29, 0.0  ;;  %v5875_v42 = vmul.f32 %v8579_v56, %v5844_v6 }
 0x269   :  { %v5847_v34 = vmax.f32 %v6522_v41, 0.0  ;;  %5936 = vadd.xlane.f32.xlu0 %v5913_v15  ;;  %v5686_v62 = vpop.f32.mrb[36].mxu1  ;;  %v5898_v21 = vmul.f32 %v8586_v45, %v5845_v8 }
 0x26a   :  { %v6525_v47 = vadd.f32 %v8602_v14, %v5686_v62  ;;  %v5688_v4 = vpop.f32.mrb[37].mxu1  ;;  %v5876_v60 = vmul.f32 %v8579_v56, %v5846_v49 }
 0x26b   :  { %v5899_v33 = vmul.f32 %v8586_v45, %v5847_v34  ;;  %v6529_v35 = vadd.f32 %v8606_v9, %v5688_v4  ;;  %v5690_v19 = vpop.f32.mrb[38].mxu1  ;;  %v5914_v57 = vadd.f32 %v5898_v21, %v5875_v42 }
 0x26c   :  { %v5799_v55 = vpop.f32.mrb[36].mxu0  ;;  %v6533_v23 = vadd.f32 %v8609_v38, %v5690_v19  ;;  %v5692_v5 = vpop.f32.mrb[39].mxu1 }
 0x26d   :  { %v6526_v48 = vadd.f32 %v6525_v47, %v5799_v55  ;;  %v5801_v58 = vpop.f32.mrb[37].mxu0  ;;  %v6537_v13 = vadd.f32 %v8613_v50, %v5692_v5  ;;  %5938 = vadd.xlane.f32.xlu1 %v5914_v57  ;;  %v5915_v2 = vadd.f32 %v5899_v33, %v5876_v60 }
 0x26e   :  { %v6530_v14 = vadd.f32 %v6529_v35, %v5801_v58  ;;  %v5803_v20 = vpop.f32.mrb[38].mxu0 }
 0x26f   :  { %v5848_v44 = vmax.f32 %v6526_v48, 0.0  ;;  %v6534_v26 = vadd.f32 %v6533_v23, %v5803_v20  ;;  %v5805_v7 = vpop.f32.mrb[39].mxu0 }
 0x270   :  { %v5849_v43 = vmax.f32 %v6530_v14, 0.0  ;;  %v6538_v16 = vadd.f32 %v6537_v13, %v5805_v7 }
 0x271   :  { %v5877_v9 = vmul.f32 %v8579_v56, %v5848_v44  ;;  %v5850_v12 = vmax.f32 %v6534_v26, 0.0  ;;  %5940 = vadd.xlane.f32.xlu1 %v5915_v2  ;;  %v5696_v31 = vpop.f32.mrb[40].mxu1 }
 0x272   :  { %v5900_v38 = vmul.f32 %v8586_v45, %v5849_v43  ;;  %v5851_v1 = vmax.f32 %v6538_v16, 0.0  ;;  %v6541_v63 = vadd.f32 %v8628_v0, %v5696_v31  ;;  %v5698_v50 = vpop.f32.mrb[41].mxu1 }
 0x273   :  { %v5878_v27 = vmul.f32 %v8579_v56, %v5850_v12  ;;  %v6545_v24 = vadd.f32 %v8634_v11, %v5698_v50  ;;  %v5700_v32 = vpop.f32.mrb[42].mxu1 }
 0x274   :  { %v5901_v17 = vmul.f32 %v8586_v45, %v5851_v1  ;;  %v5809_v25 = vpop.f32.mrb[40].mxu0  ;;  %v6549_v61 = vadd.f32 %v8637_v18, %v5700_v32  ;;  %v5702_v53 = vpop.f32.mrb[43].mxu1  ;;  %v5916_v37 = vadd.f32 %v5900_v38, %v5877_v9  ;;  %v8798_v38 = vlaneseq }
 0x275   :  { %v6542_v54 = vadd.f32 %v6541_v63, %v5809_v25  ;;  %v5811_v10 = vpop.f32.mrb[41].mxu0  ;;  %v6553_v52 = vadd.f32 %v8640_v22, %v5702_v53  ;;  %v8710_v63 = vstv %s8774_s5 }
 0x276   :  { %v6546_v40 = vadd.f32 %v6545_v24, %v5811_v10  ;;  %v5813_v36 = vpop.f32.mrb[42].mxu0  ;;  %5942 = vadd.xlane.f32.xlu1 %v5916_v37  ;;  %v5917_v0 = vadd.f32 %v5901_v17, %v5878_v27  ;;  %v5989_v1 = vand.u32 127, %v8798_v38  ;;  %v8799_v27 = vld [vmem:[#allocation10_spill] sm:$0xff] }
 0x277   :  { %v5852_v39 = vmax.f32 %v6542_v54, 0.0  ;;  %v6550_v30 = vadd.f32 %v6549_v61, %v5813_v36  ;;  %v5815_v15 = vpop.f32.mrb[43].mxu0 }
 0x278   :  { %v5853_v11 = vmax.f32 %v6546_v40, 0.0  ;;  %v6554_v6 = vadd.f32 %v6553_v52, %v5815_v15  ;;  %v8715_v24 = vsub.s32 %v5989_v1, %v8799_v27 }
 0x279   :  { %v5854_v29 = vmax.f32 %v6550_v30, 0.0  ;;  %v5879_v46 = vmul.f32 %v8579_v56, %v5852_v39  ;;  %v5706_v41 = vpop.f32.mrb[44].mxu1 }
 0x27a   :  { %v5902_v18 = vmul.f32 %v8586_v45, %v5853_v11  ;;  %v5855_v8 = vmax.f32 %v6554_v6, 0.0  ;;  %5944 = vadd.xlane.f32.xlu1 %v5917_v0  ;;  %v6557_v22 = vadd.f32 %v8656_v59, %v5706_v41  ;;  %v5708_v42 = vpop.f32.mrb[45].mxu1 }
 0x27b   :  { %v5880_v49 = vmul.f32 %v8579_v56, %v5854_v29  ;;  %v6561_v21 = vadd.f32 %v8662_v3, %v5708_v42  ;;  %v5710_v47 = vpop.f32.mrb[46].mxu1 }
 0x27c   :  { %v5903_v34 = vmul.f32 %v8586_v45, %v5855_v8  ;;  %v5819_v62 = vpop.f32.mrb[44].mxu0  ;;  %v5918_v4 = vadd.f32 %v5902_v18, %v5879_v46  ;;  %v6565_v35 = vadd.f32 %v8665_v28, %v5710_v47  ;;  %v5712_v19 = vpop.f32.mrb[47].mxu1 }
 0x27d   :  { %v6558_v60 = vadd.f32 %v6557_v22, %v5819_v62  ;;  %v5821_v33 = vpop.f32.mrb[45].mxu0  ;;  %v6569_v23 = vadd.f32 %v8668_v51, %v5712_v19 }
 0x27e   :  { %v6562_v57 = vadd.f32 %v6561_v21, %v5821_v33  ;;  %v5823_v55 = vpop.f32.mrb[46].mxu0  ;;  %5946 = vadd.xlane.f32.xlu1 %v5918_v4  ;;  %v5919_v5 = vadd.f32 %v5903_v34, %v5880_v49 }
 0x27f   :  { %v5856_v59 = vmax.f32 %v6558_v60, 0.0  ;;  %v6566_v48 = vadd.f32 %v6565_v35, %v5823_v55  ;;  %v5825_v58 = vpop.f32.mrb[47].mxu0 }
 0x280   :  { %v5857_v13 = vmax.f32 %v6562_v57, 0.0  ;;  %v6570_v2 = vadd.f32 %v6569_v23, %v5825_v58 }
 0x281   :  { %v5858_v14 = vmax.f32 %v6566_v48, 0.0  ;;  %v5881_v3 = vmul.f32 %v8579_v56, %v5856_v59 }
 0x282   :  { %v5904_v20 = vmul.f32 %v8586_v45, %v5857_v13  ;;  %v5859_v44 = vmax.f32 %v6570_v2, 0.0  ;;  %5948 = vadd.xlane.f32.xlu1 %v5919_v5 }
 0x283   :  { %v5882_v28 = vmul.f32 %v8579_v56, %v5858_v14 }
 0x284   :  { %v5905_v26 = vmul.f32 %v8586_v45, %v5859_v44  ;;  %v5920_v7 = vadd.f32 %v5904_v20, %v5881_v3 }
 0x286   :  { %5950 = vadd.xlane.f32.xlu1 %v5920_v7  ;;  %v5921_v51 = vadd.f32 %v5905_v26, %v5882_v28 }
 0x28a   :  { %5952 = vadd.xlane.f32.xlu1 %v5921_v51 }
 0x2d8   :  { %v5923_v43 = vpop.xlane.xlu0 %5922 }
 0x2d9   :  { %v5956_v32 = vadd.f32 %v8710_v63, %v5923_v43 }
 0x2db   :  { %v5993_v10 = vrot.slane %v5956_v32, %v8715_v24 }
 0x2dc   :  { %v5925_v16 = vpop.xlane.xlu0 %5924 }
 0x2dd   :  { %v5957_v56 = vadd.f32 %v8710_v63, %v5925_v16 }
 0x2df   :  { %v5997_v61 = vrot.slane %v5957_v56, %v8715_v24 }
 0x2e0   :  { %v5927_v9 = vpop.xlane.xlu0 %5926 }
 0x2e1   :  { %v5958_v45 = vadd.f32 %v8710_v63, %v5927_v9  ;;  %v6055_v0 = vsel %vm6054_vm0, %v5997_v61, %v5993_v10 }
 0x2e3   :  { %v6001_v37 = vrot.slane %v5958_v45, %v8715_v24 }
 0x2e4   :  { %v5929_v12 = vpop.xlane.xlu0 %5928 }
 0x2e5   :  { %v5959_v17 = vadd.f32 %v8710_v63, %v5929_v12  ;;  %v6057_v30 = vsel %vm6056_vm1, %v6001_v37, %v6055_v0 }
 0x2e7   :  { %v6005_v52 = vrot.slane %v5959_v17, %v8715_v24 }
 0x2e9   :  { %v5931_v31 = vpop.xlane.xlu0 %5930  ;;  %v6059_v6 = vsel %vm6058_vm2, %v6005_v52, %v6057_v30 }
 0x2ea   :  { %v5960_v25 = vadd.f32 %v8710_v63, %v5931_v31 }
 0x2ec   :  { %v6009_v36 = vrot.slane %v5960_v25, %v8715_v24 }
 0x2ed   :  { %v5933_v50 = vpop.xlane.xlu0 %5932 }
 0x2ee   :  { %v5961_v53 = vadd.f32 %v8710_v63, %v5933_v50  ;;  %v6061_v46 = vsel %vm6060_vm3, %v6009_v36, %v6059_v6 }
 0x2f0   :  { %v6013_v39 = vrot.slane %v5961_v53, %v8715_v24 }
 0x2f2   :  { %v5935_v54 = vpop.xlane.xlu0 %5934  ;;  %v6063_v18 = vsel %vm6062_vm4, %v6013_v39, %v6061_v46 }
 0x2f3   :  { %v5962_v40 = vadd.f32 %v8710_v63, %v5935_v54 }
 0x2f5   :  { %v6017_v15 = vrot.slane %v5962_v40, %v8715_v24 }
 0x2f6   :  { %v5937_v11 = vpop.xlane.xlu0 %5936 }
 0x2f7   :  { %v5963_v29 = vadd.f32 %v8710_v63, %v5937_v11  ;;  %v6065_v41 = vsel %vm6064_vm5, %v6017_v15, %v6063_v18 }
 0x2f9   :  { %v6021_v8 = vrot.slane %v5963_v29, %v8715_v24 }
 0x2fa   :  { %v5939_v49 = vpop.xlane.xlu1 %5938 }
 0x2fb   :  { %v6067_v22 = vsel %vm6066_vm6, %v6021_v8, %v6065_v41  ;;  %v5964_v33 = vadd.f32 %v8710_v63, %v5939_v49 }
 0x2fc   :  { %6078 = vst.msk [vmem:[%s8775_s6] sm:$0xff] %vm6077_vm7, %v6067_v22 }
 0x2fd   :  { %v6025_v59 = vrot.slane %v5964_v33, %v8715_v24 }
 0x2fe   :  { %v5941_v42 = vpop.xlane.xlu1 %5940 }
 0x2ff   :  { %v5965_v47 = vadd.f32 %v8710_v63, %v5941_v42 }
 0x301   :  { %v6029_v57 = vrot.slane %v5965_v47, %v8715_v24 }
 0x303   :  { %v5943_v34 = vpop.xlane.xlu1 %5942  ;;  %v6068_v2 = vsel %vm6054_vm0, %v6029_v57, %v6025_v59 }
 0x304   :  { %v5966_v4 = vadd.f32 %v8710_v63, %v5943_v34 }
 0x306   :  { %v6033_v23 = vrot.slane %v5966_v4, %v8715_v24 }
 0x307   :  { %v5945_v62 = vpop.xlane.xlu1 %5944 }
 0x308   :  { %v5967_v35 = vadd.f32 %v8710_v63, %v5945_v62  ;;  %v6069_v3 = vsel %vm6056_vm1, %v6033_v23, %v6068_v2 }
 0x30a   :  { %v6037_v48 = vrot.slane %v5967_v35, %v8715_v24 }
 0x30b   :  { %v5947_v21 = vpop.xlane.xlu1 %5946 }
 0x30c   :  { %v5968_v19 = vadd.f32 %v8710_v63, %v5947_v21  ;;  %v6070_v28 = vsel %vm6058_vm2, %v6037_v48, %v6069_v3 }
 0x30e   :  { %v6041_v13 = vrot.slane %v5968_v19, %v8715_v24 }
 0x30f   :  { %v5949_v60 = vpop.xlane.xlu1 %5948 }
 0x310   :  { %v5969_v55 = vadd.f32 %v8710_v63, %v5949_v60  ;;  %v6071_v7 = vsel %vm6060_vm3, %v6041_v13, %v6070_v28 }
 0x312   :  { %v6045_v14 = vrot.slane %v5969_v55, %v8715_v24 }
 0x313   :  { %v5951_v5 = vpop.xlane.xlu1 %5950 }
 0x314   :  { %v5970_v58 = vadd.f32 %v8710_v63, %v5951_v5  ;;  %v6072_v51 = vsel %vm6062_vm4, %v6045_v14, %v6071_v7 }
 0x316   :  { %v6049_v20 = vrot.slane %v5970_v58, %v8715_v24 }
 0x317   :  { %v5953_v44 = vpop.xlane.xlu1 %5952 }
 0x318   :  { %v5971_v26 = vadd.f32 %v8710_v63, %v5953_v44  ;;  %v6073_v16 = vsel %vm6064_vm5, %v6049_v20, %v6072_v51 }
 0x31a   :  { %v6053_v43 = vrot.slane %v5971_v26, %v8715_v24 }
 0x31c   :  { %v6074_v9 = vsel %vm6066_vm6, %v6053_v43, %v6073_v16 }
 0x31d   :  { %6079 = vst.msk [vmem:[%s8775_s6 + $0x8] sm:$0xff] %vm6077_vm7, %v6074_v9 }
 0x31e   :  { %6084 = vsyncpa [#allocation4], 1 }
 0x31f   :  { %6085 = vsyncpa [#allocation6], 1 }

</bundles_post_ra>
